<compile_context>
chip_gen: v7x
topology: tpu7x:2x2x1
jax: 0.10.0
libtpu: 0.0.40
codegen_flags: <defaults>
</compile_context>

<pallas_src>
import jax
import jax.numpy as jnp
from jax.experimental import pallas as pl
from jax.experimental.pallas import tpu as pltpu  # noqa: F401  (TPU backend)

# ----------------------------- model sizes (small) -----------------------------
BATCH = 4
INPUT_SIZE = 16      # encoder input feature size
HIDDEN = 32          # LSTM hidden size (both layers, both LSTMs)
OUTPUT_SIZE = 16     # decoder input size == fc output size (like the PyTorch module)
NUM_LAYERS = 2       # fixed at 2 (matches the module)
SEQ_X = 8            # encoder sequence length
SEQ_Y = 6            # decoder (target) sequence length


# ------------------------------- kernel helpers --------------------------------
def _fused_lstm_cell(xh, c, w, b):
    """One PyTorch-semantics LSTM step.

    xh = concat([input, h], -1): (B, Fin+H).   c: (B, H).
    w  = concat([W_ih^T, W_hh^T], 0): (Fin+H, 4H).   b = b_ih + b_hh: (1, 4H).

    Single MXU push per cell; two full-width EUP evaluations (sigmoid / tanh over
    the whole gate vector) instead of four masked quarter-width ones.
    """
    H = c.shape[-1]
    gates = jnp.dot(xh, w, preferred_element_type=jnp.float32) + b   # (B, 4H)
    sig = jax.nn.sigmoid(gates)
    tnh = jnp.tanh(gates)
    i = sig[:, 0 * H:1 * H]
    f = sig[:, 1 * H:2 * H]
    g = tnh[:, 2 * H:3 * H]
    o = sig[:, 3 * H:4 * H]
    c_new = f * c + i * g
    h_new = o * jnp.tanh(c_new)
    return h_new, c_new


# ------------------------------ fused Seq2Seq kernel ----------------------------
def seq2seq_kernel(x_ref, y_ref,                       # (B, Tx, I), (B, Ty, O)
                   ew0_ref, eb0_ref, ew1_ref, eb1_ref,  # encoder layer 0/1 fused W, bias
                   dw0_ref, db0_ref, dw1_ref, db1_ref,  # decoder layer 0/1 fused W, bias
                   wfc_ref, bfc_ref,                    # fc: (H, O), (1, O)
                   out_ref):                            # (B, Ty, O)
    B, Tx, _ = x_ref.shape
    _, Ty, O = y_ref.shape
    H = HIDDEN

    # Load every weight exactly once; they stay resident for the whole recurrence.
    ew0 = ew0_ref[...]; eb0 = eb0_ref[...]
    ew1 = ew1_ref[...]; eb1 = eb1_ref[...]
    dw0 = dw0_ref[...]; db0 = db0_ref[...]
    dw1 = dw1_ref[...]; db1 = db1_ref[...]
    wfc = wfc_ref[...]; bfc = bfc_ref[...]

    h0 = c0 = h1 = c1 = jnp.zeros((B, H), jnp.float32)

    # ---- encoder: 2-layer LSTM over Tx steps (fully unrolled; T is tiny) ------
    for t in range(Tx):
        x_t = x_ref[:, t, :]                                          # (B, I)
        h0, c0 = _fused_lstm_cell(jnp.concatenate([x_t, h0], -1), c0, ew0, eb0)
        h1, c1 = _fused_lstm_cell(jnp.concatenate([h0, h1], -1), c1, ew1, eb1)

    # ---- decoder: 2-layer LSTM + fc head, teacher forcing on y ----------------
    dec_in = jnp.zeros((B, O), jnp.float32)                           # step 0 input
    for t in range(Ty):
        h0, c0 = _fused_lstm_cell(jnp.concatenate([dec_in, h0], -1), c0, dw0, db0)
        h1, c1 = _fused_lstm_cell(jnp.concatenate([h0, h1], -1), c1, dw1, db1)
        out_ref[:, t, :] = (jnp.dot(h1, wfc, preferred_element_type=jnp.float32)
                            + bfc)
        if t + 1 < Ty:                                                # teacher forcing
            dec_in = y_ref[:, t, :]


def seq2seq_forward(x, y, params):
    """x: (B, Tx, I) batch-first.  y: (B, Ty, O) batch-first.  -> (B, Ty, O)."""
    B, Ty, O = y.shape
    return pl.pallas_call(
        seq2seq_kernel,
        out_shape=jax.ShapeDtypeStruct((B, Ty, O), jnp.float32),
        # no grid / no BlockSpecs: every operand is a single whole-array VMEM block
    )(x, y, *params)


seq2seq_forward_jit = jax.jit(seq2seq_forward)


# ------------------------------ parameter init ----------------------------------
def init_params(key):
    H, I, O = HIDDEN, INPUT_SIZE, OUTPUT_SIZE
    bound = 1.0 / (H ** 0.5)
    ks = jax.random.split(key, 10)

    def u(k, shape):
        return jax.random.uniform(k, shape, jnp.float32, -bound, bound)

    # fused [W_ih^T ; W_hh^T] weights, combined (b_ih + b_hh) biases
    ew0 = u(ks[0], (I + H, 4 * H)); eb0 = u(ks[1], (1, 4 * H))      # encoder layer 0
    ew1 = u(ks[2], (2 * H, 4 * H)); eb1 = u(ks[3], (1, 4 * H))      # encoder layer 1
    dw0 = u(ks[4], (O + H, 4 * H)); db0 = u(ks[5], (1, 4 * H))      # decoder layer 0
    dw1 = u(ks[6], (2 * H, 4 * H)); db1 = u(ks[7], (1, 4 * H))      # decoder layer 1
    wfc = u(ks[8], (H, O));         bfc = u(ks[9], (1, O))          # fc head
    return (ew0, eb0, ew1, eb1, dw0, db0, dw1, db1, wfc, bfc)


# ------------------------------ pure-JAX reference -------------------------------
def _ref_cell(x, h, c, w, b):
    H = h.shape[-1]
    fin = x.shape[-1]
    g = x @ w[:fin] + h @ w[fin:] + b
    i = jax.nn.sigmoid(g[:, :H])
    f = jax.nn.sigmoid(g[:, H:2 * H])
    gg = jnp.tanh(g[:, 2 * H:3 * H])
    o = jax.nn.sigmoid(g[:, 3 * H:])
    c_new = f * c + i * gg
    return o * jnp.tanh(c_new), c_new


def seq2seq_reference(x, y, params):
    ew0, eb0, ew1, eb1, dw0, db0, dw1, db1, wfc, bfc = params
    B, Ty, O = y.shape
    H = HIDDEN
    h0 = c0 = h1 = c1 = jnp.zeros((B, H), jnp.float32)
    for t in range(x.shape[1]):
        h0, c0 = _ref_cell(x[:, t, :], h0, c0, ew0, eb0)
        h1, c1 = _ref_cell(h0, h1, c1, ew1, eb1)
    dec_in = jnp.zeros((B, O), jnp.float32)
    outs = []
    for t in range(Ty):
        h0, c0 = _ref_cell(dec_in, h0, c0, dw0, db0)
        h1, c1 = _ref_cell(h0, h1, c1, dw1, db1)
        outs.append(h1 @ wfc + bfc)
        dec_in = y[:, t, :]
    return jnp.stack(outs, axis=1)


# ------------------------------------ main ---------------------------------------
if __name__ == "__main__":
    key = jax.random.PRNGKey(0)
    k_p, k_x, k_y = jax.random.split(key, 3)
    params = init_params(k_p)

    x = jax.random.normal(k_x, (BATCH, SEQ_X, INPUT_SIZE), jnp.float32)
    y = jax.random.normal(k_y, (BATCH, SEQ_Y, OUTPUT_SIZE), jnp.float32)

    out = jax.block_until_ready(seq2seq_forward_jit(x, y, params))

    ref = seq2seq_reference(x, y, params)
    assert out.shape == (BATCH, SEQ_Y, OUTPUT_SIZE), out.shape
    assert jnp.allclose(out, ref, atol=1e-4, rtol=1e-4), float(jnp.abs(out - ref).max())

    print("KERNEL_OK")
</pallas_src>

<mosaic_0001>
module attributes {stable_mosaic.version = 11 : i64} {
  func.func @seq2seq_kernel(%arg0: memref<4x8x16xf32, #tpu.memory_space<vmem>>, %arg1: memref<4x6x16xf32, #tpu.memory_space<vmem>>, %arg2: memref<48x128xf32, #tpu.memory_space<vmem>>, %arg3: memref<1x128xf32, #tpu.memory_space<vmem>>, %arg4: memref<64x128xf32, #tpu.memory_space<vmem>>, %arg5: memref<1x128xf32, #tpu.memory_space<vmem>>, %arg6: memref<48x128xf32, #tpu.memory_space<vmem>>, %arg7: memref<1x128xf32, #tpu.memory_space<vmem>>, %arg8: memref<64x128xf32, #tpu.memory_space<vmem>>, %arg9: memref<1x128xf32, #tpu.memory_space<vmem>>, %arg10: memref<32x16xf32, #tpu.memory_space<vmem>>, %arg11: memref<1x16xf32, #tpu.memory_space<vmem>>, %arg12: memref<4x6x16xf32, #tpu.memory_space<vmem>>) attributes {dimension_semantics = [], scalar_prefetch = 0 : i64, scratch_operands = 0 : i64, tpu.core_type = #tpu.core_type<tc>} {
    %c0 = arith.constant 0 : index
    %c0_0 = arith.constant 0 : index
    %0 = vector.load %arg2[%c0, %c0_0] : memref<48x128xf32, #tpu.memory_space<vmem>>, vector<48x128xf32>
    %c0_1 = arith.constant 0 : index
    %c0_2 = arith.constant 0 : index
    %1 = vector.load %arg3[%c0_1, %c0_2] : memref<1x128xf32, #tpu.memory_space<vmem>>, vector<1x128xf32>
    %c0_3 = arith.constant 0 : index
    %c0_4 = arith.constant 0 : index
    %2 = vector.load %arg4[%c0_3, %c0_4] : memref<64x128xf32, #tpu.memory_space<vmem>>, vector<64x128xf32>
    %c0_5 = arith.constant 0 : index
    %c0_6 = arith.constant 0 : index
    %3 = vector.load %arg5[%c0_5, %c0_6] : memref<1x128xf32, #tpu.memory_space<vmem>>, vector<1x128xf32>
    %c0_7 = arith.constant 0 : index
    %c0_8 = arith.constant 0 : index
    %4 = vector.load %arg6[%c0_7, %c0_8] : memref<48x128xf32, #tpu.memory_space<vmem>>, vector<48x128xf32>
    %c0_9 = arith.constant 0 : index
    %c0_10 = arith.constant 0 : index
    %5 = vector.load %arg7[%c0_9, %c0_10] : memref<1x128xf32, #tpu.memory_space<vmem>>, vector<1x128xf32>
    %c0_11 = arith.constant 0 : index
    %c0_12 = arith.constant 0 : index
    %6 = vector.load %arg8[%c0_11, %c0_12] : memref<64x128xf32, #tpu.memory_space<vmem>>, vector<64x128xf32>
    %c0_13 = arith.constant 0 : index
    %c0_14 = arith.constant 0 : index
    %7 = vector.load %arg9[%c0_13, %c0_14] : memref<1x128xf32, #tpu.memory_space<vmem>>, vector<1x128xf32>
    %c0_15 = arith.constant 0 : index
    %c0_16 = arith.constant 0 : index
    %8 = vector.load %arg10[%c0_15, %c0_16] : memref<32x16xf32, #tpu.memory_space<vmem>>, vector<32x16xf32>
    %c0_17 = arith.constant 0 : index
    %c0_18 = arith.constant 0 : index
    %9 = vector.load %arg11[%c0_17, %c0_18] : memref<1x16xf32, #tpu.memory_space<vmem>>, vector<1x16xf32>
    %cst = arith.constant 0.000000e+00 : f32
    %10 = vector.broadcast %cst : f32 to vector<4x32xf32>
    %c0_19 = arith.constant 0 : index
    %c0_20 = arith.constant 0 : index
    %c0_21 = arith.constant 0 : index
    %11 = vector.load %arg0[%c0_19, %c0_20, %c0_21] : memref<4x8x16xf32, #tpu.memory_space<vmem>>, vector<4x1x16xf32>
    %12 = vector.shape_cast %11 : vector<4x1x16xf32> to vector<4x16xf32>
    %13 = tpu.concatenate %12, %10 in 1 : vector<4x16xf32>, vector<4x32xf32> -> vector<4x48xf32>
    %cst_22 = arith.constant dense<0.000000e+00> : vector<4x128xf32>
    %14 = tpu.matmul %13, %0, %cst_22 {dimension_numbers = #tpu.dot_dimension_numbers<[1], [0], [0], [1], [0, 0, 1, 1], [], []>} : vector<4x48xf32>, vector<48x128xf32>, vector<4x128xf32> -> vector<4x128xf32>
    %15 = vector.broadcast %1 : vector<1x128xf32> to vector<4x128xf32>
    %16 = arith.addf %14, %15 : vector<4x128xf32>
    %17 = arith.negf %16 : vector<4x128xf32>
    %18 = math.exp %17 : vector<4x128xf32>
    %cst_23 = arith.constant 1.000000e+00 : f32
    %19 = vector.broadcast %cst_23 : f32 to vector<4x128xf32>
    %20 = arith.addf %19, %18 : vector<4x128xf32>
    %21 = arith.divf %19, %20 : vector<4x128xf32>
    %22 = math.tanh %16 : vector<4x128xf32>
    %23 = vector.extract_strided_slice %21 {offsets = [0, 0], sizes = [4, 32], strides = [1, 1]} : vector<4x128xf32> to vector<4x32xf32>
    %24 = vector.extract_strided_slice %21 {offsets = [0, 32], sizes = [4, 32], strides = [1, 1]} : vector<4x128xf32> to vector<4x32xf32>
    %25 = vector.extract_strided_slice %22 {offsets = [0, 64], sizes = [4, 32], strides = [1, 1]} : vector<4x128xf32> to vector<4x32xf32>
    %26 = vector.extract_strided_slice %21 {offsets = [0, 96], sizes = [4, 32], strides = [1, 1]} : vector<4x128xf32> to vector<4x32xf32>
    %27 = arith.mulf %24, %10 : vector<4x32xf32>
    %28 = arith.mulf %23, %25 : vector<4x32xf32>
    %29 = arith.addf %27, %28 : vector<4x32xf32>
    %30 = math.tanh %29 : vector<4x32xf32>
    %31 = arith.mulf %26, %30 : vector<4x32xf32>
    %32 = tpu.concatenate %31, %10 in 1 : vector<4x32xf32>, vector<4x32xf32> -> vector<4x64xf32>
    %cst_24 = arith.constant dense<0.000000e+00> : vector<4x128xf32>
    %33 = tpu.matmul %32, %2, %cst_24 {dimension_numbers = #tpu.dot_dimension_numbers<[1], [0], [0], [1], [0, 0, 1, 1], [], []>} : vector<4x64xf32>, vector<64x128xf32>, vector<4x128xf32> -> vector<4x128xf32>
    %34 = vector.broadcast %3 : vector<1x128xf32> to vector<4x128xf32>
    %35 = arith.addf %33, %34 : vector<4x128xf32>
    %36 = arith.negf %35 : vector<4x128xf32>
    %37 = math.exp %36 : vector<4x128xf32>
    %cst_25 = arith.constant 1.000000e+00 : f32
    %38 = vector.broadcast %cst_25 : f32 to vector<4x128xf32>
    %39 = arith.addf %38, %37 : vector<4x128xf32>
    %40 = arith.divf %38, %39 : vector<4x128xf32>
    %41 = math.tanh %35 : vector<4x128xf32>
    %42 = vector.extract_strided_slice %40 {offsets = [0, 0], sizes = [4, 32], strides = [1, 1]} : vector<4x128xf32> to vector<4x32xf32>
    %43 = vector.extract_strided_slice %40 {offsets = [0, 32], sizes = [4, 32], strides = [1, 1]} : vector<4x128xf32> to vector<4x32xf32>
    %44 = vector.extract_strided_slice %41 {offsets = [0, 64], sizes = [4, 32], strides = [1, 1]} : vector<4x128xf32> to vector<4x32xf32>
    %45 = vector.extract_strided_slice %40 {offsets = [0, 96], sizes = [4, 32], strides = [1, 1]} : vector<4x128xf32> to vector<4x32xf32>
    %46 = arith.mulf %43, %10 : vector<4x32xf32>
    %47 = arith.mulf %42, %44 : vector<4x32xf32>
    %48 = arith.addf %46, %47 : vector<4x32xf32>
    %49 = math.tanh %48 : vector<4x32xf32>
    %50 = arith.mulf %45, %49 : vector<4x32xf32>
    %c0_26 = arith.constant 0 : index
    %c1 = arith.constant 1 : index
    %c0_27 = arith.constant 0 : index
    %51 = vector.load %arg0[%c0_26, %c1, %c0_27] : memref<4x8x16xf32, #tpu.memory_space<vmem>>, vector<4x1x16xf32>
    %52 = vector.shape_cast %51 : vector<4x1x16xf32> to vector<4x16xf32>
    %53 = tpu.concatenate %52, %31 in 1 : vector<4x16xf32>, vector<4x32xf32> -> vector<4x48xf32>
    %cst_28 = arith.constant dense<0.000000e+00> : vector<4x128xf32>
    %54 = tpu.matmul %53, %0, %cst_28 {dimension_numbers = #tpu.dot_dimension_numbers<[1], [0], [0], [1], [0, 0, 1, 1], [], []>} : vector<4x48xf32>, vector<48x128xf32>, vector<4x128xf32> -> vector<4x128xf32>
    %55 = vector.broadcast %1 : vector<1x128xf32> to vector<4x128xf32>
    %56 = arith.addf %54, %55 : vector<4x128xf32>
    %57 = arith.negf %56 : vector<4x128xf32>
    %58 = math.exp %57 : vector<4x128xf32>
    %cst_29 = arith.constant 1.000000e+00 : f32
    %59 = vector.broadcast %cst_29 : f32 to vector<4x128xf32>
    %60 = arith.addf %59, %58 : vector<4x128xf32>
    %61 = arith.divf %59, %60 : vector<4x128xf32>
    %62 = math.tanh %56 : vector<4x128xf32>
    %63 = vector.extract_strided_slice %61 {offsets = [0, 0], sizes = [4, 32], strides = [1, 1]} : vector<4x128xf32> to vector<4x32xf32>
    %64 = vector.extract_strided_slice %61 {offsets = [0, 32], sizes = [4, 32], strides = [1, 1]} : vector<4x128xf32> to vector<4x32xf32>
    %65 = vector.extract_strided_slice %62 {offsets = [0, 64], sizes = [4, 32], strides = [1, 1]} : vector<4x128xf32> to vector<4x32xf32>
    %66 = vector.extract_strided_slice %61 {offsets = [0, 96], sizes = [4, 32], strides = [1, 1]} : vector<4x128xf32> to vector<4x32xf32>
    %67 = arith.mulf %64, %29 : vector<4x32xf32>
    %68 = arith.mulf %63, %65 : vector<4x32xf32>
    %69 = arith.addf %67, %68 : vector<4x32xf32>
    %70 = math.tanh %69 : vector<4x32xf32>
    %71 = arith.mulf %66, %70 : vector<4x32xf32>
    %72 = tpu.concatenate %71, %50 in 1 : vector<4x32xf32>, vector<4x32xf32> -> vector<4x64xf32>
    %cst_30 = arith.constant dense<0.000000e+00> : vector<4x128xf32>
    %73 = tpu.matmul %72, %2, %cst_30 {dimension_numbers = #tpu.dot_dimension_numbers<[1], [0], [0], [1], [0, 0, 1, 1], [], []>} : vector<4x64xf32>, vector<64x128xf32>, vector<4x128xf32> -> vector<4x128xf32>
    %74 = vector.broadcast %3 : vector<1x128xf32> to vector<4x128xf32>
    %75 = arith.addf %73, %74 : vector<4x128xf32>
    %76 = arith.negf %75 : vector<4x128xf32>
    %77 = math.exp %76 : vector<4x128xf32>
    %cst_31 = arith.constant 1.000000e+00 : f32
    %78 = vector.broadcast %cst_31 : f32 to vector<4x128xf32>
    %79 = arith.addf %78, %77 : vector<4x128xf32>
    %80 = arith.divf %78, %79 : vector<4x128xf32>
    %81 = math.tanh %75 : vector<4x128xf32>
    %82 = vector.extract_strided_slice %80 {offsets = [0, 0], sizes = [4, 32], strides = [1, 1]} : vector<4x128xf32> to vector<4x32xf32>
    %83 = vector.extract_strided_slice %80 {offsets = [0, 32], sizes = [4, 32], strides = [1, 1]} : vector<4x128xf32> to vector<4x32xf32>
    %84 = vector.extract_strided_slice %81 {offsets = [0, 64], sizes = [4, 32], strides = [1, 1]} : vector<4x128xf32> to vector<4x32xf32>
    %85 = vector.extract_strided_slice %80 {offsets = [0, 96], sizes = [4, 32], strides = [1, 1]} : vector<4x128xf32> to vector<4x32xf32>
    %86 = arith.mulf %83, %48 : vector<4x32xf32>
    %87 = arith.mulf %82, %84 : vector<4x32xf32>
    %88 = arith.addf %86, %87 : vector<4x32xf32>
    %89 = math.tanh %88 : vector<4x32xf32>
    %90 = arith.mulf %85, %89 : vector<4x32xf32>
    %c0_32 = arith.constant 0 : index
    %c2 = arith.constant 2 : index
    %c0_33 = arith.constant 0 : index
    %91 = vector.load %arg0[%c0_32, %c2, %c0_33] : memref<4x8x16xf32, #tpu.memory_space<vmem>>, vector<4x1x16xf32>
    %92 = vector.shape_cast %91 : vector<4x1x16xf32> to vector<4x16xf32>
    %93 = tpu.concatenate %92, %71 in 1 : vector<4x16xf32>, vector<4x32xf32> -> vector<4x48xf32>
    %cst_34 = arith.constant dense<0.000000e+00> : vector<4x128xf32>
    %94 = tpu.matmul %93, %0, %cst_34 {dimension_numbers = #tpu.dot_dimension_numbers<[1], [0], [0], [1], [0, 0, 1, 1], [], []>} : vector<4x48xf32>, vector<48x128xf32>, vector<4x128xf32> -> vector<4x128xf32>
    %95 = vector.broadcast %1 : vector<1x128xf32> to vector<4x128xf32>
    %96 = arith.addf %94, %95 : vector<4x128xf32>
    %97 = arith.negf %96 : vector<4x128xf32>
    %98 = math.exp %97 : vector<4x128xf32>
    %cst_35 = arith.constant 1.000000e+00 : f32
    %99 = vector.broadcast %cst_35 : f32 to vector<4x128xf32>
    %100 = arith.addf %99, %98 : vector<4x128xf32>
    %101 = arith.divf %99, %100 : vector<4x128xf32>
    %102 = math.tanh %96 : vector<4x128xf32>
    %103 = vector.extract_strided_slice %101 {offsets = [0, 0], sizes = [4, 32], strides = [1, 1]} : vector<4x128xf32> to vector<4x32xf32>
    %104 = vector.extract_strided_slice %101 {offsets = [0, 32], sizes = [4, 32], strides = [1, 1]} : vector<4x128xf32> to vector<4x32xf32>
    %105 = vector.extract_strided_slice %102 {offsets = [0, 64], sizes = [4, 32], strides = [1, 1]} : vector<4x128xf32> to vector<4x32xf32>
    %106 = vector.extract_strided_slice %101 {offsets = [0, 96], sizes = [4, 32], strides = [1, 1]} : vector<4x128xf32> to vector<4x32xf32>
    %107 = arith.mulf %104, %69 : vector<4x32xf32>
    %108 = arith.mulf %103, %105 : vector<4x32xf32>
    %109 = arith.addf %107, %108 : vector<4x32xf32>
    %110 = math.tanh %109 : vector<4x32xf32>
    %111 = arith.mulf %106, %110 : vector<4x32xf32>
    %112 = tpu.concatenate %111, %90 in 1 : vector<4x32xf32>, vector<4x32xf32> -> vector<4x64xf32>
    %cst_36 = arith.constant dense<0.000000e+00> : vector<4x128xf32>
    %113 = tpu.matmul %112, %2, %cst_36 {dimension_numbers = #tpu.dot_dimension_numbers<[1], [0], [0], [1], [0, 0, 1, 1], [], []>} : vector<4x64xf32>, vector<64x128xf32>, vector<4x128xf32> -> vector<4x128xf32>
    %114 = vector.broadcast %3 : vector<1x128xf32> to vector<4x128xf32>
    %115 = arith.addf %113, %114 : vector<4x128xf32>
    %116 = arith.negf %115 : vector<4x128xf32>
    %117 = math.exp %116 : vector<4x128xf32>
    %cst_37 = arith.constant 1.000000e+00 : f32
    %118 = vector.broadcast %cst_37 : f32 to vector<4x128xf32>
    %119 = arith.addf %118, %117 : vector<4x128xf32>
    %120 = arith.divf %118, %119 : vector<4x128xf32>
    %121 = math.tanh %115 : vector<4x128xf32>
    %122 = vector.extract_strided_slice %120 {offsets = [0, 0], sizes = [4, 32], strides = [1, 1]} : vector<4x128xf32> to vector<4x32xf32>
    %123 = vector.extract_strided_slice %120 {offsets = [0, 32], sizes = [4, 32], strides = [1, 1]} : vector<4x128xf32> to vector<4x32xf32>
    %124 = vector.extract_strided_slice %121 {offsets = [0, 64], sizes = [4, 32], strides = [1, 1]} : vector<4x128xf32> to vector<4x32xf32>
    %125 = vector.extract_strided_slice %120 {offsets = [0, 96], sizes = [4, 32], strides = [1, 1]} : vector<4x128xf32> to vector<4x32xf32>
    %126 = arith.mulf %123, %88 : vector<4x32xf32>
    %127 = arith.mulf %122, %124 : vector<4x32xf32>
    %128 = arith.addf %126, %127 : vector<4x32xf32>
    %129 = math.tanh %128 : vector<4x32xf32>
    %130 = arith.mulf %125, %129 : vector<4x32xf32>
    %c0_38 = arith.constant 0 : index
    %c3 = arith.constant 3 : index
    %c0_39 = arith.constant 0 : index
    %131 = vector.load %arg0[%c0_38, %c3, %c0_39] : memref<4x8x16xf32, #tpu.memory_space<vmem>>, vector<4x1x16xf32>
    %132 = vector.shape_cast %131 : vector<4x1x16xf32> to vector<4x16xf32>
    %133 = tpu.concatenate %132, %111 in 1 : vector<4x16xf32>, vector<4x32xf32> -> vector<4x48xf32>
    %cst_40 = arith.constant dense<0.000000e+00> : vector<4x128xf32>
    %134 = tpu.matmul %133, %0, %cst_40 {dimension_numbers = #tpu.dot_dimension_numbers<[1], [0], [0], [1], [0, 0, 1, 1], [], []>} : vector<4x48xf32>, vector<48x128xf32>, vector<4x128xf32> -> vector<4x128xf32>
    %135 = vector.broadcast %1 : vector<1x128xf32> to vector<4x128xf32>
    %136 = arith.addf %134, %135 : vector<4x128xf32>
    %137 = arith.negf %136 : vector<4x128xf32>
    %138 = math.exp %137 : vector<4x128xf32>
    %cst_41 = arith.constant 1.000000e+00 : f32
    %139 = vector.broadcast %cst_41 : f32 to vector<4x128xf32>
    %140 = arith.addf %139, %138 : vector<4x128xf32>
    %141 = arith.divf %139, %140 : vector<4x128xf32>
    %142 = math.tanh %136 : vector<4x128xf32>
    %143 = vector.extract_strided_slice %141 {offsets = [0, 0], sizes = [4, 32], strides = [1, 1]} : vector<4x128xf32> to vector<4x32xf32>
    %144 = vector.extract_strided_slice %141 {offsets = [0, 32], sizes = [4, 32], strides = [1, 1]} : vector<4x128xf32> to vector<4x32xf32>
    %145 = vector.extract_strided_slice %142 {offsets = [0, 64], sizes = [4, 32], strides = [1, 1]} : vector<4x128xf32> to vector<4x32xf32>
    %146 = vector.extract_strided_slice %141 {offsets = [0, 96], sizes = [4, 32], strides = [1, 1]} : vector<4x128xf32> to vector<4x32xf32>
    %147 = arith.mulf %144, %109 : vector<4x32xf32>
    %148 = arith.mulf %143, %145 : vector<4x32xf32>
    %149 = arith.addf %147, %148 : vector<4x32xf32>
    %150 = math.tanh %149 : vector<4x32xf32>
    %151 = arith.mulf %146, %150 : vector<4x32xf32>
    %152 = tpu.concatenate %151, %130 in 1 : vector<4x32xf32>, vector<4x32xf32> -> vector<4x64xf32>
    %cst_42 = arith.constant dense<0.000000e+00> : vector<4x128xf32>
    %153 = tpu.matmul %152, %2, %cst_42 {dimension_numbers = #tpu.dot_dimension_numbers<[1], [0], [0], [1], [0, 0, 1, 1], [], []>} : vector<4x64xf32>, vector<64x128xf32>, vector<4x128xf32> -> vector<4x128xf32>
    %154 = vector.broadcast %3 : vector<1x128xf32> to vector<4x128xf32>
    %155 = arith.addf %153, %154 : vector<4x128xf32>
    %156 = arith.negf %155 : vector<4x128xf32>
    %157 = math.exp %156 : vector<4x128xf32>
    %cst_43 = arith.constant 1.000000e+00 : f32
    %158 = vector.broadcast %cst_43 : f32 to vector<4x128xf32>
    %159 = arith.addf %158, %157 : vector<4x128xf32>
    %160 = arith.divf %158, %159 : vector<4x128xf32>
    %161 = math.tanh %155 : vector<4x128xf32>
    %162 = vector.extract_strided_slice %160 {offsets = [0, 0], sizes = [4, 32], strides = [1, 1]} : vector<4x128xf32> to vector<4x32xf32>
    %163 = vector.extract_strided_slice %160 {offsets = [0, 32], sizes = [4, 32], strides = [1, 1]} : vector<4x128xf32> to vector<4x32xf32>
    %164 = vector.extract_strided_slice %161 {offsets = [0, 64], sizes = [4, 32], strides = [1, 1]} : vector<4x128xf32> to vector<4x32xf32>
    %165 = vector.extract_strided_slice %160 {offsets = [0, 96], sizes = [4, 32], strides = [1, 1]} : vector<4x128xf32> to vector<4x32xf32>
    %166 = arith.mulf %163, %128 : vector<4x32xf32>
    %167 = arith.mulf %162, %164 : vector<4x32xf32>
    %168 = arith.addf %166, %167 : vector<4x32xf32>
    %169 = math.tanh %168 : vector<4x32xf32>
    %170 = arith.mulf %165, %169 : vector<4x32xf32>
    %c0_44 = arith.constant 0 : index
    %c4 = arith.constant 4 : index
    %c0_45 = arith.constant 0 : index
    %171 = vector.load %arg0[%c0_44, %c4, %c0_45] : memref<4x8x16xf32, #tpu.memory_space<vmem>>, vector<4x1x16xf32>
    %172 = vector.shape_cast %171 : vector<4x1x16xf32> to vector<4x16xf32>
    %173 = tpu.concatenate %172, %151 in 1 : vector<4x16xf32>, vector<4x32xf32> -> vector<4x48xf32>
    %cst_46 = arith.constant dense<0.000000e+00> : vector<4x128xf32>
    %174 = tpu.matmul %173, %0, %cst_46 {dimension_numbers = #tpu.dot_dimension_numbers<[1], [0], [0], [1], [0, 0, 1, 1], [], []>} : vector<4x48xf32>, vector<48x128xf32>, vector<4x128xf32> -> vector<4x128xf32>
    %175 = vector.broadcast %1 : vector<1x128xf32> to vector<4x128xf32>
    %176 = arith.addf %174, %175 : vector<4x128xf32>
    %177 = arith.negf %176 : vector<4x128xf32>
    %178 = math.exp %177 : vector<4x128xf32>
    %cst_47 = arith.constant 1.000000e+00 : f32
    %179 = vector.broadcast %cst_47 : f32 to vector<4x128xf32>
    %180 = arith.addf %179, %178 : vector<4x128xf32>
    %181 = arith.divf %179, %180 : vector<4x128xf32>
    %182 = math.tanh %176 : vector<4x128xf32>
    %183 = vector.extract_strided_slice %181 {offsets = [0, 0], sizes = [4, 32], strides = [1, 1]} : vector<4x128xf32> to vector<4x32xf32>
    %184 = vector.extract_strided_slice %181 {offsets = [0, 32], sizes = [4, 32], strides = [1, 1]} : vector<4x128xf32> to vector<4x32xf32>
    %185 = vector.extract_strided_slice %182 {offsets = [0, 64], sizes = [4, 32], strides = [1, 1]} : vector<4x128xf32> to vector<4x32xf32>
    %186 = vector.extract_strided_slice %181 {offsets = [0, 96], sizes = [4, 32], strides = [1, 1]} : vector<4x128xf32> to vector<4x32xf32>
    %187 = arith.mulf %184, %149 : vector<4x32xf32>
    %188 = arith.mulf %183, %185 : vector<4x32xf32>
    %189 = arith.addf %187, %188 : vector<4x32xf32>
    %190 = math.tanh %189 : vector<4x32xf32>
    %191 = arith.mulf %186, %190 : vector<4x32xf32>
    %192 = tpu.concatenate %191, %170 in 1 : vector<4x32xf32>, vector<4x32xf32> -> vector<4x64xf32>
    %cst_48 = arith.constant dense<0.000000e+00> : vector<4x128xf32>
    %193 = tpu.matmul %192, %2, %cst_48 {dimension_numbers = #tpu.dot_dimension_numbers<[1], [0], [0], [1], [0, 0, 1, 1], [], []>} : vector<4x64xf32>, vector<64x128xf32>, vector<4x128xf32> -> vector<4x128xf32>
    %194 = vector.broadcast %3 : vector<1x128xf32> to vector<4x128xf32>
    %195 = arith.addf %193, %194 : vector<4x128xf32>
    %196 = arith.negf %195 : vector<4x128xf32>
    %197 = math.exp %196 : vector<4x128xf32>
    %cst_49 = arith.constant 1.000000e+00 : f32
    %198 = vector.broadcast %cst_49 : f32 to vector<4x128xf32>
    %199 = arith.addf %198, %197 : vector<4x128xf32>
    %200 = arith.divf %198, %199 : vector<4x128xf32>
    %201 = math.tanh %195 : vector<4x128xf32>
    %202 = vector.extract_strided_slice %200 {offsets = [0, 0], sizes = [4, 32], strides = [1, 1]} : vector<4x128xf32> to vector<4x32xf32>
    %203 = vector.extract_strided_slice %200 {offsets = [0, 32], sizes = [4, 32], strides = [1, 1]} : vector<4x128xf32> to vector<4x32xf32>
    %204 = vector.extract_strided_slice %201 {offsets = [0, 64], sizes = [4, 32], strides = [1, 1]} : vector<4x128xf32> to vector<4x32xf32>
    %205 = vector.extract_strided_slice %200 {offsets = [0, 96], sizes = [4, 32], strides = [1, 1]} : vector<4x128xf32> to vector<4x32xf32>
    %206 = arith.mulf %203, %168 : vector<4x32xf32>
    %207 = arith.mulf %202, %204 : vector<4x32xf32>
    %208 = arith.addf %206, %207 : vector<4x32xf32>
    %209 = math.tanh %208 : vector<4x32xf32>
    %210 = arith.mulf %205, %209 : vector<4x32xf32>
    %c0_50 = arith.constant 0 : index
    %c5 = arith.constant 5 : index
    %c0_51 = arith.constant 0 : index
    %211 = vector.load %arg0[%c0_50, %c5, %c0_51] : memref<4x8x16xf32, #tpu.memory_space<vmem>>, vector<4x1x16xf32>
    %212 = vector.shape_cast %211 : vector<4x1x16xf32> to vector<4x16xf32>
    %213 = tpu.concatenate %212, %191 in 1 : vector<4x16xf32>, vector<4x32xf32> -> vector<4x48xf32>
    %cst_52 = arith.constant dense<0.000000e+00> : vector<4x128xf32>
    %214 = tpu.matmul %213, %0, %cst_52 {dimension_numbers = #tpu.dot_dimension_numbers<[1], [0], [0], [1], [0, 0, 1, 1], [], []>} : vector<4x48xf32>, vector<48x128xf32>, vector<4x128xf32> -> vector<4x128xf32>
    %215 = vector.broadcast %1 : vector<1x128xf32> to vector<4x128xf32>
    %216 = arith.addf %214, %215 : vector<4x128xf32>
    %217 = arith.negf %216 : vector<4x128xf32>
    %218 = math.exp %217 : vector<4x128xf32>
    %cst_53 = arith.constant 1.000000e+00 : f32
    %219 = vector.broadcast %cst_53 : f32 to vector<4x128xf32>
    %220 = arith.addf %219, %218 : vector<4x128xf32>
    %221 = arith.divf %219, %220 : vector<4x128xf32>
    %222 = math.tanh %216 : vector<4x128xf32>
    %223 = vector.extract_strided_slice %221 {offsets = [0, 0], sizes = [4, 32], strides = [1, 1]} : vector<4x128xf32> to vector<4x32xf32>
    %224 = vector.extract_strided_slice %221 {offsets = [0, 32], sizes = [4, 32], strides = [1, 1]} : vector<4x128xf32> to vector<4x32xf32>
    %225 = vector.extract_strided_slice %222 {offsets = [0, 64], sizes = [4, 32], strides = [1, 1]} : vector<4x128xf32> to vector<4x32xf32>
    %226 = vector.extract_strided_slice %221 {offsets = [0, 96], sizes = [4, 32], strides = [1, 1]} : vector<4x128xf32> to vector<4x32xf32>
    %227 = arith.mulf %224, %189 : vector<4x32xf32>
    %228 = arith.mulf %223, %225 : vector<4x32xf32>
    %229 = arith.addf %227, %228 : vector<4x32xf32>
    %230 = math.tanh %229 : vector<4x32xf32>
    %231 = arith.mulf %226, %230 : vector<4x32xf32>
    %232 = tpu.concatenate %231, %210 in 1 : vector<4x32xf32>, vector<4x32xf32> -> vector<4x64xf32>
    %cst_54 = arith.constant dense<0.000000e+00> : vector<4x128xf32>
    %233 = tpu.matmul %232, %2, %cst_54 {dimension_numbers = #tpu.dot_dimension_numbers<[1], [0], [0], [1], [0, 0, 1, 1], [], []>} : vector<4x64xf32>, vector<64x128xf32>, vector<4x128xf32> -> vector<4x128xf32>
    %234 = vector.broadcast %3 : vector<1x128xf32> to vector<4x128xf32>
    %235 = arith.addf %233, %234 : vector<4x128xf32>
    %236 = arith.negf %235 : vector<4x128xf32>
    %237 = math.exp %236 : vector<4x128xf32>
    %cst_55 = arith.constant 1.000000e+00 : f32
    %238 = vector.broadcast %cst_55 : f32 to vector<4x128xf32>
    %239 = arith.addf %238, %237 : vector<4x128xf32>
    %240 = arith.divf %238, %239 : vector<4x128xf32>
    %241 = math.tanh %235 : vector<4x128xf32>
    %242 = vector.extract_strided_slice %240 {offsets = [0, 0], sizes = [4, 32], strides = [1, 1]} : vector<4x128xf32> to vector<4x32xf32>
    %243 = vector.extract_strided_slice %240 {offsets = [0, 32], sizes = [4, 32], strides = [1, 1]} : vector<4x128xf32> to vector<4x32xf32>
    %244 = vector.extract_strided_slice %241 {offsets = [0, 64], sizes = [4, 32], strides = [1, 1]} : vector<4x128xf32> to vector<4x32xf32>
    %245 = vector.extract_strided_slice %240 {offsets = [0, 96], sizes = [4, 32], strides = [1, 1]} : vector<4x128xf32> to vector<4x32xf32>
    %246 = arith.mulf %243, %208 : vector<4x32xf32>
    %247 = arith.mulf %242, %244 : vector<4x32xf32>
    %248 = arith.addf %246, %247 : vector<4x32xf32>
    %249 = math.tanh %248 : vector<4x32xf32>
    %250 = arith.mulf %245, %249 : vector<4x32xf32>
    %c0_56 = arith.constant 0 : index
    %c6 = arith.constant 6 : index
    %c0_57 = arith.constant 0 : index
    %251 = vector.load %arg0[%c0_56, %c6, %c0_57] : memref<4x8x16xf32, #tpu.memory_space<vmem>>, vector<4x1x16xf32>
    %252 = vector.shape_cast %251 : vector<4x1x16xf32> to vector<4x16xf32>
    %253 = tpu.concatenate %252, %231 in 1 : vector<4x16xf32>, vector<4x32xf32> -> vector<4x48xf32>
    %cst_58 = arith.constant dense<0.000000e+00> : vector<4x128xf32>
    %254 = tpu.matmul %253, %0, %cst_58 {dimension_numbers = #tpu.dot_dimension_numbers<[1], [0], [0], [1], [0, 0, 1, 1], [], []>} : vector<4x48xf32>, vector<48x128xf32>, vector<4x128xf32> -> vector<4x128xf32>
    %255 = vector.broadcast %1 : vector<1x128xf32> to vector<4x128xf32>
    %256 = arith.addf %254, %255 : vector<4x128xf32>
    %257 = arith.negf %256 : vector<4x128xf32>
    %258 = math.exp %257 : vector<4x128xf32>
    %cst_59 = arith.constant 1.000000e+00 : f32
    %259 = vector.broadcast %cst_59 : f32 to vector<4x128xf32>
    %260 = arith.addf %259, %258 : vector<4x128xf32>
    %261 = arith.divf %259, %260 : vector<4x128xf32>
    %262 = math.tanh %256 : vector<4x128xf32>
    %263 = vector.extract_strided_slice %261 {offsets = [0, 0], sizes = [4, 32], strides = [1, 1]} : vector<4x128xf32> to vector<4x32xf32>
    %264 = vector.extract_strided_slice %261 {offsets = [0, 32], sizes = [4, 32], strides = [1, 1]} : vector<4x128xf32> to vector<4x32xf32>
    %265 = vector.extract_strided_slice %262 {offsets = [0, 64], sizes = [4, 32], strides = [1, 1]} : vector<4x128xf32> to vector<4x32xf32>
    %266 = vector.extract_strided_slice %261 {offsets = [0, 96], sizes = [4, 32], strides = [1, 1]} : vector<4x128xf32> to vector<4x32xf32>
    %267 = arith.mulf %264, %229 : vector<4x32xf32>
    %268 = arith.mulf %263, %265 : vector<4x32xf32>
    %269 = arith.addf %267, %268 : vector<4x32xf32>
    %270 = math.tanh %269 : vector<4x32xf32>
    %271 = arith.mulf %266, %270 : vector<4x32xf32>
    %272 = tpu.concatenate %271, %250 in 1 : vector<4x32xf32>, vector<4x32xf32> -> vector<4x64xf32>
    %cst_60 = arith.constant dense<0.000000e+00> : vector<4x128xf32>
    %273 = tpu.matmul %272, %2, %cst_60 {dimension_numbers = #tpu.dot_dimension_numbers<[1], [0], [0], [1], [0, 0, 1, 1], [], []>} : vector<4x64xf32>, vector<64x128xf32>, vector<4x128xf32> -> vector<4x128xf32>
    %274 = vector.broadcast %3 : vector<1x128xf32> to vector<4x128xf32>
    %275 = arith.addf %273, %274 : vector<4x128xf32>
    %276 = arith.negf %275 : vector<4x128xf32>
    %277 = math.exp %276 : vector<4x128xf32>
    %cst_61 = arith.constant 1.000000e+00 : f32
    %278 = vector.broadcast %cst_61 : f32 to vector<4x128xf32>
    %279 = arith.addf %278, %277 : vector<4x128xf32>
    %280 = arith.divf %278, %279 : vector<4x128xf32>
    %281 = math.tanh %275 : vector<4x128xf32>
    %282 = vector.extract_strided_slice %280 {offsets = [0, 0], sizes = [4, 32], strides = [1, 1]} : vector<4x128xf32> to vector<4x32xf32>
    %283 = vector.extract_strided_slice %280 {offsets = [0, 32], sizes = [4, 32], strides = [1, 1]} : vector<4x128xf32> to vector<4x32xf32>
    %284 = vector.extract_strided_slice %281 {offsets = [0, 64], sizes = [4, 32], strides = [1, 1]} : vector<4x128xf32> to vector<4x32xf32>
    %285 = vector.extract_strided_slice %280 {offsets = [0, 96], sizes = [4, 32], strides = [1, 1]} : vector<4x128xf32> to vector<4x32xf32>
    %286 = arith.mulf %283, %248 : vector<4x32xf32>
    %287 = arith.mulf %282, %284 : vector<4x32xf32>
    %288 = arith.addf %286, %287 : vector<4x32xf32>
    %289 = math.tanh %288 : vector<4x32xf32>
    %290 = arith.mulf %285, %289 : vector<4x32xf32>
    %c0_62 = arith.constant 0 : index
    %c7 = arith.constant 7 : index
    %c0_63 = arith.constant 0 : index
    %291 = vector.load %arg0[%c0_62, %c7, %c0_63] : memref<4x8x16xf32, #tpu.memory_space<vmem>>, vector<4x1x16xf32>
    %292 = vector.shape_cast %291 : vector<4x1x16xf32> to vector<4x16xf32>
    %293 = tpu.concatenate %292, %271 in 1 : vector<4x16xf32>, vector<4x32xf32> -> vector<4x48xf32>
    %cst_64 = arith.constant dense<0.000000e+00> : vector<4x128xf32>
    %294 = tpu.matmul %293, %0, %cst_64 {dimension_numbers = #tpu.dot_dimension_numbers<[1], [0], [0], [1], [0, 0, 1, 1], [], []>} : vector<4x48xf32>, vector<48x128xf32>, vector<4x128xf32> -> vector<4x128xf32>
    %295 = vector.broadcast %1 : vector<1x128xf32> to vector<4x128xf32>
    %296 = arith.addf %294, %295 : vector<4x128xf32>
    %297 = arith.negf %296 : vector<4x128xf32>
    %298 = math.exp %297 : vector<4x128xf32>
    %cst_65 = arith.constant 1.000000e+00 : f32
    %299 = vector.broadcast %cst_65 : f32 to vector<4x128xf32>
    %300 = arith.addf %299, %298 : vector<4x128xf32>
    %301 = arith.divf %299, %300 : vector<4x128xf32>
    %302 = math.tanh %296 : vector<4x128xf32>
    %303 = vector.extract_strided_slice %301 {offsets = [0, 0], sizes = [4, 32], strides = [1, 1]} : vector<4x128xf32> to vector<4x32xf32>
    %304 = vector.extract_strided_slice %301 {offsets = [0, 32], sizes = [4, 32], strides = [1, 1]} : vector<4x128xf32> to vector<4x32xf32>
    %305 = vector.extract_strided_slice %302 {offsets = [0, 64], sizes = [4, 32], strides = [1, 1]} : vector<4x128xf32> to vector<4x32xf32>
    %306 = vector.extract_strided_slice %301 {offsets = [0, 96], sizes = [4, 32], strides = [1, 1]} : vector<4x128xf32> to vector<4x32xf32>
    %307 = arith.mulf %304, %269 : vector<4x32xf32>
    %308 = arith.mulf %303, %305 : vector<4x32xf32>
    %309 = arith.addf %307, %308 : vector<4x32xf32>
    %310 = math.tanh %309 : vector<4x32xf32>
    %311 = arith.mulf %306, %310 : vector<4x32xf32>
    %312 = tpu.concatenate %311, %290 in 1 : vector<4x32xf32>, vector<4x32xf32> -> vector<4x64xf32>
    %cst_66 = arith.constant dense<0.000000e+00> : vector<4x128xf32>
    %313 = tpu.matmul %312, %2, %cst_66 {dimension_numbers = #tpu.dot_dimension_numbers<[1], [0], [0], [1], [0, 0, 1, 1], [], []>} : vector<4x64xf32>, vector<64x128xf32>, vector<4x128xf32> -> vector<4x128xf32>
    %314 = vector.broadcast %3 : vector<1x128xf32> to vector<4x128xf32>
    %315 = arith.addf %313, %314 : vector<4x128xf32>
    %316 = arith.negf %315 : vector<4x128xf32>
    %317 = math.exp %316 : vector<4x128xf32>
    %cst_67 = arith.constant 1.000000e+00 : f32
    %318 = vector.broadcast %cst_67 : f32 to vector<4x128xf32>
    %319 = arith.addf %318, %317 : vector<4x128xf32>
    %320 = arith.divf %318, %319 : vector<4x128xf32>
    %321 = math.tanh %315 : vector<4x128xf32>
    %322 = vector.extract_strided_slice %320 {offsets = [0, 0], sizes = [4, 32], strides = [1, 1]} : vector<4x128xf32> to vector<4x32xf32>
    %323 = vector.extract_strided_slice %320 {offsets = [0, 32], sizes = [4, 32], strides = [1, 1]} : vector<4x128xf32> to vector<4x32xf32>
    %324 = vector.extract_strided_slice %321 {offsets = [0, 64], sizes = [4, 32], strides = [1, 1]} : vector<4x128xf32> to vector<4x32xf32>
    %325 = vector.extract_strided_slice %320 {offsets = [0, 96], sizes = [4, 32], strides = [1, 1]} : vector<4x128xf32> to vector<4x32xf32>
    %326 = arith.mulf %323, %288 : vector<4x32xf32>
    %327 = arith.mulf %322, %324 : vector<4x32xf32>
    %328 = arith.addf %326, %327 : vector<4x32xf32>
    %329 = math.tanh %328 : vector<4x32xf32>
    %330 = arith.mulf %325, %329 : vector<4x32xf32>
    %cst_68 = arith.constant 0.000000e+00 : f32
    %331 = vector.broadcast %cst_68 : f32 to vector<4x16xf32>
    %332 = tpu.concatenate %331, %311 in 1 : vector<4x16xf32>, vector<4x32xf32> -> vector<4x48xf32>
    %cst_69 = arith.constant dense<0.000000e+00> : vector<4x128xf32>
    %333 = tpu.matmul %332, %4, %cst_69 {dimension_numbers = #tpu.dot_dimension_numbers<[1], [0], [0], [1], [0, 0, 1, 1], [], []>} : vector<4x48xf32>, vector<48x128xf32>, vector<4x128xf32> -> vector<4x128xf32>
    %334 = vector.broadcast %5 : vector<1x128xf32> to vector<4x128xf32>
    %335 = arith.addf %333, %334 : vector<4x128xf32>
    %336 = arith.negf %335 : vector<4x128xf32>
    %337 = math.exp %336 : vector<4x128xf32>
    %cst_70 = arith.constant 1.000000e+00 : f32
    %338 = vector.broadcast %cst_70 : f32 to vector<4x128xf32>
    %339 = arith.addf %338, %337 : vector<4x128xf32>
    %340 = arith.divf %338, %339 : vector<4x128xf32>
    %341 = math.tanh %335 : vector<4x128xf32>
    %342 = vector.extract_strided_slice %340 {offsets = [0, 0], sizes = [4, 32], strides = [1, 1]} : vector<4x128xf32> to vector<4x32xf32>
    %343 = vector.extract_strided_slice %340 {offsets = [0, 32], sizes = [4, 32], strides = [1, 1]} : vector<4x128xf32> to vector<4x32xf32>
    %344 = vector.extract_strided_slice %341 {offsets = [0, 64], sizes = [4, 32], strides = [1, 1]} : vector<4x128xf32> to vector<4x32xf32>
    %345 = vector.extract_strided_slice %340 {offsets = [0, 96], sizes = [4, 32], strides = [1, 1]} : vector<4x128xf32> to vector<4x32xf32>
    %346 = arith.mulf %343, %309 : vector<4x32xf32>
    %347 = arith.mulf %342, %344 : vector<4x32xf32>
    %348 = arith.addf %346, %347 : vector<4x32xf32>
    %349 = math.tanh %348 : vector<4x32xf32>
    %350 = arith.mulf %345, %349 : vector<4x32xf32>
    %351 = tpu.concatenate %350, %330 in 1 : vector<4x32xf32>, vector<4x32xf32> -> vector<4x64xf32>
    %cst_71 = arith.constant dense<0.000000e+00> : vector<4x128xf32>
    %352 = tpu.matmul %351, %6, %cst_71 {dimension_numbers = #tpu.dot_dimension_numbers<[1], [0], [0], [1], [0, 0, 1, 1], [], []>} : vector<4x64xf32>, vector<64x128xf32>, vector<4x128xf32> -> vector<4x128xf32>
    %353 = vector.broadcast %7 : vector<1x128xf32> to vector<4x128xf32>
    %354 = arith.addf %352, %353 : vector<4x128xf32>
    %355 = arith.negf %354 : vector<4x128xf32>
    %356 = math.exp %355 : vector<4x128xf32>
    %cst_72 = arith.constant 1.000000e+00 : f32
    %357 = vector.broadcast %cst_72 : f32 to vector<4x128xf32>
    %358 = arith.addf %357, %356 : vector<4x128xf32>
    %359 = arith.divf %357, %358 : vector<4x128xf32>
    %360 = math.tanh %354 : vector<4x128xf32>
    %361 = vector.extract_strided_slice %359 {offsets = [0, 0], sizes = [4, 32], strides = [1, 1]} : vector<4x128xf32> to vector<4x32xf32>
    %362 = vector.extract_strided_slice %359 {offsets = [0, 32], sizes = [4, 32], strides = [1, 1]} : vector<4x128xf32> to vector<4x32xf32>
    %363 = vector.extract_strided_slice %360 {offsets = [0, 64], sizes = [4, 32], strides = [1, 1]} : vector<4x128xf32> to vector<4x32xf32>
    %364 = vector.extract_strided_slice %359 {offsets = [0, 96], sizes = [4, 32], strides = [1, 1]} : vector<4x128xf32> to vector<4x32xf32>
    %365 = arith.mulf %362, %328 : vector<4x32xf32>
    %366 = arith.mulf %361, %363 : vector<4x32xf32>
    %367 = arith.addf %365, %366 : vector<4x32xf32>
    %368 = math.tanh %367 : vector<4x32xf32>
    %369 = arith.mulf %364, %368 : vector<4x32xf32>
    %cst_73 = arith.constant dense<0.000000e+00> : vector<4x16xf32>
    %370 = tpu.matmul %369, %8, %cst_73 {dimension_numbers = #tpu.dot_dimension_numbers<[1], [0], [0], [1], [0, 0, 1, 1], [], []>} : vector<4x32xf32>, vector<32x16xf32>, vector<4x16xf32> -> vector<4x16xf32>
    %371 = vector.broadcast %9 : vector<1x16xf32> to vector<4x16xf32>
    %372 = arith.addf %370, %371 : vector<4x16xf32>
    %c0_74 = arith.constant 0 : index
    %c0_75 = arith.constant 0 : index
    %c0_76 = arith.constant 0 : index
    %373 = vector.load %arg12[%c0_74, %c0_75, %c0_76] : memref<4x6x16xf32, #tpu.memory_space<vmem>>, vector<4x1x16xf32>
    %374 = vector.shape_cast %373 : vector<4x1x16xf32> to vector<4x16xf32>
    %375 = vector.shape_cast %372 : vector<4x16xf32> to vector<4x1x16xf32>
    tpu.vector_store %arg12[%c0_74, %c0_75, %c0_76], %375 {strides = array<i32>} : memref<4x6x16xf32, #tpu.memory_space<vmem>>, vector<4x1x16xf32>,
    %c0_77 = arith.constant 0 : index
    %c0_78 = arith.constant 0 : index
    %c0_79 = arith.constant 0 : index
    %376 = vector.load %arg1[%c0_77, %c0_78, %c0_79] : memref<4x6x16xf32, #tpu.memory_space<vmem>>, vector<4x1x16xf32>
    %377 = vector.shape_cast %376 : vector<4x1x16xf32> to vector<4x16xf32>
    %378 = tpu.concatenate %377, %350 in 1 : vector<4x16xf32>, vector<4x32xf32> -> vector<4x48xf32>
    %cst_80 = arith.constant dense<0.000000e+00> : vector<4x128xf32>
    %379 = tpu.matmul %378, %4, %cst_80 {dimension_numbers = #tpu.dot_dimension_numbers<[1], [0], [0], [1], [0, 0, 1, 1], [], []>} : vector<4x48xf32>, vector<48x128xf32>, vector<4x128xf32> -> vector<4x128xf32>
    %380 = vector.broadcast %5 : vector<1x128xf32> to vector<4x128xf32>
    %381 = arith.addf %379, %380 : vector<4x128xf32>
    %382 = arith.negf %381 : vector<4x128xf32>
    %383 = math.exp %382 : vector<4x128xf32>
    %cst_81 = arith.constant 1.000000e+00 : f32
    %384 = vector.broadcast %cst_81 : f32 to vector<4x128xf32>
    %385 = arith.addf %384, %383 : vector<4x128xf32>
    %386 = arith.divf %384, %385 : vector<4x128xf32>
    %387 = math.tanh %381 : vector<4x128xf32>
    %388 = vector.extract_strided_slice %386 {offsets = [0, 0], sizes = [4, 32], strides = [1, 1]} : vector<4x128xf32> to vector<4x32xf32>
    %389 = vector.extract_strided_slice %386 {offsets = [0, 32], sizes = [4, 32], strides = [1, 1]} : vector<4x128xf32> to vector<4x32xf32>
    %390 = vector.extract_strided_slice %387 {offsets = [0, 64], sizes = [4, 32], strides = [1, 1]} : vector<4x128xf32> to vector<4x32xf32>
    %391 = vector.extract_strided_slice %386 {offsets = [0, 96], sizes = [4, 32], strides = [1, 1]} : vector<4x128xf32> to vector<4x32xf32>
    %392 = arith.mulf %389, %348 : vector<4x32xf32>
    %393 = arith.mulf %388, %390 : vector<4x32xf32>
    %394 = arith.addf %392, %393 : vector<4x32xf32>
    %395 = math.tanh %394 : vector<4x32xf32>
    %396 = arith.mulf %391, %395 : vector<4x32xf32>
    %397 = tpu.concatenate %396, %369 in 1 : vector<4x32xf32>, vector<4x32xf32> -> vector<4x64xf32>
    %cst_82 = arith.constant dense<0.000000e+00> : vector<4x128xf32>
    %398 = tpu.matmul %397, %6, %cst_82 {dimension_numbers = #tpu.dot_dimension_numbers<[1], [0], [0], [1], [0, 0, 1, 1], [], []>} : vector<4x64xf32>, vector<64x128xf32>, vector<4x128xf32> -> vector<4x128xf32>
    %399 = vector.broadcast %7 : vector<1x128xf32> to vector<4x128xf32>
    %400 = arith.addf %398, %399 : vector<4x128xf32>
    %401 = arith.negf %400 : vector<4x128xf32>
    %402 = math.exp %401 : vector<4x128xf32>
    %cst_83 = arith.constant 1.000000e+00 : f32
    %403 = vector.broadcast %cst_83 : f32 to vector<4x128xf32>
    %404 = arith.addf %403, %402 : vector<4x128xf32>
    %405 = arith.divf %403, %404 : vector<4x128xf32>
    %406 = math.tanh %400 : vector<4x128xf32>
    %407 = vector.extract_strided_slice %405 {offsets = [0, 0], sizes = [4, 32], strides = [1, 1]} : vector<4x128xf32> to vector<4x32xf32>
    %408 = vector.extract_strided_slice %405 {offsets = [0, 32], sizes = [4, 32], strides = [1, 1]} : vector<4x128xf32> to vector<4x32xf32>
    %409 = vector.extract_strided_slice %406 {offsets = [0, 64], sizes = [4, 32], strides = [1, 1]} : vector<4x128xf32> to vector<4x32xf32>
    %410 = vector.extract_strided_slice %405 {offsets = [0, 96], sizes = [4, 32], strides = [1, 1]} : vector<4x128xf32> to vector<4x32xf32>
    %411 = arith.mulf %408, %367 : vector<4x32xf32>
    %412 = arith.mulf %407, %409 : vector<4x32xf32>
    %413 = arith.addf %411, %412 : vector<4x32xf32>
    %414 = math.tanh %413 : vector<4x32xf32>
    %415 = arith.mulf %410, %414 : vector<4x32xf32>
    %cst_84 = arith.constant dense<0.000000e+00> : vector<4x16xf32>
    %416 = tpu.matmul %415, %8, %cst_84 {dimension_numbers = #tpu.dot_dimension_numbers<[1], [0], [0], [1], [0, 0, 1, 1], [], []>} : vector<4x32xf32>, vector<32x16xf32>, vector<4x16xf32> -> vector<4x16xf32>
    %417 = vector.broadcast %9 : vector<1x16xf32> to vector<4x16xf32>
    %418 = arith.addf %416, %417 : vector<4x16xf32>
    %c0_85 = arith.constant 0 : index
    %c1_86 = arith.constant 1 : index
    %c0_87 = arith.constant 0 : index
    %419 = vector.load %arg12[%c0_85, %c1_86, %c0_87] : memref<4x6x16xf32, #tpu.memory_space<vmem>>, vector<4x1x16xf32>
    %420 = vector.shape_cast %419 : vector<4x1x16xf32> to vector<4x16xf32>
    %421 = vector.shape_cast %418 : vector<4x16xf32> to vector<4x1x16xf32>
    tpu.vector_store %arg12[%c0_85, %c1_86, %c0_87], %421 {strides = array<i32>} : memref<4x6x16xf32, #tpu.memory_space<vmem>>, vector<4x1x16xf32>,
    %c0_88 = arith.constant 0 : index
    %c1_89 = arith.constant 1 : index
    %c0_90 = arith.constant 0 : index
    %422 = vector.load %arg1[%c0_88, %c1_89, %c0_90] : memref<4x6x16xf32, #tpu.memory_space<vmem>>, vector<4x1x16xf32>
    %423 = vector.shape_cast %422 : vector<4x1x16xf32> to vector<4x16xf32>
    %424 = tpu.concatenate %423, %396 in 1 : vector<4x16xf32>, vector<4x32xf32> -> vector<4x48xf32>
    %cst_91 = arith.constant dense<0.000000e+00> : vector<4x128xf32>
    %425 = tpu.matmul %424, %4, %cst_91 {dimension_numbers = #tpu.dot_dimension_numbers<[1], [0], [0], [1], [0, 0, 1, 1], [], []>} : vector<4x48xf32>, vector<48x128xf32>, vector<4x128xf32> -> vector<4x128xf32>
    %426 = vector.broadcast %5 : vector<1x128xf32> to vector<4x128xf32>
    %427 = arith.addf %425, %426 : vector<4x128xf32>
    %428 = arith.negf %427 : vector<4x128xf32>
    %429 = math.exp %428 : vector<4x128xf32>
    %cst_92 = arith.constant 1.000000e+00 : f32
    %430 = vector.broadcast %cst_92 : f32 to vector<4x128xf32>
    %431 = arith.addf %430, %429 : vector<4x128xf32>
    %432 = arith.divf %430, %431 : vector<4x128xf32>
    %433 = math.tanh %427 : vector<4x128xf32>
    %434 = vector.extract_strided_slice %432 {offsets = [0, 0], sizes = [4, 32], strides = [1, 1]} : vector<4x128xf32> to vector<4x32xf32>
    %435 = vector.extract_strided_slice %432 {offsets = [0, 32], sizes = [4, 32], strides = [1, 1]} : vector<4x128xf32> to vector<4x32xf32>
    %436 = vector.extract_strided_slice %433 {offsets = [0, 64], sizes = [4, 32], strides = [1, 1]} : vector<4x128xf32> to vector<4x32xf32>
    %437 = vector.extract_strided_slice %432 {offsets = [0, 96], sizes = [4, 32], strides = [1, 1]} : vector<4x128xf32> to vector<4x32xf32>
    %438 = arith.mulf %435, %394 : vector<4x32xf32>
    %439 = arith.mulf %434, %436 : vector<4x32xf32>
    %440 = arith.addf %438, %439 : vector<4x32xf32>
    %441 = math.tanh %440 : vector<4x32xf32>
    %442 = arith.mulf %437, %441 : vector<4x32xf32>
    %443 = tpu.concatenate %442, %415 in 1 : vector<4x32xf32>, vector<4x32xf32> -> vector<4x64xf32>
    %cst_93 = arith.constant dense<0.000000e+00> : vector<4x128xf32>
    %444 = tpu.matmul %443, %6, %cst_93 {dimension_numbers = #tpu.dot_dimension_numbers<[1], [0], [0], [1], [0, 0, 1, 1], [], []>} : vector<4x64xf32>, vector<64x128xf32>, vector<4x128xf32> -> vector<4x128xf32>
    %445 = vector.broadcast %7 : vector<1x128xf32> to vector<4x128xf32>
    %446 = arith.addf %444, %445 : vector<4x128xf32>
    %447 = arith.negf %446 : vector<4x128xf32>
    %448 = math.exp %447 : vector<4x128xf32>
    %cst_94 = arith.constant 1.000000e+00 : f32
    %449 = vector.broadcast %cst_94 : f32 to vector<4x128xf32>
    %450 = arith.addf %449, %448 : vector<4x128xf32>
    %451 = arith.divf %449, %450 : vector<4x128xf32>
    %452 = math.tanh %446 : vector<4x128xf32>
    %453 = vector.extract_strided_slice %451 {offsets = [0, 0], sizes = [4, 32], strides = [1, 1]} : vector<4x128xf32> to vector<4x32xf32>
    %454 = vector.extract_strided_slice %451 {offsets = [0, 32], sizes = [4, 32], strides = [1, 1]} : vector<4x128xf32> to vector<4x32xf32>
    %455 = vector.extract_strided_slice %452 {offsets = [0, 64], sizes = [4, 32], strides = [1, 1]} : vector<4x128xf32> to vector<4x32xf32>
    %456 = vector.extract_strided_slice %451 {offsets = [0, 96], sizes = [4, 32], strides = [1, 1]} : vector<4x128xf32> to vector<4x32xf32>
    %457 = arith.mulf %454, %413 : vector<4x32xf32>
    %458 = arith.mulf %453, %455 : vector<4x32xf32>
    %459 = arith.addf %457, %458 : vector<4x32xf32>
    %460 = math.tanh %459 : vector<4x32xf32>
    %461 = arith.mulf %456, %460 : vector<4x32xf32>
    %cst_95 = arith.constant dense<0.000000e+00> : vector<4x16xf32>
    %462 = tpu.matmul %461, %8, %cst_95 {dimension_numbers = #tpu.dot_dimension_numbers<[1], [0], [0], [1], [0, 0, 1, 1], [], []>} : vector<4x32xf32>, vector<32x16xf32>, vector<4x16xf32> -> vector<4x16xf32>
    %463 = vector.broadcast %9 : vector<1x16xf32> to vector<4x16xf32>
    %464 = arith.addf %462, %463 : vector<4x16xf32>
    %c0_96 = arith.constant 0 : index
    %c2_97 = arith.constant 2 : index
    %c0_98 = arith.constant 0 : index
    %465 = vector.load %arg12[%c0_96, %c2_97, %c0_98] : memref<4x6x16xf32, #tpu.memory_space<vmem>>, vector<4x1x16xf32>
    %466 = vector.shape_cast %465 : vector<4x1x16xf32> to vector<4x16xf32>
    %467 = vector.shape_cast %464 : vector<4x16xf32> to vector<4x1x16xf32>
    tpu.vector_store %arg12[%c0_96, %c2_97, %c0_98], %467 {strides = array<i32>} : memref<4x6x16xf32, #tpu.memory_space<vmem>>, vector<4x1x16xf32>,
    %c0_99 = arith.constant 0 : index
    %c2_100 = arith.constant 2 : index
    %c0_101 = arith.constant 0 : index
    %468 = vector.load %arg1[%c0_99, %c2_100, %c0_101] : memref<4x6x16xf32, #tpu.memory_space<vmem>>, vector<4x1x16xf32>
    %469 = vector.shape_cast %468 : vector<4x1x16xf32> to vector<4x16xf32>
    %470 = tpu.concatenate %469, %442 in 1 : vector<4x16xf32>, vector<4x32xf32> -> vector<4x48xf32>
    %cst_102 = arith.constant dense<0.000000e+00> : vector<4x128xf32>
    %471 = tpu.matmul %470, %4, %cst_102 {dimension_numbers = #tpu.dot_dimension_numbers<[1], [0], [0], [1], [0, 0, 1, 1], [], []>} : vector<4x48xf32>, vector<48x128xf32>, vector<4x128xf32> -> vector<4x128xf32>
    %472 = vector.broadcast %5 : vector<1x128xf32> to vector<4x128xf32>
    %473 = arith.addf %471, %472 : vector<4x128xf32>
    %474 = arith.negf %473 : vector<4x128xf32>
    %475 = math.exp %474 : vector<4x128xf32>
    %cst_103 = arith.constant 1.000000e+00 : f32
    %476 = vector.broadcast %cst_103 : f32 to vector<4x128xf32>
    %477 = arith.addf %476, %475 : vector<4x128xf32>
    %478 = arith.divf %476, %477 : vector<4x128xf32>
    %479 = math.tanh %473 : vector<4x128xf32>
    %480 = vector.extract_strided_slice %478 {offsets = [0, 0], sizes = [4, 32], strides = [1, 1]} : vector<4x128xf32> to vector<4x32xf32>
    %481 = vector.extract_strided_slice %478 {offsets = [0, 32], sizes = [4, 32], strides = [1, 1]} : vector<4x128xf32> to vector<4x32xf32>
    %482 = vector.extract_strided_slice %479 {offsets = [0, 64], sizes = [4, 32], strides = [1, 1]} : vector<4x128xf32> to vector<4x32xf32>
    %483 = vector.extract_strided_slice %478 {offsets = [0, 96], sizes = [4, 32], strides = [1, 1]} : vector<4x128xf32> to vector<4x32xf32>
    %484 = arith.mulf %481, %440 : vector<4x32xf32>
    %485 = arith.mulf %480, %482 : vector<4x32xf32>
    %486 = arith.addf %484, %485 : vector<4x32xf32>
    %487 = math.tanh %486 : vector<4x32xf32>
    %488 = arith.mulf %483, %487 : vector<4x32xf32>
    %489 = tpu.concatenate %488, %461 in 1 : vector<4x32xf32>, vector<4x32xf32> -> vector<4x64xf32>
    %cst_104 = arith.constant dense<0.000000e+00> : vector<4x128xf32>
    %490 = tpu.matmul %489, %6, %cst_104 {dimension_numbers = #tpu.dot_dimension_numbers<[1], [0], [0], [1], [0, 0, 1, 1], [], []>} : vector<4x64xf32>, vector<64x128xf32>, vector<4x128xf32> -> vector<4x128xf32>
    %491 = vector.broadcast %7 : vector<1x128xf32> to vector<4x128xf32>
    %492 = arith.addf %490, %491 : vector<4x128xf32>
    %493 = arith.negf %492 : vector<4x128xf32>
    %494 = math.exp %493 : vector<4x128xf32>
    %cst_105 = arith.constant 1.000000e+00 : f32
    %495 = vector.broadcast %cst_105 : f32 to vector<4x128xf32>
    %496 = arith.addf %495, %494 : vector<4x128xf32>
    %497 = arith.divf %495, %496 : vector<4x128xf32>
    %498 = math.tanh %492 : vector<4x128xf32>
    %499 = vector.extract_strided_slice %497 {offsets = [0, 0], sizes = [4, 32], strides = [1, 1]} : vector<4x128xf32> to vector<4x32xf32>
    %500 = vector.extract_strided_slice %497 {offsets = [0, 32], sizes = [4, 32], strides = [1, 1]} : vector<4x128xf32> to vector<4x32xf32>
    %501 = vector.extract_strided_slice %498 {offsets = [0, 64], sizes = [4, 32], strides = [1, 1]} : vector<4x128xf32> to vector<4x32xf32>
    %502 = vector.extract_strided_slice %497 {offsets = [0, 96], sizes = [4, 32], strides = [1, 1]} : vector<4x128xf32> to vector<4x32xf32>
    %503 = arith.mulf %500, %459 : vector<4x32xf32>
    %504 = arith.mulf %499, %501 : vector<4x32xf32>
    %505 = arith.addf %503, %504 : vector<4x32xf32>
    %506 = math.tanh %505 : vector<4x32xf32>
    %507 = arith.mulf %502, %506 : vector<4x32xf32>
    %cst_106 = arith.constant dense<0.000000e+00> : vector<4x16xf32>
    %508 = tpu.matmul %507, %8, %cst_106 {dimension_numbers = #tpu.dot_dimension_numbers<[1], [0], [0], [1], [0, 0, 1, 1], [], []>} : vector<4x32xf32>, vector<32x16xf32>, vector<4x16xf32> -> vector<4x16xf32>
    %509 = vector.broadcast %9 : vector<1x16xf32> to vector<4x16xf32>
    %510 = arith.addf %508, %509 : vector<4x16xf32>
    %c0_107 = arith.constant 0 : index
    %c3_108 = arith.constant 3 : index
    %c0_109 = arith.constant 0 : index
    %511 = vector.load %arg12[%c0_107, %c3_108, %c0_109] : memref<4x6x16xf32, #tpu.memory_space<vmem>>, vector<4x1x16xf32>
    %512 = vector.shape_cast %511 : vector<4x1x16xf32> to vector<4x16xf32>
    %513 = vector.shape_cast %510 : vector<4x16xf32> to vector<4x1x16xf32>
    tpu.vector_store %arg12[%c0_107, %c3_108, %c0_109], %513 {strides = array<i32>} : memref<4x6x16xf32, #tpu.memory_space<vmem>>, vector<4x1x16xf32>,
    %c0_110 = arith.constant 0 : index
    %c3_111 = arith.constant 3 : index
    %c0_112 = arith.constant 0 : index
    %514 = vector.load %arg1[%c0_110, %c3_111, %c0_112] : memref<4x6x16xf32, #tpu.memory_space<vmem>>, vector<4x1x16xf32>
    %515 = vector.shape_cast %514 : vector<4x1x16xf32> to vector<4x16xf32>
    %516 = tpu.concatenate %515, %488 in 1 : vector<4x16xf32>, vector<4x32xf32> -> vector<4x48xf32>
    %cst_113 = arith.constant dense<0.000000e+00> : vector<4x128xf32>
    %517 = tpu.matmul %516, %4, %cst_113 {dimension_numbers = #tpu.dot_dimension_numbers<[1], [0], [0], [1], [0, 0, 1, 1], [], []>} : vector<4x48xf32>, vector<48x128xf32>, vector<4x128xf32> -> vector<4x128xf32>
    %518 = vector.broadcast %5 : vector<1x128xf32> to vector<4x128xf32>
    %519 = arith.addf %517, %518 : vector<4x128xf32>
    %520 = arith.negf %519 : vector<4x128xf32>
    %521 = math.exp %520 : vector<4x128xf32>
    %cst_114 = arith.constant 1.000000e+00 : f32
    %522 = vector.broadcast %cst_114 : f32 to vector<4x128xf32>
    %523 = arith.addf %522, %521 : vector<4x128xf32>
    %524 = arith.divf %522, %523 : vector<4x128xf32>
    %525 = math.tanh %519 : vector<4x128xf32>
    %526 = vector.extract_strided_slice %524 {offsets = [0, 0], sizes = [4, 32], strides = [1, 1]} : vector<4x128xf32> to vector<4x32xf32>
    %527 = vector.extract_strided_slice %524 {offsets = [0, 32], sizes = [4, 32], strides = [1, 1]} : vector<4x128xf32> to vector<4x32xf32>
    %528 = vector.extract_strided_slice %525 {offsets = [0, 64], sizes = [4, 32], strides = [1, 1]} : vector<4x128xf32> to vector<4x32xf32>
    %529 = vector.extract_strided_slice %524 {offsets = [0, 96], sizes = [4, 32], strides = [1, 1]} : vector<4x128xf32> to vector<4x32xf32>
    %530 = arith.mulf %527, %486 : vector<4x32xf32>
    %531 = arith.mulf %526, %528 : vector<4x32xf32>
    %532 = arith.addf %530, %531 : vector<4x32xf32>
    %533 = math.tanh %532 : vector<4x32xf32>
    %534 = arith.mulf %529, %533 : vector<4x32xf32>
    %535 = tpu.concatenate %534, %507 in 1 : vector<4x32xf32>, vector<4x32xf32> -> vector<4x64xf32>
    %cst_115 = arith.constant dense<0.000000e+00> : vector<4x128xf32>
    %536 = tpu.matmul %535, %6, %cst_115 {dimension_numbers = #tpu.dot_dimension_numbers<[1], [0], [0], [1], [0, 0, 1, 1], [], []>} : vector<4x64xf32>, vector<64x128xf32>, vector<4x128xf32> -> vector<4x128xf32>
    %537 = vector.broadcast %7 : vector<1x128xf32> to vector<4x128xf32>
    %538 = arith.addf %536, %537 : vector<4x128xf32>
    %539 = arith.negf %538 : vector<4x128xf32>
    %540 = math.exp %539 : vector<4x128xf32>
    %cst_116 = arith.constant 1.000000e+00 : f32
    %541 = vector.broadcast %cst_116 : f32 to vector<4x128xf32>
    %542 = arith.addf %541, %540 : vector<4x128xf32>
    %543 = arith.divf %541, %542 : vector<4x128xf32>
    %544 = math.tanh %538 : vector<4x128xf32>
    %545 = vector.extract_strided_slice %543 {offsets = [0, 0], sizes = [4, 32], strides = [1, 1]} : vector<4x128xf32> to vector<4x32xf32>
    %546 = vector.extract_strided_slice %543 {offsets = [0, 32], sizes = [4, 32], strides = [1, 1]} : vector<4x128xf32> to vector<4x32xf32>
    %547 = vector.extract_strided_slice %544 {offsets = [0, 64], sizes = [4, 32], strides = [1, 1]} : vector<4x128xf32> to vector<4x32xf32>
    %548 = vector.extract_strided_slice %543 {offsets = [0, 96], sizes = [4, 32], strides = [1, 1]} : vector<4x128xf32> to vector<4x32xf32>
    %549 = arith.mulf %546, %505 : vector<4x32xf32>
    %550 = arith.mulf %545, %547 : vector<4x32xf32>
    %551 = arith.addf %549, %550 : vector<4x32xf32>
    %552 = math.tanh %551 : vector<4x32xf32>
    %553 = arith.mulf %548, %552 : vector<4x32xf32>
    %cst_117 = arith.constant dense<0.000000e+00> : vector<4x16xf32>
    %554 = tpu.matmul %553, %8, %cst_117 {dimension_numbers = #tpu.dot_dimension_numbers<[1], [0], [0], [1], [0, 0, 1, 1], [], []>} : vector<4x32xf32>, vector<32x16xf32>, vector<4x16xf32> -> vector<4x16xf32>
    %555 = vector.broadcast %9 : vector<1x16xf32> to vector<4x16xf32>
    %556 = arith.addf %554, %555 : vector<4x16xf32>
    %c0_118 = arith.constant 0 : index
    %c4_119 = arith.constant 4 : index
    %c0_120 = arith.constant 0 : index
    %557 = vector.load %arg12[%c0_118, %c4_119, %c0_120] : memref<4x6x16xf32, #tpu.memory_space<vmem>>, vector<4x1x16xf32>
    %558 = vector.shape_cast %557 : vector<4x1x16xf32> to vector<4x16xf32>
    %559 = vector.shape_cast %556 : vector<4x16xf32> to vector<4x1x16xf32>
    tpu.vector_store %arg12[%c0_118, %c4_119, %c0_120], %559 {strides = array<i32>} : memref<4x6x16xf32, #tpu.memory_space<vmem>>, vector<4x1x16xf32>,
    %c0_121 = arith.constant 0 : index
    %c4_122 = arith.constant 4 : index
    %c0_123 = arith.constant 0 : index
    %560 = vector.load %arg1[%c0_121, %c4_122, %c0_123] : memref<4x6x16xf32, #tpu.memory_space<vmem>>, vector<4x1x16xf32>
    %561 = vector.shape_cast %560 : vector<4x1x16xf32> to vector<4x16xf32>
    %562 = tpu.concatenate %561, %534 in 1 : vector<4x16xf32>, vector<4x32xf32> -> vector<4x48xf32>
    %cst_124 = arith.constant dense<0.000000e+00> : vector<4x128xf32>
    %563 = tpu.matmul %562, %4, %cst_124 {dimension_numbers = #tpu.dot_dimension_numbers<[1], [0], [0], [1], [0, 0, 1, 1], [], []>} : vector<4x48xf32>, vector<48x128xf32>, vector<4x128xf32> -> vector<4x128xf32>
    %564 = vector.broadcast %5 : vector<1x128xf32> to vector<4x128xf32>
    %565 = arith.addf %563, %564 : vector<4x128xf32>
    %566 = arith.negf %565 : vector<4x128xf32>
    %567 = math.exp %566 : vector<4x128xf32>
    %cst_125 = arith.constant 1.000000e+00 : f32
    %568 = vector.broadcast %cst_125 : f32 to vector<4x128xf32>
    %569 = arith.addf %568, %567 : vector<4x128xf32>
    %570 = arith.divf %568, %569 : vector<4x128xf32>
    %571 = math.tanh %565 : vector<4x128xf32>
    %572 = vector.extract_strided_slice %570 {offsets = [0, 0], sizes = [4, 32], strides = [1, 1]} : vector<4x128xf32> to vector<4x32xf32>
    %573 = vector.extract_strided_slice %570 {offsets = [0, 32], sizes = [4, 32], strides = [1, 1]} : vector<4x128xf32> to vector<4x32xf32>
    %574 = vector.extract_strided_slice %571 {offsets = [0, 64], sizes = [4, 32], strides = [1, 1]} : vector<4x128xf32> to vector<4x32xf32>
    %575 = vector.extract_strided_slice %570 {offsets = [0, 96], sizes = [4, 32], strides = [1, 1]} : vector<4x128xf32> to vector<4x32xf32>
    %576 = arith.mulf %573, %532 : vector<4x32xf32>
    %577 = arith.mulf %572, %574 : vector<4x32xf32>
    %578 = arith.addf %576, %577 : vector<4x32xf32>
    %579 = math.tanh %578 : vector<4x32xf32>
    %580 = arith.mulf %575, %579 : vector<4x32xf32>
    %581 = tpu.concatenate %580, %553 in 1 : vector<4x32xf32>, vector<4x32xf32> -> vector<4x64xf32>
    %cst_126 = arith.constant dense<0.000000e+00> : vector<4x128xf32>
    %582 = tpu.matmul %581, %6, %cst_126 {dimension_numbers = #tpu.dot_dimension_numbers<[1], [0], [0], [1], [0, 0, 1, 1], [], []>} : vector<4x64xf32>, vector<64x128xf32>, vector<4x128xf32> -> vector<4x128xf32>
    %583 = vector.broadcast %7 : vector<1x128xf32> to vector<4x128xf32>
    %584 = arith.addf %582, %583 : vector<4x128xf32>
    %585 = arith.negf %584 : vector<4x128xf32>
    %586 = math.exp %585 : vector<4x128xf32>
    %cst_127 = arith.constant 1.000000e+00 : f32
    %587 = vector.broadcast %cst_127 : f32 to vector<4x128xf32>
    %588 = arith.addf %587, %586 : vector<4x128xf32>
    %589 = arith.divf %587, %588 : vector<4x128xf32>
    %590 = math.tanh %584 : vector<4x128xf32>
    %591 = vector.extract_strided_slice %589 {offsets = [0, 0], sizes = [4, 32], strides = [1, 1]} : vector<4x128xf32> to vector<4x32xf32>
    %592 = vector.extract_strided_slice %589 {offsets = [0, 32], sizes = [4, 32], strides = [1, 1]} : vector<4x128xf32> to vector<4x32xf32>
    %593 = vector.extract_strided_slice %590 {offsets = [0, 64], sizes = [4, 32], strides = [1, 1]} : vector<4x128xf32> to vector<4x32xf32>
    %594 = vector.extract_strided_slice %589 {offsets = [0, 96], sizes = [4, 32], strides = [1, 1]} : vector<4x128xf32> to vector<4x32xf32>
    %595 = arith.mulf %592, %551 : vector<4x32xf32>
    %596 = arith.mulf %591, %593 : vector<4x32xf32>
    %597 = arith.addf %595, %596 : vector<4x32xf32>
    %598 = math.tanh %597 : vector<4x32xf32>
    %599 = arith.mulf %594, %598 : vector<4x32xf32>
    %cst_128 = arith.constant dense<0.000000e+00> : vector<4x16xf32>
    %600 = tpu.matmul %599, %8, %cst_128 {dimension_numbers = #tpu.dot_dimension_numbers<[1], [0], [0], [1], [0, 0, 1, 1], [], []>} : vector<4x32xf32>, vector<32x16xf32>, vector<4x16xf32> -> vector<4x16xf32>
    %601 = vector.broadcast %9 : vector<1x16xf32> to vector<4x16xf32>
    %602 = arith.addf %600, %601 : vector<4x16xf32>
    %c0_129 = arith.constant 0 : index
    %c5_130 = arith.constant 5 : index
    %c0_131 = arith.constant 0 : index
    %603 = vector.load %arg12[%c0_129, %c5_130, %c0_131] : memref<4x6x16xf32, #tpu.memory_space<vmem>>, vector<4x1x16xf32>
    %604 = vector.shape_cast %603 : vector<4x1x16xf32> to vector<4x16xf32>
    %605 = vector.shape_cast %602 : vector<4x16xf32> to vector<4x1x16xf32>
    tpu.vector_store %arg12[%c0_129, %c5_130, %c0_131], %605 {strides = array<i32>} : memref<4x6x16xf32, #tpu.memory_space<vmem>>, vector<4x1x16xf32>,
    return
  }
}

</mosaic_0001>

<bundles_post_ra>
// kernel: seq2seq_forward.1
= control target key start
LH: loop header
LB: loop body
LE: loop exit
PB: predicated region body
PF: predicated region fallthrough
CT: control target
= control target key end

     0   :  { %17 = vsyncpa [#allocation3], 0  ;;  %s6527_s0 = inlined_call_operand.hbm [shape: f32[4,8,16], index: 0, kind: input, shape index: {}]   ;;  %s6528_s1 = inlined_call_operand.vmem [shape: f32[4,6,16], index: 1, kind: input, shape index: {}]   ;;  %s6529_s2 = inlined_call_operand.hbm [shape: f32[48,128], index: 2, kind: input, shape index: {}]   ;;  %s6530_s3 = inlined_call_operand.vmem [shape: f32[1,128], index: 3, kind: input, shape index: {}]   ;;  %s6531_s4 = inlined_call_operand.vmem [shape: f32[64,128], index: 4, kind: input, shape index: {}]   ;;  %s6532_s5 = inlined_call_operand.vmem [shape: f32[1,128], index: 5, kind: input, shape index: {}]   ;;  %s6533_s6 = inlined_call_operand.hbm [shape: f32[48,128], index: 6, kind: input, shape index: {}]   ;;  %s6534_s7 = inlined_call_operand.hbm [shape: f32[1,128], index: 7, kind: input, shape index: {}]   ;;  %s6535_s8 = inlined_call_operand.vmem [shape: f32[64,128], index: 8, kind: input, shape index: {}]   ;;  %s6536_s9 = inlined_call_operand.vmem [shape: f32[1,128], index: 9, kind: input, shape index: {}]   ;;  %s6537_s10 = inlined_call_operand.vmem [shape: f32[32,16], index: 10, kind: input, shape index: {}]   ;;  %s6538_s11 = inlined_call_operand.vmem [shape: f32[1,16], index: 11, kind: input, shape index: {}]   ;;  %s6539_s12 = inlined_call_operand.vmem [shape: f32[4,6,16], index: 12, kind: output, shape index: {}]  }
   0x1   :  { %18 = vsyncpa [#allocation5], 0 }
   0x2   :  { %19 = vsyncpa [#allocation8], 0  ;;  %s5433_s21 = smov [#allocation4]   ;;  %s5434_s23 = smov [#allocation2]  }
   0x3   :  { %s39_s22 = sshll.u32 %s5433_s21, 4  ;;  %s25_s24 = sshll.u32 %s5434_s23, 4  ;;  %s40_s22 = int_to_ptr.vmem [resolvable:$true] %s39_s22  ;;  %s5511_s24 = int_to_ptr.vmem [resolvable:$true] %s25_s24 }
   0x4   :  { %s5339_s27 = scalar_lea.hbm %s6529_s2, 768 }
   0x5   :  { %p5340_p0 = scmp.ne.s32.totalorder %s6529_s2, %s5339_s27  ;;  %p5343_p1 = scmp.lt.u32.totalorder %s5339_s27, %s6529_s2 }
   0x7   :  { %p5345_p2 = pnand %p5343_p1, %p5340_p0 }
   0x9   :  { %5348 = shalt.err (!%p5345_p2)
}
   0xa   :  { %s5349_s14 = scalar_lea.vmem %s40_s22, 768  ;;  %p5354_p4 = scmp.lt.s32.totalorder %s40_s22, %s40_s22 }
   0xb   :  { %p5350_p3 = scmp.ne.s32.totalorder %s40_s22, %s5349_s14  ;;  %p5355_p5 = scmp.lt.s32.totalorder %s5349_s14, %s5349_s14 }
   0xd   :  { %p5356_p6 = por %p5355_p5, %p5354_p4 }
   0xf   :  { %p5357_p7 = pnand %p5356_p6, %p5350_p3 }
  0x11   :  { %5360 = shalt.err (!%p5357_p7)
}
  0x12   :  { %s5435_s15 = smov 128   ;;  %s5436_s16 = smov 8  }
  0x13   :  { %45 = dma.hbm_to_vmem [thread:$0]  %s6529_s2, 768, %s40_s22, [#allocation5], %s5435_s15, %s5435_s15, %s5436_s16  }
  0x14   :  { %s5361_s21 = scalar_lea.hbm %s6527_s0, 512 }
  0x15   :  { %p5362_p8 = scmp.ne.s32.totalorder %s6527_s0, %s5361_s21  ;;  %p5365_p9 = scmp.lt.u32.totalorder %s5361_s21, %s6527_s0 }
  0x17   :  { %p5367_p10 = pnand %p5365_p9, %p5362_p8 }
  0x19   :  { %5370 = shalt.err (!%p5367_p10)
}
  0x1a   :  { %s5371_s28 = scalar_lea.vmem %s5511_s24, 512  ;;  %p5376_p12 = scmp.lt.s32.totalorder %s5511_s24, %s5511_s24 }
  0x1b   :  { %p5372_p11 = scmp.ne.s32.totalorder %s5511_s24, %s5371_s28  ;;  %p5377_p13 = scmp.lt.s32.totalorder %s5371_s28, %s5371_s28 }
  0x1d   :  { %p5378_p0 = por %p5377_p13, %p5376_p12 }
  0x1f   :  { %p5379_p1 = pnand %p5378_p0, %p5372_p11 }
  0x21   :  { %5382 = shalt.err (!%p5379_p1)
}
  0x22   :  { %31 = dma.hbm_to_vmem [thread:$0]  %s6527_s0, 512, %s5511_s24, [#allocation3], %s5435_s15, %s5435_s15, %s5436_s16  }
  0x23   :  { %s5437_s29 = smov [#allocation6]   ;;  %s5438_s13 = smov [#allocation7]  }
  0x24   :  { %s57_s30 = sshll.u32 %s5437_s29, 4  ;;  %s70_s14 = sshll.u32 %s5438_s13, 4  ;;  %s58_s30 = int_to_ptr.vmem [resolvable:$true] %s57_s30  ;;  %s71_s14 = int_to_ptr.vmem [resolvable:$true] %s70_s14 }
  0x25   :  { %s5383_s19 = scalar_lea.hbm %s6533_s6, 768 }
  0x26   :  { %p5384_p2 = scmp.ne.s32.totalorder %s6533_s6, %s5383_s19  ;;  %p5387_p3 = scmp.lt.u32.totalorder %s5383_s19, %s6533_s6 }
  0x28   :  { %p5389_p4 = pnand %p5387_p3, %p5384_p2 }
  0x2a   :  { %5392 = shalt.err (!%p5389_p4)
}
  0x2b   :  { %s5393_s0 = scalar_lea.vmem %s58_s30, 768  ;;  %p5398_p6 = scmp.lt.s32.totalorder %s58_s30, %s58_s30 }
  0x2c   :  { %p5394_p5 = scmp.ne.s32.totalorder %s58_s30, %s5393_s0  ;;  %p5399_p7 = scmp.lt.s32.totalorder %s5393_s0, %s5393_s0 }
  0x2e   :  { %p5400_p8 = por %p5399_p7, %p5398_p6 }
  0x30   :  { %p5401_p9 = pnand %p5400_p8, %p5394_p5 }
  0x32   :  { %5404 = shalt.err (!%p5401_p9)
}
  0x33   :  { %63 = dma.hbm_to_vmem [thread:$0]  %s6533_s6, 768, %s58_s30, [#allocation5], %s5435_s15, %s5435_s15, %s5436_s16  }
  0x34   :  { %s5405_s2 = scalar_lea.hbm %s6534_s7, 16 }
  0x35   :  { %p5406_p10 = scmp.ne.s32.totalorder %s6534_s7, %s5405_s2  ;;  %p5409_p11 = scmp.lt.u32.totalorder %s5405_s2, %s6534_s7 }
  0x37   :  { %p5411_p12 = pnand %p5409_p11, %p5406_p10 }
  0x39   :  { %5414 = shalt.err (!%p5411_p12)
}
  0x3a   :  { %s5415_s18 = scalar_lea.vmem %s71_s14, 16  ;;  %s5419_s19 = scalar_lea.vmem %s71_s14, 32 }
  0x3b   :  { %p5416_p13 = scmp.ne.s32.totalorder %s71_s14, %s5415_s18  ;;  %p5420_p0 = scmp.lt.s32.totalorder %s71_s14, %s71_s14 }
  0x3c   :  { %p5421_p1 = scmp.lt.s32.totalorder %s5419_s19, %s5415_s18 }
  0x3e   :  { %p5422_p2 = por %p5421_p1, %p5420_p0 }
  0x40   :  { %p5423_p3 = pnand %p5422_p2, %p5416_p13 }
  0x42   :  { %5426 = shalt.err (!%p5423_p3)
}
  0x43   :  { %73 = dma.hbm_to_vmem [thread:$0]  %s6534_s7, 16, %s71_s14, [#allocation8]  }
  0x44   :  { %5427 = dma.done.wait [#allocation3], 512  }
  0x45   :  { %5428 = vsyncadd [#allocation3], 4294966784 }
  0x46   :  { %5429 = dma.done.wait [#allocation5], 1536  }
  0x47   :  { %5430 = vsyncadd [#allocation5], 4294965760 }
  0x48   :  { %5431 = dma.done.wait [#allocation8], 16  }
  0x49   :  { %5432 = vsyncadd [#allocation8], 4294967280  ;;  %v5439_v0 = vmov 0.0|0.0   ;;  %vm5440_vm0 = vmmov 0   ;;  %v5441_v1 = vmov 0.0   ;;  %v94_v2 = vld [vmem:[#allocation4] sm:$0xff] }
  0x4a   :  { %4768 = vmatprep.subr.bf16.mxu0 %v5439_v0  ;;  %4238 = vmatprep.mubr.msk.f32.mxu0 %vm5440_vm0, %v5441_v1  ;;  %v95_v3 = vld [vmem:[#allocation4 + $0x8] sm:$0xff]  ;;  %v96_v4 = vld [vmem:[#allocation4 + $0x10] sm:$0xff]  ;;  %v97_v6 = vld [vmem:[#allocation4 + $0x18] sm:$0xff]  ;;  %vm140_vm1 = vcmask 1041409   ;;  %vm143_vm2 = vcmask 1042434   ;;  %vm146_vm3 = vcmask 1043459  }
  0x4b   :  { %4777 = vmatprep.subr.bf16.mxu1 %v5439_v0  ;;  %4257 = vmatprep.mubr.msk.f32.mxu1 %vm5440_vm0, %v5441_v1  ;;  %v5581_v5 = vpack.c.bf16 %v95_v3, %v94_v2  ;;  %v131_v7 = vld [vmem:[#allocation2] sm:$0x1]  ;;  %v132_v8 = vld [vmem:[#allocation2 + $0x8] sm:$0x1]  ;;  %v133_v9 = vld [vmem:[#allocation2 + $0x10] sm:$0x1]  ;;  %v5584_v10 = vpack.c.bf16 %v97_v6, %v96_v4 }
  0x4c   :  { %v134_v11 = vld [vmem:[#allocation2 + $0x18] sm:$0x1]  ;;  %v139_v12 = vrot.slane %v132_v8, 7  ;;  %v142_v13 = vrot.slane %v133_v9, 6  ;;  %v98_v14 = vld [vmem:[#allocation4 + $0x20] sm:$0xff]  ;;  %v99_v15 = vld [vmem:[#allocation4 + $0x28] sm:$0xff] }
  0x4d   :  { %4770 = vmatpush3.bf16.msra.mxu0 %v5581_v5  ;;  %v145_v16 = vrot.slane %v134_v11, 5  ;;  %v5590_v19 = vpack.c.bf16 %v99_v15, %v98_v14  ;;  %vm149_vm4 = vcmask 130048   ;;  %vm157_vm5 = vcmask 392192   ;;  %v5609_v22 = vld [vmem:[%s6530_s3] ss:$0 sm:$0xff]  ;;  %s5442_s30 = smov 64  }
  0x4e   :  { %4771 = vmatprep.subr.bf16.mxu0 %v5439_v0  ;;  %v141_v17 = vsel %vm140_vm1, %v139_v12, %v131_v7  ;;  %s5443_s14 = smov 32   ;;  %v101_v36 = vld [vmem:[%s6531_s4] sm:$0xff]  ;;  %v102_v37 = vld [vmem:[%s6531_s4 + $0x8] sm:$0xff]  ;;  %v103_v38 = vld [vmem:[%s6531_s4 + $0x10] sm:$0xff]  ;;  %s5444_s6 = smov 48   ;;  %vm259_vm6 = vcmask 261120  }
  0x4f   :  { %v144_v18 = vsel %vm143_vm2, %v142_v13, %v141_v17  ;;  %v5626_v39 = vpack.c.bf16 %v102_v37, %v101_v36  ;;  %v104_v40 = vld [vmem:[%s6531_s4 + $0x18] sm:$0xff]  ;;  %v105_v42 = vld [vmem:[%s6531_s4 + $0x20] sm:$0xff]  ;;  %v106_v43 = vld [vmem:[%s6531_s4 + $0x28] sm:$0xff]  ;;  %vm267_vm7 = vcmask 523264   ;;  %vm2248_vm8 = vcmask 122880  }
  0x50   :  { %v147_v20 = vsel %vm146_vm3, %v145_v16, %v144_v18  ;;  %v5632_v41 = vpack.c.bf16 %v104_v40, %v103_v38  ;;  %v5642_v44 = vpack.c.bf16 %v106_v43, %v105_v42  ;;  %v107_v45 = vld [vmem:[%s6531_s4 + $0x30] sm:$0xff]  ;;  %v108_v46 = vld [vmem:[%s6531_s4 + $0x38] sm:$0xff]  ;;  %v366_v51 = vld [vmem:[#allocation2 + $0x9] sm:$0x1] }
  0x51   :  { %4773 = vmatpush3.bf16.msra.mxu0 %v5584_v10  ;;  %v150_v21 = vsel %vm149_vm4, %v147_v20, 0.0  ;;  %4779 = vmatpush3.bf16.msra.mxu1 %v5626_v39  ;;  %v5653_v48 = vpack.c.bf16 %v108_v46, %v107_v45  ;;  %v367_v52 = vld [vmem:[#allocation2 + $0x11] sm:$0x1]  ;;  %v373_v53 = vrot.slane %v366_v51, 7  ;;  %v365_v54 = vld [vmem:[#allocation2 + $0x1] sm:$0x1] }
  0x52   :  { %4774 = vmatprep.subr.bf16.mxu0 %v5439_v0  ;;  %4780 = vmatprep.subr.bf16.mxu1 %v5439_v0  ;;  %v368_v55 = vld [vmem:[#allocation2 + $0x19] sm:$0x1]  ;;  %v375_v56 = vrot.slane %v367_v52, 6  ;;  %v5688_v3 = vld [vmem:[%s6532_s5] ss:$0 sm:$0xff] }
  0x53   :  { %v374_v57 = vsel %vm140_vm1, %v373_v53, %v365_v54  ;;  %v377_v58 = vrot.slane %v368_v55, 5  ;;  %v589_v43 = vld [vmem:[#allocation2 + $0x12] sm:$0x1]  ;;  %v587_v46 = vld [vmem:[#allocation2 + $0x2] sm:$0x1] }
  0x54   :  { %v376_v59 = vsel %vm143_vm2, %v375_v56, %v374_v57 }
  0x55   :  { %4776 = vmatpush3.bf16.msra.mxu0 %v5590_v19  ;;  %4782 = vmatpush3.bf16.msra.mxu1 %v5632_v41  ;;  %v378_v60 = vsel %vm146_vm3, %v377_v58, %v376_v59 }
  0x56   :  { %4789 = vmatprep.subr.bf16.mxu0 %v5439_v0  ;;  %4783 = vmatprep.subr.bf16.mxu1 %v5439_v0 }
  0x58   :  { %4239 = vmatmul.mubr.msk.f32.vlgmr.msra.gmra.mrb[0].mxu0 %vm157_vm5, %v150_v21 }
  0x59   :  { %4791 = vmatpush3.bf16.msra.mxu0 %v5581_v5  ;;  %4272 = vmatprep.mubr.msk.f32.mxu0 %vm5440_vm0, %v5441_v1 }
  0x5a   :  { %4792 = vmatprep.subr.bf16.mxu0 %v5439_v0  ;;  %4785 = vmatpush3.bf16.msra.mxu1 %v5642_v44 }
  0x5b   :  { %4786 = vmatprep.subr.bf16.mxu1 %v5439_v0 }
  0x5d   :  { %4794 = vmatpush3.bf16.msra.mxu0 %v5584_v10 }
  0x5e   :  { %4795 = vmatprep.subr.bf16.mxu0 %v5439_v0  ;;  %4788 = vmatpush3.bf16.msra.mxu1 %v5653_v48 }
  0x5f   :  { %4798 = vmatprep.subr.bf16.mxu1 %v5439_v0 }
  0x61   :  { %4797 = vmatpush3.bf16.msra.mxu0 %v5590_v19 }
  0x62   :  { %4810 = vmatprep.subr.bf16.mxu0 %v5439_v0 }
 0x12b   :  { %v227_v23 = vpop.f32.mrb[0].mxu0 }
 0x12c   :  { %v228_v24 = vadd.f32 %v5609_v22, %v227_v23  ;;  %v4240_v25 = vpop.f32.mrb[1].mxu0 }
 0x12e   :  { %5111 = vtanh.f32 %v228_v24  ;;  %v3907_v27 = vmul.f32 -1.442695, %v228_v24 }
 0x130   :  { %5113 = vpow2.f32 %v3907_v27 }
 0x138   :  { %v5112_v26 = vpop.eup %5111 }
 0x139   :  { %240 = vrot.lane.b32.xlu0 %v5112_v26, %s5442_s30 }
 0x13a   :  { %v5114_v28 = vpop.eup %5113 }
 0x13b   :  { %v234_v29 = vadd.f32 1.0, %v5114_v28 }
 0x13d   :  { %5115 = vrcp.f32 %v234_v29 }
 0x147   :  { %v5116_v30 = vpop.eup %5115 }
 0x148   :  { %v238_v33 = vmul.f32 0.0, %v5116_v30 }
 0x1ab   :  { %v241_v31 = vpop.permute.xlu0 %240 }
 0x1ac   :  { %v243_v32 = vmul.f32 %v5116_v30, %v241_v31 }
 0x1ae   :  { %245 = vrot.lane.b32.xlu0 %v243_v32, %s5443_s14 }
 0x220   :  { %v246_v34 = vpop.permute.xlu0 %245 }
 0x221   :  { %v5614_v35 = vadd.f32 %v246_v34, %v238_v33 }
 0x223   :  { %5117 = vtanh.f32 %v5614_v35 }
 0x22d   :  { %v5118_v47 = vpop.eup %5117 }
 0x22e   :  { %251 = vrot.lane.b32.xlu1 %v5118_v47, %s5442_s30  ;;  %v590_v47 = vld [vmem:[#allocation2 + $0x1a] sm:$0x1] }
 0x22f   :  { %v599_v51 = vrot.slane %v590_v47, 5 }
 0x2a0   :  { %v252_v49 = vpop.permute.xlu1 %251 }
 0x2a1   :  { %v254_v50 = vmul.f32 %v5116_v30, %v252_v49  ;;  %v597_v49 = vrot.slane %v589_v43, 6 }
 0x2a3   :  { %380 = vrot.lane.b32.xlu0 %v254_v50, %s5444_s6  ;;  %256 = vrot.lane.b32.xlu1 %v254_v50, %s5443_s14 }
 0x315   :  { %v381_v61 = vpop.permute.xlu0 %380  ;;  %v257_v62 = vpop.permute.xlu1 %256 }
 0x316   :  { %v383_v63 = vsel %vm149_vm4, %v378_v60, %v381_v61  ;;  %v260_v2 = vsel %vm259_vm6, %v257_v62, 0.0 }
 0x317   :  { %4258 = vmatmul.mubr.msk.f32.vlgmr.msra.gmra.mrb[0].mxu1 %vm267_vm7, %v260_v2  ;;  %4273 = vmatmul.mubr.msk.f32.vlgmr.msra.gmra.mrb[2].mxu0 %vm157_vm5, %v383_v63 }
 0x318   :  { %4800 = vmatpush3.bf16.msra.mxu1 %v5626_v39  ;;  %4812 = vmatpush3.bf16.msra.mxu0 %v5581_v5 }
 0x319   :  { %4801 = vmatprep.subr.bf16.mxu1 %v5439_v0  ;;  %4813 = vmatprep.subr.bf16.mxu0 %v5439_v0 }
 0x31a   :  { %4291 = vmatprep.mubr.msk.f32.mxu1 %vm5440_vm0, %v5441_v1  ;;  %4306 = vmatprep.mubr.msk.f32.mxu0 %vm5440_vm0, %v5441_v1 }
 0x31c   :  { %4803 = vmatpush3.bf16.msra.mxu1 %v5632_v41  ;;  %4815 = vmatpush3.bf16.msra.mxu0 %v5584_v10 }
 0x31d   :  { %4804 = vmatprep.subr.bf16.mxu1 %v5439_v0  ;;  %4816 = vmatprep.subr.bf16.mxu0 %v5439_v0 }
 0x320   :  { %4806 = vmatpush3.bf16.msra.mxu1 %v5642_v44  ;;  %4818 = vmatpush3.bf16.msra.mxu0 %v5590_v19 }
 0x321   :  { %4807 = vmatprep.subr.bf16.mxu1 %v5439_v0  ;;  %4831 = vmatprep.subr.bf16.mxu0 %v5439_v0 }
 0x324   :  { %4809 = vmatpush3.bf16.msra.mxu1 %v5653_v48 }
 0x325   :  { %4819 = vmatprep.subr.bf16.mxu1 %v5439_v0 }
 0x3ea   :  { %v337_v4 = vpop.f32.mrb[0].mxu1  ;;  %v453_v6 = vpop.f32.mrb[2].mxu0 }
 0x3eb   :  { %v338_v7 = vadd.f32 %v5688_v3, %v337_v4  ;;  %v454_v8 = vadd.f32 %v5609_v22, %v453_v6  ;;  %v4259_v9 = vpop.f32.mrb[1].mxu1  ;;  %v4274_v11 = vpop.f32.mrb[3].mxu0 }
 0x3ed   :  { %5119 = vtanh.f32 %v338_v7  ;;  %v3910_v14 = vmul.f32 -1.442695, %v338_v7  ;;  %v3912_v15 = vmul.f32 -1.442695, %v454_v8 }
 0x3ee   :  { %5121 = vtanh.f32 %v454_v8 }
 0x3ef   :  { %5123 = vpow2.f32 %v3910_v14 }
 0x3f0   :  { %5125 = vpow2.f32 %v3912_v15 }
 0x3f7   :  { %v5120_v12 = vpop.eup %5119 }
 0x3f8   :  { %v5122_v13 = vpop.eup %5121  ;;  %350 = vrot.lane.b32.xlu1 %v5120_v12, %s5442_s30 }
 0x3f9   :  { %466 = vrot.lane.b32.xlu0 %v5122_v13, %s5442_s30  ;;  %v5124_v16 = vpop.eup %5123 }
 0x3fa   :  { %v5126_v17 = vpop.eup %5125  ;;  %v344_v18 = vadd.f32 1.0, %v5124_v16 }
 0x3fb   :  { %v460_v20 = vadd.f32 1.0, %v5126_v17 }
 0x3fc   :  { %5127 = vrcp.f32 %v344_v18 }
 0x3fd   :  { %5129 = vrcp.f32 %v460_v20 }
 0x406   :  { %v5128_v21 = vpop.eup %5127 }
 0x407   :  { %v5130_v24 = vpop.eup %5129  ;;  %v348_v28 = vmul.f32 0.0, %v5128_v21 }
 0x408   :  { %v464_v30 = vmul.f32 %v5130_v24, %v5614_v35  ;;  %v588_v35 = vld [vmem:[#allocation2 + $0xa] sm:$0x1] }
 0x409   :  { %v595_v45 = vrot.slane %v588_v35, 7 }
 0x40b   :  { %v596_v50 = vsel %vm140_vm1, %v595_v45, %v587_v46 }
 0x40c   :  { %v598_v53 = vsel %vm143_vm2, %v597_v49, %v596_v50 }
 0x40d   :  { %v600_v56 = vsel %vm146_vm3, %v599_v51, %v598_v53 }
 0x46a   :  { %v351_v23 = vpop.permute.xlu1 %350 }
 0x46b   :  { %v353_v25 = vmul.f32 %v5128_v21, %v351_v23  ;;  %v467_v26 = vpop.permute.xlu0 %466 }
 0x46c   :  { %v469_v27 = vmul.f32 %v5130_v24, %v467_v26 }
 0x46d   :  { %355 = vrot.lane.b32.xlu1 %v353_v25, %s5443_s14 }
 0x46e   :  { %471 = vrot.lane.b32.xlu0 %v469_v27, %s5443_s14 }
 0x4df   :  { %v356_v29 = vpop.permute.xlu1 %355 }
 0x4e0   :  { %v5697_v31 = vadd.f32 %v356_v29, %v348_v28  ;;  %v472_v32 = vpop.permute.xlu0 %471 }
 0x4e1   :  { %v5699_v33 = vadd.f32 %v472_v32, %v464_v30 }
 0x4e2   :  { %5131 = vtanh.f32 %v5697_v31 }
 0x4e3   :  { %5133 = vtanh.f32 %v5699_v33 }
 0x4ec   :  { %v5132_v34 = vpop.eup %5131 }
 0x4ed   :  { %v5134_v36 = vpop.eup %5133  ;;  %361 = vrot.lane.b32.xlu1 %v5132_v34, %s5442_s30 }
 0x4ee   :  { %477 = vrot.lane.b32.xlu0 %v5134_v36, %s5442_s30  ;;  %v811_v36 = vld [vmem:[#allocation2 + $0x13] sm:$0x1] }
 0x55f   :  { %v362_v37 = vpop.permute.xlu1 %361 }
 0x560   :  { %v364_v38 = vmul.f32 %v5128_v21, %v362_v37  ;;  %v478_v40 = vpop.permute.xlu0 %477 }
 0x561   :  { %v480_v42 = vmul.f32 %v5130_v24, %v478_v40  ;;  %v812_v40 = vld [vmem:[#allocation2 + $0x1b] sm:$0x1] }
 0x562   :  { %486 = vrot.lane.b32.xlu0 %v364_v38, %s5442_s30  ;;  %v809_v38 = vld [vmem:[#allocation2 + $0x3] sm:$0x1]  ;;  %v821_v43 = vrot.slane %v812_v40, 5 }
 0x563   :  { %482 = vrot.lane.b32.xlu1 %v480_v42, %s5443_s14 }
 0x567   :  { %602 = vrot.lane.b32.xlu1 %v480_v42, %s5444_s6  ;;  %v819_v42 = vrot.slane %v811_v36, 6 }
 0x5d4   :  { %v487_v52 = vpop.permute.xlu0 %486 }
 0x5d5   :  { %v483_v54 = vpop.permute.xlu1 %482 }
 0x5d6   :  { %v489_v55 = vsel %vm259_vm6, %v483_v54, %v487_v52 }
 0x5d7   :  { %4292 = vmatmul.mubr.msk.f32.vlgmr.msra.gmra.mrb[2].mxu1 %vm267_vm7, %v489_v55 }
 0x5d8   :  { %4821 = vmatpush3.bf16.msra.mxu1 %v5626_v39  ;;  %4325 = vmatprep.mubr.msk.f32.mxu1 %vm5440_vm0, %v5441_v1 }
 0x5d9   :  { %v603_v57 = vpop.permute.xlu1 %602  ;;  %4822 = vmatprep.subr.bf16.mxu1 %v5439_v0 }
 0x5da   :  { %v605_v58 = vsel %vm149_vm4, %v600_v56, %v603_v57 }
 0x5db   :  { %4307 = vmatmul.mubr.msk.f32.vlgmr.msra.gmra.mrb[4].mxu0 %vm157_vm5, %v605_v58 }
 0x5dc   :  { %4824 = vmatpush3.bf16.msra.mxu1 %v5632_v41  ;;  %4833 = vmatpush3.bf16.msra.mxu0 %v5581_v5 }
 0x5dd   :  { %4825 = vmatprep.subr.bf16.mxu1 %v5439_v0  ;;  %4834 = vmatprep.subr.bf16.mxu0 %v5439_v0 }
 0x5de   :  { %4340 = vmatprep.mubr.msk.f32.mxu0 %vm5440_vm0, %v5441_v1 }
 0x5e0   :  { %4827 = vmatpush3.bf16.msra.mxu1 %v5642_v44  ;;  %4836 = vmatpush3.bf16.msra.mxu0 %v5584_v10 }
 0x5e1   :  { %4828 = vmatprep.subr.bf16.mxu1 %v5439_v0  ;;  %4837 = vmatprep.subr.bf16.mxu0 %v5439_v0 }
 0x5e4   :  { %4830 = vmatpush3.bf16.msra.mxu1 %v5653_v48  ;;  %4839 = vmatpush3.bf16.msra.mxu0 %v5590_v19 }
 0x5e5   :  { %4840 = vmatprep.subr.bf16.mxu0 %v5439_v0  ;;  %4852 = vmatprep.subr.bf16.mxu1 %v5439_v0 }
 0x6aa   :  { %v559_v59 = vpop.f32.mrb[2].mxu1 }
 0x6ab   :  { %v560_v60 = vadd.f32 %v5688_v3, %v559_v59  ;;  %v4293_v61 = vpop.f32.mrb[3].mxu1 }
 0x6ad   :  { %5135 = vtanh.f32 %v560_v60  ;;  %v3914_v7 = vmul.f32 -1.442695, %v560_v60 }
 0x6ae   :  { %v675_v62 = vpop.f32.mrb[4].mxu0 }
 0x6af   :  { %v676_v63 = vadd.f32 %v5609_v22, %v675_v62  ;;  %v4308_v2 = vpop.f32.mrb[5].mxu0 }
 0x6b1   :  { %5137 = vtanh.f32 %v676_v63  ;;  %v3916_v8 = vmul.f32 -1.442695, %v676_v63 }
 0x6b2   :  { %5139 = vpow2.f32 %v3914_v7 }
 0x6b3   :  { %5141 = vpow2.f32 %v3916_v8 }
 0x6b7   :  { %v5136_v4 = vpop.eup %5135 }
 0x6b8   :  { %572 = vrot.lane.b32.xlu0 %v5136_v4, %s5442_s30 }
 0x6bb   :  { %v5138_v6 = vpop.eup %5137 }
 0x6bc   :  { %688 = vrot.lane.b32.xlu1 %v5138_v6, %s5442_s30  ;;  %v5140_v9 = vpop.eup %5139 }
 0x6bd   :  { %v566_v11 = vadd.f32 1.0, %v5140_v9  ;;  %v5142_v12 = vpop.eup %5141 }
 0x6be   :  { %v682_v13 = vadd.f32 1.0, %v5142_v12 }
 0x6bf   :  { %5143 = vrcp.f32 %v566_v11 }
 0x6c0   :  { %5145 = vrcp.f32 %v682_v13 }
 0x6c9   :  { %v5144_v14 = vpop.eup %5143 }
 0x6ca   :  { %v5146_v17 = vpop.eup %5145  ;;  %v570_v21 = vmul.f32 %v5144_v14, %v5697_v31 }
 0x6cb   :  { %v686_v25 = vmul.f32 %v5146_v17, %v5699_v33  ;;  %v810_v33 = vld [vmem:[#allocation2 + $0xb] sm:$0x1] }
 0x6cc   :  { %v817_v37 = vrot.slane %v810_v33, 7 }
 0x6ce   :  { %v818_v35 = vsel %vm140_vm1, %v817_v37, %v809_v38 }
 0x6cf   :  { %v820_v45 = vsel %vm143_vm2, %v819_v42, %v818_v35 }
 0x6d0   :  { %v822_v50 = vsel %vm146_vm3, %v821_v43, %v820_v45 }
 0x72a   :  { %v573_v15 = vpop.permute.xlu0 %572 }
 0x72b   :  { %v575_v16 = vmul.f32 %v5144_v14, %v573_v15 }
 0x72d   :  { %577 = vrot.lane.b32.xlu0 %v575_v16, %s5443_s14 }
 0x72e   :  { %v689_v18 = vpop.permute.xlu1 %688 }
 0x72f   :  { %v691_v20 = vmul.f32 %v5146_v17, %v689_v18 }
 0x731   :  { %693 = vrot.lane.b32.xlu1 %v691_v20, %s5443_s14 }
 0x79f   :  { %v578_v23 = vpop.permute.xlu0 %577 }
 0x7a0   :  { %v5740_v24 = vadd.f32 %v578_v23, %v570_v21 }
 0x7a2   :  { %5147 = vtanh.f32 %v5740_v24 }
 0x7a3   :  { %v694_v26 = vpop.permute.xlu1 %693 }
 0x7a4   :  { %v5744_v27 = vadd.f32 %v694_v26, %v686_v25 }
 0x7a6   :  { %5149 = vtanh.f32 %v5744_v27 }
 0x7ac   :  { %v5148_v28 = vpop.eup %5147 }
 0x7ad   :  { %583 = vrot.lane.b32.xlu0 %v5148_v28, %s5442_s30 }
 0x7b0   :  { %v5150_v29 = vpop.eup %5149 }
 0x7b1   :  { %699 = vrot.lane.b32.xlu1 %v5150_v29, %s5442_s30  ;;  %v1033_v29 = vld [vmem:[#allocation2 + $0x14] sm:$0x1] }
 0x81f   :  { %v584_v30 = vpop.permute.xlu0 %583 }
 0x820   :  { %v586_v31 = vmul.f32 %v5144_v14, %v584_v30 }
 0x822   :  { %708 = vrot.lane.b32.xlu1 %v586_v31, %s5442_s30  ;;  %v1031_v31 = vld [vmem:[#allocation2 + $0x4] sm:$0x1] }
 0x823   :  { %v700_v32 = vpop.permute.xlu1 %699 }
 0x824   :  { %v702_v34 = vmul.f32 %v5146_v17, %v700_v32  ;;  %v1034_v32 = vld [vmem:[#allocation2 + $0x1c] sm:$0x1] }
 0x825   :  { %v1043_v36 = vrot.slane %v1034_v32, 5 }
 0x826   :  { %704 = vrot.lane.b32.xlu0 %v702_v34, %s5443_s14 }
 0x82a   :  { %824 = vrot.lane.b32.xlu0 %v702_v34, %s5444_s6  ;;  %v1041_v34 = vrot.slane %v1033_v29, 6 }
 0x894   :  { %v709_v46 = vpop.permute.xlu1 %708 }
 0x898   :  { %v705_v47 = vpop.permute.xlu0 %704 }
 0x899   :  { %v711_v49 = vsel %vm259_vm6, %v705_v47, %v709_v46 }
 0x89a   :  { %4326 = vmatmul.mubr.msk.f32.vlgmr.msra.gmra.mrb[4].mxu1 %vm267_vm7, %v711_v49 }
 0x89b   :  { %4854 = vmatpush3.bf16.msra.mxu1 %v5581_v5  ;;  %4374 = vmatprep.mubr.msk.f32.mxu1 %vm5440_vm0, %v5441_v1 }
 0x89c   :  { %v825_v51 = vpop.permute.xlu0 %824  ;;  %4855 = vmatprep.subr.bf16.mxu1 %v5439_v0 }
 0x89d   :  { %v827_v52 = vsel %vm149_vm4, %v822_v50, %v825_v51 }
 0x89e   :  { %4341 = vmatmul.mubr.msk.f32.vlgmr.msra.gmra.mrb[6].mxu0 %vm157_vm5, %v827_v52 }
 0x89f   :  { %4842 = vmatpush3.bf16.msra.mxu0 %v5626_v39  ;;  %4857 = vmatpush3.bf16.msra.mxu1 %v5584_v10 }
 0x8a0   :  { %4843 = vmatprep.subr.bf16.mxu0 %v5439_v0  ;;  %4359 = vmatprep.mubr.msk.f32.mxu0 %vm5440_vm0, %v5441_v1 }
 0x8a1   :  { %4858 = vmatprep.subr.bf16.mxu1 %v5439_v0 }
 0x8a3   :  { %4845 = vmatpush3.bf16.msra.mxu0 %v5632_v41  ;;  %4860 = vmatpush3.bf16.msra.mxu1 %v5590_v19 }
 0x8a4   :  { %4846 = vmatprep.subr.bf16.mxu0 %v5439_v0  ;;  %4861 = vmatprep.subr.bf16.mxu1 %v5439_v0 }
 0x8a7   :  { %4848 = vmatpush3.bf16.msra.mxu0 %v5642_v44 }
 0x8a8   :  { %4849 = vmatprep.subr.bf16.mxu0 %v5439_v0 }
 0x8ab   :  { %4851 = vmatpush3.bf16.msra.mxu0 %v5653_v48 }
 0x8ac   :  { %4873 = vmatprep.subr.bf16.mxu0 %v5439_v0 }
 0x96d   :  { %v781_v53 = vpop.f32.mrb[4].mxu1 }
 0x96e   :  { %v782_v54 = vadd.f32 %v5688_v3, %v781_v53  ;;  %v4327_v55 = vpop.f32.mrb[5].mxu1 }
 0x970   :  { %5151 = vtanh.f32 %v782_v54  ;;  %v3918_v61 = vmul.f32 -1.442695, %v782_v54 }
 0x971   :  { %v897_v56 = vpop.f32.mrb[6].mxu0 }
 0x972   :  { %v898_v57 = vadd.f32 %v5609_v22, %v897_v56  ;;  %v4342_v58 = vpop.f32.mrb[7].mxu0 }
 0x974   :  { %5153 = vtanh.f32 %v898_v57  ;;  %v3920_v62 = vmul.f32 -1.442695, %v898_v57 }
 0x975   :  { %5155 = vpow2.f32 %v3918_v61 }
 0x976   :  { %5157 = vpow2.f32 %v3920_v62 }
 0x97a   :  { %v5152_v59 = vpop.eup %5151 }
 0x97b   :  { %794 = vrot.lane.b32.xlu1 %v5152_v59, %s5442_s30 }
 0x97e   :  { %v5154_v60 = vpop.eup %5153 }
 0x97f   :  { %910 = vrot.lane.b32.xlu0 %v5154_v60, %s5442_s30  ;;  %v5156_v63 = vpop.eup %5155 }
 0x980   :  { %v788_v2 = vadd.f32 1.0, %v5156_v63  ;;  %v5158_v4 = vpop.eup %5157 }
 0x981   :  { %v904_v6 = vadd.f32 1.0, %v5158_v4 }
 0x982   :  { %5159 = vrcp.f32 %v788_v2 }
 0x983   :  { %5161 = vrcp.f32 %v904_v6 }
 0x98c   :  { %v5160_v7 = vpop.eup %5159 }
 0x98d   :  { %v5162_v11 = vpop.eup %5161  ;;  %v792_v14 = vmul.f32 %v5160_v7, %v5740_v24 }
 0x98e   :  { %v908_v17 = vmul.f32 %v5162_v11, %v5744_v27  ;;  %v1032_v27 = vld [vmem:[#allocation2 + $0xc] sm:$0x1] }
 0x98f   :  { %v1039_v30 = vrot.slane %v1032_v27, 7 }
 0x991   :  { %v1040_v33 = vsel %vm140_vm1, %v1039_v30, %v1031_v31 }
 0x992   :  { %v1042_v37 = vsel %vm143_vm2, %v1041_v34, %v1040_v33 }
 0x993   :  { %v1044_v35 = vsel %vm146_vm3, %v1043_v36, %v1042_v37 }
 0x9ed   :  { %v795_v8 = vpop.permute.xlu1 %794 }
 0x9ee   :  { %v797_v9 = vmul.f32 %v5160_v7, %v795_v8 }
 0x9f0   :  { %799 = vrot.lane.b32.xlu1 %v797_v9, %s5443_s14 }
 0x9f1   :  { %v911_v12 = vpop.permute.xlu0 %910 }
 0x9f2   :  { %v913_v13 = vmul.f32 %v5162_v11, %v911_v12 }
 0x9f4   :  { %915 = vrot.lane.b32.xlu0 %v913_v13, %s5443_s14 }
 0xa62   :  { %v800_v15 = vpop.permute.xlu1 %799 }
 0xa63   :  { %v5784_v16 = vadd.f32 %v800_v15, %v792_v14 }
 0xa65   :  { %5163 = vtanh.f32 %v5784_v16 }
 0xa66   :  { %v916_v18 = vpop.permute.xlu0 %915 }
 0xa67   :  { %v5788_v20 = vadd.f32 %v916_v18, %v908_v17 }
 0xa69   :  { %5165 = vtanh.f32 %v5788_v20 }
 0xa6f   :  { %v5164_v21 = vpop.eup %5163 }
 0xa70   :  { %805 = vrot.lane.b32.xlu1 %v5164_v21, %s5442_s30 }
 0xa73   :  { %v5166_v23 = vpop.eup %5165 }
 0xa74   :  { %921 = vrot.lane.b32.xlu0 %v5166_v23, %s5442_s30  ;;  %v1255_v23 = vld [vmem:[#allocation2 + $0x15] sm:$0x1] }
 0xae2   :  { %v806_v25 = vpop.permute.xlu1 %805 }
 0xae3   :  { %v808_v24 = vmul.f32 %v5160_v7, %v806_v25 }
 0xae5   :  { %930 = vrot.lane.b32.xlu0 %v808_v24, %s5442_s30  ;;  %v1253_v24 = vld [vmem:[#allocation2 + $0x5] sm:$0x1] }
 0xae6   :  { %v922_v26 = vpop.permute.xlu0 %921 }
 0xae7   :  { %v924_v28 = vmul.f32 %v5162_v11, %v922_v26  ;;  %v1256_v26 = vld [vmem:[#allocation2 + $0x1d] sm:$0x1] }
 0xae8   :  { %v1265_v29 = vrot.slane %v1256_v26, 5 }
 0xae9   :  { %926 = vrot.lane.b32.xlu1 %v924_v28, %s5443_s14 }
 0xaed   :  { %1046 = vrot.lane.b32.xlu1 %v924_v28, %s5444_s6  ;;  %v1263_v28 = vrot.slane %v1255_v23, 6 }
 0xb57   :  { %v931_v38 = vpop.permute.xlu0 %930 }
 0xb5b   :  { %v927_v40 = vpop.permute.xlu1 %926 }
 0xb5c   :  { %v933_v42 = vsel %vm259_vm6, %v927_v40, %v931_v38 }
 0xb5d   :  { %4360 = vmatmul.mubr.msk.f32.vlgmr.msra.gmra.mrb[8].mxu0 %vm267_vm7, %v933_v42 }
 0xb5e   :  { %4875 = vmatpush3.bf16.msra.mxu0 %v5581_v5  ;;  %4408 = vmatprep.mubr.msk.f32.mxu0 %vm5440_vm0, %v5441_v1 }
 0xb5f   :  { %v1047_v43 = vpop.permute.xlu1 %1046  ;;  %4876 = vmatprep.subr.bf16.mxu0 %v5439_v0 }
 0xb60   :  { %v1049_v45 = vsel %vm149_vm4, %v1044_v35, %v1047_v43 }
 0xb61   :  { %4375 = vmatmul.mubr.msk.f32.vlgmr.msra.gmra.mrb[6].mxu1 %vm157_vm5, %v1049_v45 }
 0xb62   :  { %4863 = vmatpush3.bf16.msra.mxu1 %v5626_v39  ;;  %4878 = vmatpush3.bf16.msra.mxu0 %v5584_v10 }
 0xb63   :  { %4864 = vmatprep.subr.bf16.mxu1 %v5439_v0  ;;  %4393 = vmatprep.mubr.msk.f32.mxu1 %vm5440_vm0, %v5441_v1 }
 0xb64   :  { %4879 = vmatprep.subr.bf16.mxu0 %v5439_v0 }
 0xb66   :  { %4866 = vmatpush3.bf16.msra.mxu1 %v5632_v41  ;;  %4881 = vmatpush3.bf16.msra.mxu0 %v5590_v19 }
 0xb67   :  { %4867 = vmatprep.subr.bf16.mxu1 %v5439_v0  ;;  %4882 = vmatprep.subr.bf16.mxu0 %v5439_v0 }
 0xb6a   :  { %4869 = vmatpush3.bf16.msra.mxu1 %v5642_v44 }
 0xb6b   :  { %4870 = vmatprep.subr.bf16.mxu1 %v5439_v0 }
 0xb6e   :  { %4872 = vmatpush3.bf16.msra.mxu1 %v5653_v48 }
 0xb6f   :  { %4894 = vmatprep.subr.bf16.mxu1 %v5439_v0 }
 0xc30   :  { %v1003_v46 = vpop.f32.mrb[8].mxu0 }
 0xc31   :  { %v1004_v47 = vadd.f32 %v5688_v3, %v1003_v46  ;;  %v4361_v49 = vpop.f32.mrb[9].mxu0 }
 0xc33   :  { %5167 = vtanh.f32 %v1004_v47  ;;  %v3922_v55 = vmul.f32 -1.442695, %v1004_v47 }
 0xc34   :  { %v1119_v50 = vpop.f32.mrb[6].mxu1 }
 0xc35   :  { %v1120_v51 = vadd.f32 %v5609_v22, %v1119_v50  ;;  %v4376_v52 = vpop.f32.mrb[7].mxu1 }
 0xc37   :  { %5169 = vtanh.f32 %v1120_v51  ;;  %v3924_v56 = vmul.f32 -1.442695, %v1120_v51 }
 0xc38   :  { %5171 = vpow2.f32 %v3922_v55 }
 0xc39   :  { %5173 = vpow2.f32 %v3924_v56 }
 0xc3d   :  { %v5168_v53 = vpop.eup %5167 }
 0xc3e   :  { %1016 = vrot.lane.b32.xlu0 %v5168_v53, %s5442_s30 }
 0xc41   :  { %v5170_v54 = vpop.eup %5169 }
 0xc42   :  { %1132 = vrot.lane.b32.xlu1 %v5170_v54, %s5442_s30  ;;  %v5172_v57 = vpop.eup %5171 }
 0xc43   :  { %v1010_v58 = vadd.f32 1.0, %v5172_v57  ;;  %v5174_v59 = vpop.eup %5173 }
 0xc44   :  { %v1126_v60 = vadd.f32 1.0, %v5174_v59 }
 0xc45   :  { %5175 = vrcp.f32 %v1010_v58 }
 0xc46   :  { %5177 = vrcp.f32 %v1126_v60 }
 0xc4f   :  { %v5176_v61 = vpop.eup %5175 }
 0xc50   :  { %v5178_v2 = vpop.eup %5177  ;;  %v1014_v7 = vmul.f32 %v5176_v61, %v5784_v16 }
 0xc51   :  { %v1130_v11 = vmul.f32 %v5178_v2, %v5788_v20  ;;  %v1254_v20 = vld [vmem:[#allocation2 + $0xd] sm:$0x1] }
 0xc52   :  { %v1261_v25 = vrot.slane %v1254_v20, 7 }
 0xc54   :  { %v1262_v27 = vsel %vm140_vm1, %v1261_v25, %v1253_v24 }
 0xc55   :  { %v1264_v30 = vsel %vm143_vm2, %v1263_v28, %v1262_v27 }
 0xc56   :  { %v1266_v33 = vsel %vm146_vm3, %v1265_v29, %v1264_v30 }
 0xcb0   :  { %v1017_v62 = vpop.permute.xlu0 %1016 }
 0xcb1   :  { %v1019_v63 = vmul.f32 %v5176_v61, %v1017_v62 }
 0xcb3   :  { %1021 = vrot.lane.b32.xlu0 %v1019_v63, %s5443_s14 }
 0xcb4   :  { %v1133_v4 = vpop.permute.xlu1 %1132 }
 0xcb5   :  { %v1135_v6 = vmul.f32 %v5178_v2, %v1133_v4 }
 0xcb7   :  { %1137 = vrot.lane.b32.xlu1 %v1135_v6, %s5443_s14 }
 0xd25   :  { %v1022_v8 = vpop.permute.xlu0 %1021 }
 0xd26   :  { %v5828_v9 = vadd.f32 %v1022_v8, %v1014_v7 }
 0xd28   :  { %5179 = vtanh.f32 %v5828_v9 }
 0xd29   :  { %v1138_v12 = vpop.permute.xlu1 %1137 }
 0xd2a   :  { %v5832_v13 = vadd.f32 %v1138_v12, %v1130_v11 }
 0xd2c   :  { %5181 = vtanh.f32 %v5832_v13 }
 0xd32   :  { %v5180_v14 = vpop.eup %5179 }
 0xd33   :  { %1027 = vrot.lane.b32.xlu0 %v5180_v14, %s5442_s30 }
 0xd36   :  { %v5182_v15 = vpop.eup %5181 }
 0xd37   :  { %1143 = vrot.lane.b32.xlu1 %v5182_v15, %s5442_s30  ;;  %v1477_v15 = vld [vmem:[#allocation2 + $0x16] sm:$0x1] }
 0xda5   :  { %v1028_v17 = vpop.permute.xlu0 %1027 }
 0xda6   :  { %v1030_v16 = vmul.f32 %v5176_v61, %v1028_v17 }
 0xda8   :  { %1152 = vrot.lane.b32.xlu1 %v1030_v16, %s5442_s30  ;;  %v1475_v16 = vld [vmem:[#allocation2 + $0x6] sm:$0x1] }
 0xda9   :  { %v1144_v18 = vpop.permute.xlu1 %1143 }
 0xdaa   :  { %v1146_v21 = vmul.f32 %v5178_v2, %v1144_v18  ;;  %v1478_v18 = vld [vmem:[#allocation2 + $0x1e] sm:$0x1] }
 0xdab   :  { %v1487_v23 = vrot.slane %v1478_v18, 5 }
 0xdac   :  { %1148 = vrot.lane.b32.xlu0 %v1146_v21, %s5443_s14 }
 0xdb0   :  { %1268 = vrot.lane.b32.xlu0 %v1146_v21, %s5444_s6  ;;  %v1485_v21 = vrot.slane %v1477_v15, 6 }
 0xe1a   :  { %v1153_v31 = vpop.permute.xlu1 %1152 }
 0xe1e   :  { %v1149_v32 = vpop.permute.xlu0 %1148 }
 0xe1f   :  { %v1155_v34 = vsel %vm259_vm6, %v1149_v32, %v1153_v31 }
 0xe20   :  { %4394 = vmatmul.mubr.msk.f32.vlgmr.msra.gmra.mrb[8].mxu1 %vm267_vm7, %v1155_v34 }
 0xe21   :  { %4896 = vmatpush3.bf16.msra.mxu1 %v5581_v5  ;;  %4442 = vmatprep.mubr.msk.f32.mxu1 %vm5440_vm0, %v5441_v1 }
 0xe22   :  { %v1269_v36 = vpop.permute.xlu0 %1268  ;;  %4897 = vmatprep.subr.bf16.mxu1 %v5439_v0 }
 0xe23   :  { %v1271_v37 = vsel %vm149_vm4, %v1266_v33, %v1269_v36 }
 0xe24   :  { %4409 = vmatmul.mubr.msk.f32.vlgmr.msra.gmra.mrb[10].mxu0 %vm157_vm5, %v1271_v37 }
 0xe25   :  { %4884 = vmatpush3.bf16.msra.mxu0 %v5626_v39  ;;  %4899 = vmatpush3.bf16.msra.mxu1 %v5584_v10 }
 0xe26   :  { %4885 = vmatprep.subr.bf16.mxu0 %v5439_v0  ;;  %4427 = vmatprep.mubr.msk.f32.mxu0 %vm5440_vm0, %v5441_v1 }
 0xe27   :  { %4900 = vmatprep.subr.bf16.mxu1 %v5439_v0 }
 0xe29   :  { %4887 = vmatpush3.bf16.msra.mxu0 %v5632_v41  ;;  %4902 = vmatpush3.bf16.msra.mxu1 %v5590_v19 }
 0xe2a   :  { %4888 = vmatprep.subr.bf16.mxu0 %v5439_v0  ;;  %4903 = vmatprep.subr.bf16.mxu1 %v5439_v0 }
 0xe2d   :  { %4890 = vmatpush3.bf16.msra.mxu0 %v5642_v44 }
 0xe2e   :  { %4891 = vmatprep.subr.bf16.mxu0 %v5439_v0 }
 0xe31   :  { %4893 = vmatpush3.bf16.msra.mxu0 %v5653_v48 }
 0xe32   :  { %4915 = vmatprep.subr.bf16.mxu0 %v5439_v0 }
 0xef3   :  { %v1225_v38 = vpop.f32.mrb[8].mxu1 }
 0xef4   :  { %v1226_v40 = vadd.f32 %v5688_v3, %v1225_v38  ;;  %v4395_v42 = vpop.f32.mrb[9].mxu1 }
 0xef6   :  { %5183 = vtanh.f32 %v1226_v40  ;;  %v3926_v49 = vmul.f32 -1.442695, %v1226_v40 }
 0xef7   :  { %v1341_v35 = vpop.f32.mrb[10].mxu0 }
 0xef8   :  { %v1342_v43 = vadd.f32 %v5609_v22, %v1341_v35  ;;  %v4410_v45 = vpop.f32.mrb[11].mxu0 }
 0xefa   :  { %5185 = vtanh.f32 %v1342_v43  ;;  %v3928_v50 = vmul.f32 -1.442695, %v1342_v43 }
 0xefb   :  { %5187 = vpow2.f32 %v3926_v49 }
 0xefc   :  { %5189 = vpow2.f32 %v3928_v50 }
 0xf00   :  { %v5184_v46 = vpop.eup %5183 }
 0xf01   :  { %1238 = vrot.lane.b32.xlu1 %v5184_v46, %s5442_s30 }
 0xf04   :  { %v5186_v47 = vpop.eup %5185 }
 0xf05   :  { %1354 = vrot.lane.b32.xlu0 %v5186_v47, %s5442_s30  ;;  %v5188_v51 = vpop.eup %5187 }
 0xf06   :  { %v1232_v52 = vadd.f32 1.0, %v5188_v51  ;;  %v5190_v53 = vpop.eup %5189 }
 0xf07   :  { %v1348_v54 = vadd.f32 1.0, %v5190_v53 }
 0xf08   :  { %5191 = vrcp.f32 %v1232_v52 }
 0xf09   :  { %5193 = vrcp.f32 %v1348_v54 }
 0xf12   :  { %v5192_v55 = vpop.eup %5191 }
 0xf13   :  { %v5194_v58 = vpop.eup %5193  ;;  %v1236_v61 = vmul.f32 %v5192_v55, %v5828_v9 }
 0xf14   :  { %v1352_v2 = vmul.f32 %v5194_v58, %v5832_v13  ;;  %v1476_v13 = vld [vmem:[#allocation2 + $0xe] sm:$0x1] }
 0xf15   :  { %v1483_v17 = vrot.slane %v1476_v13, 7 }
 0xf17   :  { %v1484_v20 = vsel %vm140_vm1, %v1483_v17, %v1475_v16 }
 0xf18   :  { %v1486_v25 = vsel %vm143_vm2, %v1485_v21, %v1484_v20 }
 0xf19   :  { %v1488_v27 = vsel %vm146_vm3, %v1487_v23, %v1486_v25 }
 0xf73   :  { %v1239_v56 = vpop.permute.xlu1 %1238 }
 0xf74   :  { %v1241_v57 = vmul.f32 %v5192_v55, %v1239_v56 }
 0xf76   :  { %1243 = vrot.lane.b32.xlu1 %v1241_v57, %s5443_s14 }
 0xf77   :  { %v1355_v59 = vpop.permute.xlu0 %1354 }
 0xf78   :  { %v1357_v60 = vmul.f32 %v5194_v58, %v1355_v59 }
 0xf7a   :  { %1359 = vrot.lane.b32.xlu0 %v1357_v60, %s5443_s14 }
 0xfe8   :  { %v1244_v62 = vpop.permute.xlu1 %1243 }
 0xfe9   :  { %v5872_v63 = vadd.f32 %v1244_v62, %v1236_v61 }
 0xfeb   :  { %5195 = vtanh.f32 %v5872_v63 }
 0xfec   :  { %v1360_v4 = vpop.permute.xlu0 %1359 }
 0xfed   :  { %v5876_v6 = vadd.f32 %v1360_v4, %v1352_v2  ;;  %v1699_v2 = vld [vmem:[#allocation2 + $0x17] sm:$0x1] }
 0xfef   :  { %5197 = vtanh.f32 %v5876_v6 }
 0xff5   :  { %v5196_v7 = vpop.eup %5195 }
 0xff6   :  { %1249 = vrot.lane.b32.xlu1 %v5196_v7, %s5442_s30  ;;  %v1700_v7 = vld [vmem:[#allocation2 + $0x1f] sm:$0x1] }
 0xff9   :  { %v5198_v8 = vpop.eup %5197 }
 0xffa   :  { %1365 = vrot.lane.b32.xlu0 %v5198_v8, %s5442_s30  ;;  %v1707_v8 = vrot.slane %v1699_v2, 6  ;;  %v5336_v2 = vld [vmem:[%s6532_s5] ss:$0 sm:$0xff] }
0x1068   :  { %v1250_v11 = vpop.permute.xlu1 %1249 }
0x1069   :  { %v1252_v9 = vmul.f32 %v5192_v55, %v1250_v11 }
0x106b   :  { %1374 = vrot.lane.b32.xlu0 %v1252_v9, %s5442_s30  ;;  %v1709_v9 = vrot.slane %v1700_v7, 5  ;;  %v5991_v7 = vld [vmem:[#allocation7] ss:$0 sm:$0xff] }
0x106c   :  { %v1366_v12 = vpop.permute.xlu0 %1365 }
0x106d   :  { %v1368_v14 = vmul.f32 %v5194_v58, %v1366_v12 }
0x106f   :  { %1370 = vrot.lane.b32.xlu1 %v1368_v14, %s5443_s14 }
0x1073   :  { %1490 = vrot.lane.b32.xlu1 %v1368_v14, %s5444_s6 }
0x10dd   :  { %v1375_v24 = vpop.permute.xlu0 %1374 }
0x10e1   :  { %v1371_v26 = vpop.permute.xlu1 %1370 }
0x10e2   :  { %v1377_v28 = vsel %vm259_vm6, %v1371_v26, %v1375_v24 }
0x10e3   :  { %4428 = vmatmul.mubr.msk.f32.vlgmr.msra.gmra.mrb[12].mxu0 %vm267_vm7, %v1377_v28 }
0x10e4   :  { %4917 = vmatpush3.bf16.msra.mxu0 %v5581_v5  ;;  %4476 = vmatprep.mubr.msk.f32.mxu0 %vm5440_vm0, %v5441_v1 }
0x10e5   :  { %v1491_v29 = vpop.permute.xlu1 %1490  ;;  %4918 = vmatprep.subr.bf16.mxu0 %v5439_v0 }
0x10e6   :  { %v1493_v30 = vsel %vm149_vm4, %v1488_v27, %v1491_v29 }
0x10e7   :  { %4443 = vmatmul.mubr.msk.f32.vlgmr.msra.gmra.mrb[10].mxu1 %vm157_vm5, %v1493_v30 }
0x10e8   :  { %4905 = vmatpush3.bf16.msra.mxu1 %v5626_v39  ;;  %4920 = vmatpush3.bf16.msra.mxu0 %v5584_v10 }
0x10e9   :  { %4906 = vmatprep.subr.bf16.mxu1 %v5439_v0  ;;  %4461 = vmatprep.mubr.msk.f32.mxu1 %vm5440_vm0, %v5441_v1 }
0x10ea   :  { %4921 = vmatprep.subr.bf16.mxu0 %v5439_v0 }
0x10ec   :  { %4908 = vmatpush3.bf16.msra.mxu1 %v5632_v41  ;;  %4923 = vmatpush3.bf16.msra.mxu0 %v5590_v19 }
0x10ed   :  { %4909 = vmatprep.subr.bf16.mxu1 %v5439_v0  ;;  %4924 = vmatprep.subr.bf16.mxu0 %v5439_v0 }
0x10f0   :  { %4911 = vmatpush3.bf16.msra.mxu1 %v5642_v44 }
0x10f1   :  { %4912 = vmatprep.subr.bf16.mxu1 %v5439_v0 }
0x10f4   :  { %4914 = vmatpush3.bf16.msra.mxu1 %v5653_v48 }
0x10f5   :  { %4936 = vmatprep.subr.bf16.mxu1 %v5439_v0 }
0x11b6   :  { %v1447_v5 = vpop.f32.mrb[12].mxu0 }
0x11b7   :  { %v1448_v10 = vadd.f32 %v5688_v3, %v1447_v5  ;;  %v4429_v31 = vpop.f32.mrb[13].mxu0 }
0x11b9   :  { %5199 = vtanh.f32 %v1448_v10  ;;  %v3930_v37 = vmul.f32 -1.442695, %v1448_v10 }
0x11ba   :  { %v1563_v32 = vpop.f32.mrb[10].mxu1 }
0x11bb   :  { %v1564_v19 = vadd.f32 %v5609_v22, %v1563_v32  ;;  %v4444_v34 = vpop.f32.mrb[11].mxu1 }
0x11bd   :  { %5201 = vtanh.f32 %v1564_v19  ;;  %v3932_v38 = vmul.f32 -1.442695, %v1564_v19 }
0x11be   :  { %5203 = vpow2.f32 %v3930_v37 }
0x11bf   :  { %5205 = vpow2.f32 %v3932_v38 }
0x11c3   :  { %v5200_v33 = vpop.eup %5199 }
0x11c4   :  { %1460 = vrot.lane.b32.xlu0 %v5200_v33, %s5442_s30 }
0x11c7   :  { %v5202_v36 = vpop.eup %5201 }
0x11c8   :  { %1576 = vrot.lane.b32.xlu1 %v5202_v36, %s5442_s30  ;;  %v5204_v40 = vpop.eup %5203 }
0x11c9   :  { %v1454_v42 = vadd.f32 1.0, %v5204_v40  ;;  %v5206_v35 = vpop.eup %5205 }
0x11ca   :  { %v1570_v43 = vadd.f32 1.0, %v5206_v35  ;;  %v110_v35 = vld [vmem:[#allocation6] sm:$0xff] }
0x11cb   :  { %5207 = vrcp.f32 %v1454_v42 }
0x11cc   :  { %5209 = vrcp.f32 %v1570_v43  ;;  %v111_v43 = vld [vmem:[#allocation6 + $0x8] sm:$0xff] }
0x11d5   :  { %v5208_v45 = vpop.eup %5207 }
0x11d6   :  { %v5210_v47 = vpop.eup %5209  ;;  %v1458_v51 = vmul.f32 %v5208_v45, %v5872_v63  ;;  %v1698_v63 = vld [vmem:[#allocation2 + $0xf] sm:$0x1] }
0x11d7   :  { %v1574_v54 = vmul.f32 %v5210_v47, %v5876_v6  ;;  %v1705_v4 = vrot.slane %v1698_v63, 7  ;;  %v1697_v6 = vld [vmem:[#allocation2 + $0x7] sm:$0x1] }
0x11d9   :  { %v1706_v11 = vsel %vm140_vm1, %v1705_v4, %v1697_v6 }
0x11da   :  { %v1708_v12 = vsel %vm143_vm2, %v1707_v8, %v1706_v11 }
0x11db   :  { %v1710_v17 = vsel %vm146_vm3, %v1709_v9, %v1708_v12 }
0x1236   :  { %v1461_v22 = vpop.permute.xlu0 %1460 }
0x1237   :  { %v1463_v46 = vmul.f32 %v5208_v45, %v1461_v22 }
0x1239   :  { %1465 = vrot.lane.b32.xlu0 %v1463_v46, %s5443_s14 }
0x123a   :  { %v1577_v49 = vpop.permute.xlu1 %1576 }
0x123b   :  { %v1579_v50 = vmul.f32 %v5210_v47, %v1577_v49  ;;  %v113_v49 = vld [vmem:[#allocation6 + $0x18] sm:$0xff] }
0x123d   :  { %1581 = vrot.lane.b32.xlu1 %v1579_v50, %s5443_s14 }
0x12ab   :  { %v1466_v52 = vpop.permute.xlu0 %1465 }
0x12ac   :  { %v5916_v53 = vadd.f32 %v1466_v52, %v1458_v51  ;;  %v114_v51 = vld [vmem:[#allocation6 + $0x20] sm:$0xff]  ;;  %v115_v52 = vld [vmem:[#allocation6 + $0x28] sm:$0xff] }
0x12ae   :  { %5211 = vtanh.f32 %v5916_v53 }
0x12af   :  { %v1582_v55 = vpop.permute.xlu1 %1581 }
0x12b0   :  { %v5920_v56 = vadd.f32 %v1582_v55, %v1574_v54 }
0x12b2   :  { %5213 = vtanh.f32 %v5920_v56 }
0x12b8   :  { %v5212_v57 = vpop.eup %5211 }
0x12b9   :  { %1471 = vrot.lane.b32.xlu0 %v5212_v57, %s5442_s30 }
0x12bc   :  { %v5214_v58 = vpop.eup %5213 }
0x12bd   :  { %1587 = vrot.lane.b32.xlu1 %v5214_v58, %s5442_s30 }
0x132b   :  { %v1472_v59 = vpop.permute.xlu0 %1471 }
0x132c   :  { %v1474_v60 = vmul.f32 %v5208_v45, %v1472_v59  ;;  %v5963_v45 = vpack.c.bf16 %v111_v43, %v110_v35 }
0x132e   :  { %1596 = vrot.lane.b32.xlu1 %v1474_v60, %s5442_s30 }
0x132f   :  { %v1588_v61 = vpop.permute.xlu1 %1587 }
0x1330   :  { %v1590_v62 = vmul.f32 %v5210_v47, %v1588_v61  ;;  %v112_v47 = vld [vmem:[#allocation6 + $0x10] sm:$0xff] }
0x1331   :  { %v5969_v50 = vpack.c.bf16 %v113_v49, %v112_v47 }
0x1332   :  { %1592 = vrot.lane.b32.xlu0 %v1590_v62, %s5443_s14 }
0x1336   :  { %1712 = vrot.lane.b32.xlu0 %v1590_v62, %s5444_s6 }
0x13a0   :  { %v1597_v14 = vpop.permute.xlu1 %1596 }
0x13a4   :  { %v1593_v13 = vpop.permute.xlu0 %1592 }
0x13a5   :  { %v1599_v15 = vsel %vm259_vm6, %v1593_v13, %v1597_v14 }
0x13a6   :  { %4462 = vmatmul.mubr.msk.f32.vlgmr.msra.gmra.mrb[12].mxu1 %vm267_vm7, %v1599_v15 }
0x13a7   :  { %4510 = vmatprep.mubr.msk.f32.mxu1 %vm5440_vm0, %v5441_v1  ;;  %4938 = vmatpush3.bf16.msra.mxu1 %v5963_v45 }
0x13a8   :  { %v1713_v16 = vpop.permute.xlu0 %1712  ;;  %4939 = vmatprep.subr.bf16.mxu1 %v5439_v0 }
0x13a9   :  { %v1715_v18 = vsel %vm149_vm4, %v1710_v17, %v1713_v16 }
0x13aa   :  { %4477 = vmatmul.mubr.msk.f32.vlgmr.msra.gmra.mrb[14].mxu0 %vm157_vm5, %v1715_v18 }
0x13ab   :  { %4926 = vmatpush3.bf16.msra.mxu0 %v5626_v39  ;;  %4495 = vmatprep.mubr.msk.f32.mxu0 %vm5440_vm0, %v5441_v1 }
0x13ac   :  { %4927 = vmatprep.subr.bf16.mxu0 %v5439_v0  ;;  %4941 = vmatpush3.bf16.msra.mxu1 %v5969_v50 }
0x13ad   :  { %4942 = vmatprep.subr.bf16.mxu1 %v5439_v0 }
0x13af   :  { %4929 = vmatpush3.bf16.msra.mxu0 %v5632_v41  ;;  %v5335_v41 = vld [vmem:[%s6530_s3] ss:$0 sm:$0xff] }
0x13b0   :  { %4930 = vmatprep.subr.bf16.mxu0 %v5439_v0 }
0x13b3   :  { %4932 = vmatpush3.bf16.msra.mxu0 %v5642_v44 }
0x13b4   :  { %4933 = vmatprep.subr.bf16.mxu0 %v5439_v0 }
0x13b7   :  { %4935 = vmatpush3.bf16.msra.mxu0 %v5653_v48 }
0x13b8   :  { %4957 = vmatprep.subr.bf16.mxu0 %v5439_v0 }
0x1479   :  { %v1669_v21 = vpop.f32.mrb[12].mxu1 }
0x147a   :  { %v1670_v39 = vadd.f32 %v5688_v3, %v1669_v21  ;;  %v4463_v20 = vpop.f32.mrb[13].mxu1 }
0x147c   :  { %5215 = vtanh.f32 %v1670_v39  ;;  %v3934_v48 = vmul.f32 -1.442695, %v1670_v39 }
0x147d   :  { %v1785_v23 = vpop.f32.mrb[14].mxu0 }
0x147e   :  { %v1786_v25 = vadd.f32 %v5335_v41, %v1785_v23  ;;  %v4478_v24 = vpop.f32.mrb[15].mxu0 }
0x1480   :  { %5217 = vtanh.f32 %v1786_v25  ;;  %v3936_v28 = vmul.f32 -1.442695, %v1786_v25 }
0x1481   :  { %5219 = vpow2.f32 %v3934_v48 }
0x1482   :  { %5221 = vpow2.f32 %v3936_v28 }
0x1486   :  { %v5216_v44 = vpop.eup %5215 }
0x1487   :  { %1682 = vrot.lane.b32.xlu1 %v5216_v44, %s5442_s30 }
0x148a   :  { %v5218_v26 = vpop.eup %5217 }
0x148b   :  { %1798 = vrot.lane.b32.xlu0 %v5218_v26, %s5442_s30  ;;  %v5220_v3 = vpop.eup %5219 }
0x148c   :  { %v1676_v27 = vadd.f32 1.0, %v5220_v3  ;;  %v5222_v29 = vpop.eup %5221 }
0x148d   :  { %v1792_v30 = vadd.f32 1.0, %v5222_v29  ;;  %v117_v29 = vld [vmem:[%s6535_s8] sm:$0xff] }
0x148e   :  { %5223 = vrcp.f32 %v1676_v27 }
0x148f   :  { %5225 = vrcp.f32 %v1792_v30  ;;  %v118_v30 = vld [vmem:[%s6535_s8 + $0x8] sm:$0xff] }
0x1498   :  { %v5224_v5 = vpop.eup %5223 }
0x1499   :  { %v5226_v32 = vpop.eup %5225  ;;  %v1680_v33 = vmul.f32 %v5224_v5, %v5916_v53  ;;  %v5973_v53 = vpack.c.bf16 %v115_v52, %v114_v51  ;;  %v6065_v52 = vld [vmem:[%s6536_s9] ss:$0 sm:$0xff] }
0x149a   :  { %v1796_v38 = vmul.f32 %v5226_v32, %v5920_v56 }
0x149b   :  { %4944 = vmatpush3.bf16.msra.mxu1 %v5973_v53 }
0x149c   :  { %4945 = vmatprep.subr.bf16.mxu1 %v5439_v0 }
0x14f9   :  { %v1683_v10 = vpop.permute.xlu1 %1682 }
0x14fa   :  { %v1685_v31 = vmul.f32 %v5224_v5, %v1683_v10  ;;  %v6015_v10 = vpack.c.bf16 %v118_v30, %v117_v29  ;;  %v5445_v29 = vmov 1966171168  }
0x14fb   :  { %v2221_v30 = vunpack.c.l.s4 %v5445_v29 }
0x14fc   :  { %1687 = vrot.lane.b32.xlu1 %v1685_v31, %s5443_s14  ;;  %v120_v31 = vld [vmem:[%s6535_s8 + $0x18] sm:$0xff] }
0x14fd   :  { %v1799_v19 = vpop.permute.xlu0 %1798 }
0x14fe   :  { %v1801_v34 = vmul.f32 %v5226_v32, %v1799_v19  ;;  %v121_v19 = vld [vmem:[%s6535_s8 + $0x20] sm:$0xff] }
0x1500   :  { %1803 = vrot.lane.b32.xlu0 %v1801_v34, %s5443_s14  ;;  %v122_v34 = vld [vmem:[%s6535_s8 + $0x28] sm:$0xff] }
0x156e   :  { %v1688_v36 = vpop.permute.xlu1 %1687 }
0x156f   :  { %v5956_v37 = vadd.f32 %v1688_v36, %v1680_v33  ;;  %v6032_v36 = vpack.c.bf16 %v122_v34, %v121_v19  ;;  %v6135_v34 = vld [vmem:[%s6538_s11] ss:$0 sm:$0xff] }
0x1571   :  { %5227 = vtanh.f32 %v5956_v37 }
0x1572   :  { %v1804_v40 = vpop.permute.xlu0 %1803 }
0x1573   :  { %v5960_v42 = vadd.f32 %v1804_v40, %v1796_v38  ;;  %v123_v38 = vld [vmem:[%s6535_s8 + $0x30] sm:$0xff]  ;;  %v124_v40 = vld [vmem:[%s6535_s8 + $0x38] sm:$0xff] }
0x1575   :  { %5229 = vtanh.f32 %v5960_v42 }
0x157b   :  { %v5228_v22 = vpop.eup %5227 }
0x157c   :  { %1693 = vrot.lane.b32.xlu1 %v5228_v22, %s5442_s30 }
0x157f   :  { %v5230_v46 = vpop.eup %5229 }
0x1580   :  { %1809 = vrot.lane.b32.xlu0 %v5230_v46, %s5442_s30 }
0x15ee   :  { %v1694_v54 = vpop.permute.xlu1 %1693 }
0x15ef   :  { %v1696_v55 = vmul.f32 %v5224_v5, %v1694_v54  ;;  %v119_v5 = vld [vmem:[%s6535_s8 + $0x10] sm:$0xff] }
0x15f1   :  { %1818 = vrot.lane.b32.xlu0 %v1696_v55, %s5442_s30 }
0x15f2   :  { %v1810_v56 = vpop.permute.xlu0 %1809 }
0x15f3   :  { %v1812_v57 = vmul.f32 %v5226_v32, %v1810_v56  ;;  %v6021_v32 = vpack.c.bf16 %v120_v31, %v119_v5  ;;  %v2223_v5 = vlaneseq  ;;  %v2222_v31 = vunpack.c.0.s8 %v2221_v30  ;;  %v2583_v30 = vld [vmem:[%s6528_s1 + $0x9] sm:$0x1] }
0x15f5   :  { %1814 = vrot.lane.b32.xlu1 %v1812_v57, %s5443_s14  ;;  %v2224_v19 = vshrl.u32 %v2223_v5, 7  ;;  %v2590_v5 = vrot.slane %v2583_v30, 7 }
0x15f9   :  { %1919 = vrot.lane.b32.xlu1 %v1812_v57, %s5444_s6 }
0x1663   :  { %v1819_v58 = vpop.permute.xlu0 %1818 }
0x1667   :  { %v1815_v59 = vpop.permute.xlu1 %1814 }
0x1668   :  { %v1821_v60 = vsel %vm259_vm6, %v1815_v59, %v1819_v58 }
0x1669   :  { %4496 = vmatmul.mubr.msk.f32.vlgmr.msra.gmra.mrb[16].mxu0 %vm267_vm7, %v1821_v60 }
0x166a   :  { %4540 = vmatprep.mubr.msk.f32.mxu0 %vm5440_vm0, %v5441_v1 }
0x166b   :  { %v1920_v61 = vpop.permute.xlu1 %1919 }
0x166c   :  { %v1922_v62 = vsel %vm149_vm4, 0.0, %v1920_v61 }
0x166d   :  { %4511 = vmatmul.mubr.msk.f32.vlgmr.msra.gmra.mrb[14].mxu1 %vm157_vm5, %v1922_v62 }
0x166e   :  { %4529 = vmatprep.mubr.msk.f32.mxu1 %vm5440_vm0, %v5441_v1  ;;  %4947 = vmatpush3.bf16.msra.mxu1 %v6015_v10 }
0x166f   :  { %4948 = vmatprep.subr.bf16.mxu1 %v5439_v0 }
0x1672   :  { %4950 = vmatpush3.bf16.msra.mxu1 %v6021_v32 }
0x1673   :  { %4951 = vmatprep.subr.bf16.mxu1 %v5439_v0 }
0x1676   :  { %4953 = vmatpush3.bf16.msra.mxu1 %v6032_v36 }
0x1677   :  { %4954 = vmatprep.subr.bf16.mxu1 %v5439_v0 }
0x173c   :  { %v1891_v63 = vpop.f32.mrb[16].mxu0 }
0x173d   :  { %v1892_v4 = vadd.f32 %v5336_v2, %v1891_v63  ;;  %v4497_v6 = vpop.f32.mrb[17].mxu0 }
0x173f   :  { %5231 = vtanh.f32 %v1892_v4  ;;  %v3938_v13 = vmul.f32 -1.442695, %v1892_v4 }
0x1740   :  { %v1998_v8 = vpop.f32.mrb[14].mxu1 }
0x1741   :  { %v1999_v11 = vadd.f32 %v5991_v7, %v1998_v8  ;;  %v4512_v9 = vpop.f32.mrb[15].mxu1  ;;  %v126_v8 = vld [vmem:[%s6537_s10] sm:$0xff] }
0x1742   :  { %v128_v9 = vld [vmem:[%s6537_s10 + $0x10] sm:$0xff] }
0x1743   :  { %5233 = vtanh.f32 %v1999_v11  ;;  %v3941_v15 = vmul.f32 -1.442695, %v1999_v11  ;;  %v127_v11 = vld [vmem:[%s6537_s10 + $0x8] sm:$0xff] }
0x1744   :  { %5235 = vpow2.f32 %v3938_v13 }
0x1745   :  { %5237 = vpow2.f32 %v3941_v15 }
0x1749   :  { %v5232_v12 = vpop.eup %5231 }
0x174a   :  { %1904 = vrot.lane.b32.xlu0 %v5232_v12, %s5442_s30  ;;  %v6083_v12 = vpack.c.bf16 %v127_v11, %v126_v8 }
0x174c   :  { %4959 = vmatpush3.bf16.msra.mxu0 %v6083_v12 }
0x174d   :  { %v5234_v14 = vpop.eup %5233  ;;  %4960 = vmatprep.subr.bf16.mxu0 %v5439_v0 }
0x174e   :  { %2011 = vrot.lane.b32.xlu1 %v5234_v14, %s5442_s30  ;;  %v5236_v17 = vpop.eup %5235  ;;  %v129_v14 = vld [vmem:[%s6537_s10 + $0x18] sm:$0xff] }
0x174f   :  { %v1898_v16 = vadd.f32 1.0, %v5236_v17  ;;  %v5238_v18 = vpop.eup %5237  ;;  %v6089_v13 = vpack.c.bf16 %v129_v14, %v128_v9 }
0x1750   :  { %v2005_v21 = vadd.f32 1.0, %v5238_v18  ;;  %v2254_v18 = vld [vmem:[%s6528_s1 + $0x8] sm:$0x1] }
0x1751   :  { %5239 = vrcp.f32 %v1898_v16  ;;  %4962 = vmatpush3.bf16.msra.mxu0 %v6089_v13 }
0x1752   :  { %5241 = vrcp.f32 %v2005_v21  ;;  %4963 = vmatprep.subr.bf16.mxu0 %v5439_v0  ;;  %v2255_v21 = vld [vmem:[%s6528_s1 + $0x10] sm:$0x1] }
0x175b   :  { %v5240_v39 = vpop.eup %5239 }
0x175c   :  { %v5242_v41 = vpop.eup %5241  ;;  %v1902_v44 = vmul.f32 %v5240_v39, %v5956_v37 }
0x175d   :  { %v2009_v28 = vmul.f32 %v5242_v41, %v5960_v42  ;;  %v6044_v42 = vpack.c.bf16 %v124_v40, %v123_v38 }
0x175f   :  { %4956 = vmatpush3.bf16.msra.mxu1 %v6044_v42 }
0x1760   :  { %4972 = vmatprep.subr.bf16.mxu1 %v5439_v0 }
0x17bc   :  { %v1905_v20 = vpop.permute.xlu0 %1904 }
0x17bd   :  { %v1907_v23 = vmul.f32 %v5240_v39, %v1905_v20  ;;  %v2253_v20 = vld [vmem:[%s6528_s1] sm:$0x1] }
0x17bf   :  { %1909 = vrot.lane.b32.xlu0 %v1907_v23, %s5443_s14 }
0x17c0   :  { %v2012_v25 = vpop.permute.xlu1 %2011 }
0x17c1   :  { %v2014_v24 = vmul.f32 %v5242_v41, %v2012_v25  ;;  %v2263_v25 = vrot.slane %v2255_v21, 6 }
0x17c3   :  { %2016 = vrot.lane.b32.xlu1 %v2014_v24, %s5443_s14 }
0x1831   :  { %v1910_v26 = vpop.permute.xlu0 %1909 }
0x1832   :  { %v5999_v48 = vadd.f32 %v1910_v26, %v1902_v44 }
0x1834   :  { %5243 = vtanh.f32 %v5999_v48 }
0x1835   :  { %v2017_v3 = vpop.permute.xlu1 %2016 }
0x1836   :  { %v6003_v27 = vadd.f32 %v2017_v3, %v2009_v28 }
0x1838   :  { %5245 = vtanh.f32 %v6003_v27 }
0x183e   :  { %v5244_v33 = vpop.eup %5243 }
0x183f   :  { %1915 = vrot.lane.b32.xlu0 %v5244_v33, %s5442_s30  ;;  %v6137_v33 = vsub.s32 %v2222_v31, %v2224_v19  ;;  %v2582_v31 = vld [vmem:[%s6528_s1 + $0x1] sm:$0x1] }
0x1842   :  { %v5246_v37 = vpop.eup %5245 }
0x1843   :  { %2022 = vrot.lane.b32.xlu1 %v5246_v37, %s5442_s30 }
0x18b1   :  { %v1916_v35 = vpop.permute.xlu0 %1915 }
0x18b2   :  { %v1918_v43 = vmul.f32 %v5240_v39, %v1916_v35  ;;  %v2261_v39 = vrot.slane %v2254_v18, 7 }
0x18b4   :  { %2031 = vrot.lane.b32.xlu1 %v1918_v43, %s5442_s30  ;;  %v2262_v24 = vsel %vm140_vm1, %v2261_v39, %v2253_v20 }
0x18b5   :  { %v2023_v22 = vpop.permute.xlu1 %2022  ;;  %v2264_v26 = vsel %vm143_vm2, %v2263_v25, %v2262_v24 }
0x18b6   :  { %v2025_v46 = vmul.f32 %v5242_v41, %v2023_v22  ;;  %v2256_v41 = vld [vmem:[%s6528_s1 + $0x18] sm:$0x1] }
0x18b7   :  { %v2265_v44 = vrot.slane %v2256_v41, 5 }
0x18b8   :  { %2027 = vrot.lane.b32.xlu0 %v2025_v46, %s5443_s14 }
0x1926   :  { %v2032_v47 = vpop.permute.xlu1 %2031 }
0x192a   :  { %v2028_v49 = vpop.permute.xlu0 %2027 }
0x192b   :  { %v2034_v51 = vsel %vm259_vm6, %v2028_v49, %v2032_v47 }
0x192c   :  { %4530 = vmatmul.mubr.msk.f32.vlgmr.msra.gmra.mrb[16].mxu1 %vm267_vm7, %v2034_v51 }
0x192d   :  { %4974 = vmatpush3.bf16.msra.mxu1 %v6015_v10  ;;  %4574 = vmatprep.mubr.msk.f32.mxu1 %vm5440_vm0, %v5441_v1 }
0x192e   :  { %4975 = vmatprep.subr.bf16.mxu1 %v5439_v0 }
0x1931   :  { %4977 = vmatpush3.bf16.msra.mxu1 %v6021_v32 }
0x1932   :  { %4978 = vmatprep.subr.bf16.mxu1 %v5439_v0 }
0x1935   :  { %4980 = vmatpush3.bf16.msra.mxu1 %v6032_v36 }
0x1936   :  { %4981 = vmatprep.subr.bf16.mxu1 %v5439_v0 }
0x1939   :  { %4983 = vmatpush3.bf16.msra.mxu1 %v6044_v42 }
0x193a   :  { %4999 = vmatprep.subr.bf16.mxu1 %v5439_v0 }
0x19ff   :  { %v2110_v54 = vpop.f32.mrb[16].mxu1 }
0x1a00   :  { %v2111_v55 = vadd.f32 %v6065_v52, %v2110_v54  ;;  %v4531_v56 = vpop.f32.mrb[17].mxu1 }
0x1a02   :  { %5247 = vtanh.f32 %v2111_v55  ;;  %v3944_v58 = vmul.f32 -1.442695, %v2111_v55 }
0x1a04   :  { %5249 = vpow2.f32 %v3944_v58 }
0x1a0c   :  { %v5248_v57 = vpop.eup %5247 }
0x1a0d   :  { %2123 = vrot.lane.b32.xlu0 %v5248_v57, %s5442_s30 }
0x1a0e   :  { %v5250_v59 = vpop.eup %5249 }
0x1a0f   :  { %v2117_v60 = vadd.f32 1.0, %v5250_v59 }
0x1a11   :  { %5251 = vrcp.f32 %v2117_v60 }
0x1a1b   :  { %v5252_v61 = vpop.eup %5251 }
0x1a1c   :  { %v2121_v2 = vmul.f32 %v5252_v61, %v5999_v48  ;;  %v2266_v48 = vsel %vm146_vm3, %v2265_v44, %v2264_v26 }
0x1a7f   :  { %v2124_v62 = vpop.permute.xlu0 %2123 }
0x1a80   :  { %v2126_v63 = vmul.f32 %v5252_v61, %v2124_v62 }
0x1a82   :  { %2128 = vrot.lane.b32.xlu1 %v2126_v63, %s5443_s14 }
0x1af4   :  { %v2129_v4 = vpop.permute.xlu1 %2128 }
0x1af5   :  { %v6071_v6 = vadd.f32 %v2129_v4, %v2121_v2 }
0x1af7   :  { %5253 = vtanh.f32 %v6071_v6 }
0x1b01   :  { %v5254_v15 = vpop.eup %5253 }
0x1b02   :  { %2134 = vrot.lane.b32.xlu0 %v5254_v15, %s5442_s30 }
0x1b06   :  { %2268 = vrot.lane.b32.xlu0 %v2025_v46, %s5444_s6 }
0x1b74   :  { %v2135_v17 = vpop.permute.xlu0 %2134 }
0x1b75   :  { %v6096_v16 = vmul.f32 %v5252_v61, %v2135_v17 }
0x1b77   :  { %2145 = vrot.lane.b32.xlu1 %v6096_v16, %s5443_s14 }
0x1b78   :  { %v2269_v28 = vpop.permute.xlu0 %2268 }
0x1b79   :  { %v2271_v3 = vsel %vm149_vm4, %v2266_v48, %v2269_v28 }
0x1be9   :  { %v2146_v23 = vpop.permute.xlu1 %2145 }
0x1bea   :  { %4541 = vmatmul.mubr.msk.f32.vlgmr.msra.gmra.mrb[18].mxu0 %vm259_vm6, %v2146_v23 }
0x1beb   :  { %4965 = vmatpush3.bf16.msra.mxu0 %v5963_v45  ;;  %4555 = vmatprep.mubr.msk.f32.mxu0 %vm5440_vm0, %v5441_v1 }
0x1bec   :  { %4966 = vmatprep.subr.bf16.mxu0 %v5439_v0 }
0x1bef   :  { %4968 = vmatpush3.bf16.msra.mxu0 %v5969_v50 }
0x1bf0   :  { %4969 = vmatprep.subr.bf16.mxu0 %v5439_v0 }
0x1bf3   :  { %4971 = vmatpush3.bf16.msra.mxu0 %v5973_v53 }
0x1bf4   :  { %4984 = vmatprep.subr.bf16.mxu0 %v5439_v0 }
0x1bf6   :  { %4556 = vmatmul.mubr.msk.f32.vlgmr.msra.gmra.mrb[20].mxu0 %vm157_vm5, %v2271_v3 }
0x1bf7   :  { %4986 = vmatpush3.bf16.msra.mxu0 %v6083_v12  ;;  %4585 = vmatprep.mubr.msk.f32.mxu0 %vm5440_vm0, %v5441_v1 }
0x1bf8   :  { %4987 = vmatprep.subr.bf16.mxu0 %v5439_v0 }
0x1bfb   :  { %4989 = vmatpush3.bf16.msra.mxu0 %v6089_v13 }
0x1bfc   :  { %4990 = vmatprep.subr.bf16.mxu0 %v5439_v0 }
0x1cbd   :  { %v2215_v37 = vpop.f32.mrb[18].mxu0 }
0x1cbe   :  { %v2216_v38 = vadd.f32 %v6135_v34, %v2215_v37  ;;  %v4542_v40 = vpop.f32.mrb[19].mxu0  ;;  %v2585_v37 = vld [vmem:[%s6528_s1 + $0x19] sm:$0x1] }
0x1cbf   :  { %v2591_v40 = vsel %vm140_vm1, %v2590_v5, %v2582_v31 }
0x1cc0   :  { %v2226_v35 = vrot.slane %v2216_v38, %v6137_v33 }
0x1cc2   :  { %v2227_v43 = vcombine.high %v2226_v35, %v2226_v35  ;;  %v2234_v22 = vrot.slane %v2226_v35, %v6137_v33  ;;  %v2594_v35 = vrot.slane %v2585_v37, 5 }
0x1cc4   :  { %v2241_v46 = vrot.slane %v2227_v43, %v6137_v33  ;;  %v2242_v47 = vcombine.high %v2234_v22, %v2234_v22  ;;  %2249 = vst.msk [vmem:[%s6539_s12] sm:$0x1] %vm2248_vm8, %v2234_v22 }
0x1cc6   :  { %v2243_v49 = vcombine.high %v2241_v46, %v2241_v46  ;;  %2250 = vst.msk [vmem:[%s6539_s12 + $0x8] sm:$0x1] %vm2248_vm8, %v2241_v46  ;;  %2251 = vst.msk [vmem:[%s6539_s12 + $0x10] sm:$0x1] %vm2248_vm8, %v2242_v47 }
0x1cc8   :  { %2252 = vst.msk [vmem:[%s6539_s12 + $0x18] sm:$0x1] %vm2248_vm8, %v2243_v49 }
0x1cc9   :  { %v2341_v51 = vpop.f32.mrb[20].mxu0 }
0x1cca   :  { %v2342_v54 = vadd.f32 %v5991_v7, %v2341_v51  ;;  %v4557_v55 = vpop.f32.mrb[21].mxu0 }
0x1ccc   :  { %5255 = vtanh.f32 %v2342_v54  ;;  %v3948_v57 = vmul.f32 -1.442695, %v2342_v54 }
0x1cce   :  { %5257 = vpow2.f32 %v3948_v57 }
0x1cd6   :  { %v5256_v56 = vpop.eup %5255 }
0x1cd7   :  { %2354 = vrot.lane.b32.xlu1 %v5256_v56, %s5442_s30 }
0x1cd8   :  { %v5258_v58 = vpop.eup %5257 }
0x1cd9   :  { %v2348_v59 = vadd.f32 1.0, %v5258_v58 }
0x1cdb   :  { %5259 = vrcp.f32 %v2348_v59 }
0x1ce5   :  { %v5260_v60 = vpop.eup %5259 }
0x1ce6   :  { %v2352_v63 = vmul.f32 %v5260_v60, %v6003_v27 }
0x1d49   :  { %v2355_v61 = vpop.permute.xlu1 %2354 }
0x1d4a   :  { %v2357_v62 = vmul.f32 %v5260_v60, %v2355_v61 }
0x1d4c   :  { %2359 = vrot.lane.b32.xlu0 %v2357_v62, %s5443_s14 }
0x1dbe   :  { %v2360_v2 = vpop.permute.xlu0 %2359 }
0x1dbf   :  { %v6163_v4 = vadd.f32 %v2360_v2, %v2352_v63 }
0x1dc1   :  { %5261 = vtanh.f32 %v6163_v4 }
0x1dcb   :  { %v5262_v8 = vpop.eup %5261 }
0x1dcc   :  { %2365 = vrot.lane.b32.xlu1 %v5262_v8, %s5442_s30 }
0x1dd0   :  { %2373 = vrot.lane.b32.xlu1 %v6096_v16, %s5442_s30 }
0x1e3e   :  { %v2366_v11 = vpop.permute.xlu1 %2365 }
0x1e3f   :  { %v2368_v9 = vmul.f32 %v5260_v60, %v2366_v11 }
0x1e41   :  { %2370 = vrot.lane.b32.xlu0 %v2368_v9, %s5443_s14 }
0x1e42   :  { %v2374_v14 = vpop.permute.xlu1 %2373 }
0x1eb3   :  { %v2371_v15 = vpop.permute.xlu0 %2370 }
0x1eb4   :  { %v2376_v17 = vsel %vm259_vm6, %v2371_v15, %v2374_v14 }
0x1eb5   :  { %4575 = vmatmul.mubr.msk.f32.vlgmr.msra.gmra.mrb[18].mxu1 %vm267_vm7, %v2376_v17 }
0x1eb6   :  { %5001 = vmatpush3.bf16.msra.mxu1 %v6015_v10  ;;  %4619 = vmatprep.mubr.msk.f32.mxu1 %vm5440_vm0, %v5441_v1 }
0x1eb7   :  { %5002 = vmatprep.subr.bf16.mxu1 %v5439_v0 }
0x1eba   :  { %5004 = vmatpush3.bf16.msra.mxu1 %v6021_v32 }
0x1ebb   :  { %5005 = vmatprep.subr.bf16.mxu1 %v5439_v0 }
0x1ebe   :  { %5007 = vmatpush3.bf16.msra.mxu1 %v6032_v36 }
0x1ebf   :  { %5008 = vmatprep.subr.bf16.mxu1 %v5439_v0 }
0x1ec2   :  { %5010 = vmatpush3.bf16.msra.mxu1 %v6044_v42 }
0x1ec3   :  { %5017 = vmatprep.subr.bf16.mxu1 %v5439_v0 }
0x1f88   :  { %v2446_v27 = vpop.f32.mrb[18].mxu1 }
0x1f89   :  { %v2447_v16 = vadd.f32 %v6065_v52, %v2446_v27  ;;  %v4576_v18 = vpop.f32.mrb[19].mxu1 }
0x1f8b   :  { %5263 = vtanh.f32 %v2447_v16  ;;  %v3950_v39 = vmul.f32 -1.442695, %v2447_v16 }
0x1f8d   :  { %5265 = vpow2.f32 %v3950_v39 }
0x1f95   :  { %v5264_v21 = vpop.eup %5263 }
0x1f96   :  { %2459 = vrot.lane.b32.xlu0 %v5264_v21, %s5442_s30 }
0x1f97   :  { %v5266_v20 = vpop.eup %5265 }
0x1f98   :  { %v2453_v23 = vadd.f32 1.0, %v5266_v20 }
0x1f9a   :  { %5267 = vrcp.f32 %v2453_v23 }
0x1fa4   :  { %v5268_v41 = vpop.eup %5267 }
0x1fa5   :  { %v2457_v44 = vmul.f32 %v5268_v41, %v6071_v6  ;;  %v2584_v6 = vld [vmem:[%s6528_s1 + $0x11] sm:$0x1] }
0x1fa6   :  { %v2592_v38 = vrot.slane %v2584_v6, 6 }
0x1fa8   :  { %v2593_v43 = vsel %vm143_vm2, %v2592_v38, %v2591_v40 }
0x1fa9   :  { %v2595_v22 = vsel %vm146_vm3, %v2594_v35, %v2593_v43 }
0x2008   :  { %v2460_v25 = vpop.permute.xlu0 %2459 }
0x2009   :  { %v2462_v24 = vmul.f32 %v5268_v41, %v2460_v25  ;;  %v2913_v25 = vld [vmem:[%s6528_s1 + $0x12] sm:$0x1] }
0x200b   :  { %2464 = vrot.lane.b32.xlu1 %v2462_v24, %s5443_s14 }
0x207d   :  { %v2465_v26 = vpop.permute.xlu1 %2464 }
0x207e   :  { %v6186_v48 = vadd.f32 %v2465_v26, %v2457_v44  ;;  %v2911_v26 = vld [vmem:[%s6528_s1 + $0x2] sm:$0x1] }
0x2080   :  { %5269 = vtanh.f32 %v6186_v48 }
0x208a   :  { %v5270_v28 = vpop.eup %5269 }
0x208b   :  { %2470 = vrot.lane.b32.xlu0 %v5270_v28, %s5442_s30  ;;  %v2914_v28 = vld [vmem:[%s6528_s1 + $0x1a] sm:$0x1] }
0x208c   :  { %v2923_v30 = vrot.slane %v2914_v28, 5 }
0x208f   :  { %2597 = vrot.lane.b32.xlu0 %v2368_v9, %s5444_s6 }
0x20fd   :  { %v2471_v3 = vpop.permute.xlu0 %2470 }
0x20fe   :  { %v2473_v29 = vmul.f32 %v5268_v41, %v2471_v3  ;;  %v2921_v3 = vrot.slane %v2913_v25, 6 }
0x2100   :  { %2475 = vrot.lane.b32.xlu1 %v2473_v29, %s5443_s14 }
0x2101   :  { %v2598_v46 = vpop.permute.xlu0 %2597 }
0x2102   :  { %v2600_v47 = vsel %vm149_vm4, %v2595_v22, %v2598_v46 }
0x2172   :  { %v2476_v19 = vpop.permute.xlu1 %2475 }
0x2173   :  { %4586 = vmatmul.mubr.msk.f32.vlgmr.msra.gmra.mrb[22].mxu0 %vm259_vm6, %v2476_v19 }
0x2174   :  { %4992 = vmatpush3.bf16.msra.mxu0 %v5963_v45  ;;  %4600 = vmatprep.mubr.msk.f32.mxu0 %vm5440_vm0, %v5441_v1 }
0x2175   :  { %4993 = vmatprep.subr.bf16.mxu0 %v5439_v0 }
0x2178   :  { %4995 = vmatpush3.bf16.msra.mxu0 %v5969_v50 }
0x2179   :  { %4996 = vmatprep.subr.bf16.mxu0 %v5439_v0 }
0x217c   :  { %4998 = vmatpush3.bf16.msra.mxu0 %v5973_v53 }
0x217d   :  { %5011 = vmatprep.subr.bf16.mxu0 %v5439_v0 }
0x217f   :  { %4601 = vmatmul.mubr.msk.f32.vlgmr.msra.gmra.mrb[24].mxu0 %vm157_vm5, %v2600_v47 }
0x2180   :  { %5013 = vmatpush3.bf16.msra.mxu0 %v6083_v12  ;;  %4630 = vmatprep.mubr.msk.f32.mxu0 %vm5440_vm0, %v5441_v1 }
0x2181   :  { %5014 = vmatprep.subr.bf16.mxu0 %v5439_v0 }
0x2184   :  { %5016 = vmatpush3.bf16.msra.mxu0 %v6089_v13 }
0x2185   :  { %5026 = vmatprep.subr.bf16.mxu0 %v5439_v0 }
0x2246   :  { %v2545_v49 = vpop.f32.mrb[22].mxu0 }
0x2247   :  { %v2546_v51 = vadd.f32 %v6135_v34, %v2545_v49  ;;  %v4587_v54 = vpop.f32.mrb[23].mxu0 }
0x2249   :  { %v2556_v55 = vrot.slane %v2546_v51, %v6137_v33 }
0x224b   :  { %v2557_v56 = vcombine.high %v2556_v55, %v2556_v55  ;;  %v2564_v57 = vrot.slane %v2556_v55, %v6137_v33 }
0x224d   :  { %v2571_v58 = vrot.slane %v2557_v56, %v6137_v33  ;;  %v2572_v59 = vcombine.high %v2564_v57, %v2564_v57  ;;  %2578 = vst.msk [vmem:[%s6539_s12 + $0x1] sm:$0x1] %vm2248_vm8, %v2564_v57 }
0x224f   :  { %v2573_v60 = vcombine.high %v2571_v58, %v2571_v58  ;;  %2579 = vst.msk [vmem:[%s6539_s12 + $0x9] sm:$0x1] %vm2248_vm8, %v2571_v58  ;;  %2580 = vst.msk [vmem:[%s6539_s12 + $0x11] sm:$0x1] %vm2248_vm8, %v2572_v59 }
0x2251   :  { %2581 = vst.msk [vmem:[%s6539_s12 + $0x19] sm:$0x1] %vm2248_vm8, %v2573_v60 }
0x2252   :  { %v2670_v61 = vpop.f32.mrb[24].mxu0 }
0x2253   :  { %v2671_v62 = vadd.f32 %v5991_v7, %v2670_v61  ;;  %v4602_v63 = vpop.f32.mrb[25].mxu0 }
0x2255   :  { %5271 = vtanh.f32 %v2671_v62  ;;  %v3953_v8 = vmul.f32 -1.442695, %v2671_v62 }
0x2257   :  { %5273 = vpow2.f32 %v3953_v8 }
0x225f   :  { %v5272_v2 = vpop.eup %5271 }
0x2260   :  { %2683 = vrot.lane.b32.xlu1 %v5272_v2, %s5442_s30 }
0x2261   :  { %v5274_v11 = vpop.eup %5273 }
0x2262   :  { %v2677_v9 = vadd.f32 1.0, %v5274_v11 }
0x2264   :  { %5275 = vrcp.f32 %v2677_v9 }
0x226e   :  { %v5276_v14 = vpop.eup %5275 }
0x226f   :  { %v2681_v27 = vmul.f32 %v5276_v14, %v6163_v4  ;;  %v2912_v4 = vld [vmem:[%s6528_s1 + $0xa] sm:$0x1] }
0x2270   :  { %v2919_v24 = vrot.slane %v2912_v4, 7 }
0x22d2   :  { %v2684_v15 = vpop.permute.xlu1 %2683 }
0x22d3   :  { %v2686_v17 = vmul.f32 %v5276_v14, %v2684_v15 }
0x22d5   :  { %2688 = vrot.lane.b32.xlu0 %v2686_v17, %s5443_s14 }
0x2347   :  { %v2689_v16 = vpop.permute.xlu0 %2688 }
0x2348   :  { %v6248_v18 = vadd.f32 %v2689_v16, %v2681_v27 }
0x234a   :  { %5277 = vtanh.f32 %v6248_v18 }
0x2354   :  { %v5278_v21 = vpop.eup %5277 }
0x2355   :  { %2694 = vrot.lane.b32.xlu1 %v5278_v21, %s5442_s30 }
0x2359   :  { %2702 = vrot.lane.b32.xlu1 %v2473_v29, %s5442_s30  ;;  %v2920_v29 = vsel %vm140_vm1, %v2919_v24, %v2911_v26  ;;  %v3243_v26 = vld [vmem:[%s6528_s1 + $0x1b] sm:$0x1] }
0x235a   :  { %v2922_v6 = vsel %vm143_vm2, %v2921_v3, %v2920_v29  ;;  %v3252_v29 = vrot.slane %v3243_v26, 5  ;;  %v3570_v26 = vld [vmem:[%s6528_s1 + $0xc] sm:$0x1] }
0x235b   :  { %v2924_v5 = vsel %vm146_vm3, %v2923_v30, %v2922_v6 }
0x23c7   :  { %v2695_v39 = vpop.permute.xlu1 %2694 }
0x23c8   :  { %v2697_v20 = vmul.f32 %v5276_v14, %v2695_v39 }
0x23ca   :  { %2699 = vrot.lane.b32.xlu0 %v2697_v20, %s5443_s14 }
0x23cb   :  { %v2703_v23 = vpop.permute.xlu1 %2702 }
0x23ce   :  { %2926 = vrot.lane.b32.xlu0 %v2697_v20, %s5444_s6  ;;  %v3241_v20 = vld [vmem:[%s6528_s1 + $0xb] sm:$0x1] }
0x23cf   :  { %v3248_v25 = vrot.slane %v3241_v20, 7 }
0x243c   :  { %v2700_v41 = vpop.permute.xlu0 %2699 }
0x243d   :  { %v2705_v44 = vsel %vm259_vm6, %v2700_v41, %v2703_v23  ;;  %v3242_v41 = vld [vmem:[%s6528_s1 + $0x13] sm:$0x1] }
0x243e   :  { %4620 = vmatmul.mubr.msk.f32.vlgmr.msra.gmra.mrb[20].mxu1 %vm267_vm7, %v2705_v44  ;;  %v3240_v44 = vld [vmem:[%s6528_s1 + $0x3] sm:$0x1]  ;;  %v3250_v28 = vrot.slane %v3242_v41, 6 }
0x243f   :  { %5019 = vmatpush3.bf16.msra.mxu1 %v5963_v45  ;;  %4645 = vmatprep.mubr.msk.f32.mxu1 %vm5440_vm0, %v5441_v1  ;;  %v3249_v3 = vsel %vm140_vm1, %v3248_v25, %v3240_v44 }
0x2440   :  { %5020 = vmatprep.subr.bf16.mxu1 %v5439_v0  ;;  %v2927_v31 = vpop.permute.xlu0 %2926  ;;  %v3251_v30 = vsel %vm143_vm2, %v3250_v28, %v3249_v3 }
0x2441   :  { %v2929_v19 = vsel %vm149_vm4, %v2924_v5, %v2927_v31  ;;  %v3253_v6 = vsel %vm146_vm3, %v3252_v29, %v3251_v30  ;;  %v3571_v29 = vld [vmem:[%s6528_s1 + $0x14] sm:$0x1]  ;;  %v3577_v30 = vrot.slane %v3570_v26, 7 }
0x2443   :  { %5022 = vmatpush3.bf16.msra.mxu1 %v5969_v50 }
0x2444   :  { %5023 = vmatprep.subr.bf16.mxu1 %v5439_v0 }
0x2447   :  { %5025 = vmatpush3.bf16.msra.mxu1 %v5973_v53 }
0x2448   :  { %5038 = vmatprep.subr.bf16.mxu1 %v5439_v0 }
0x244a   :  { %4646 = vmatmul.mubr.msk.f32.vlgmr.msra.gmra.mrb[22].mxu1 %vm157_vm5, %v2929_v19 }
0x244b   :  { %5040 = vmatpush3.bf16.msra.mxu1 %v6083_v12  ;;  %4675 = vmatprep.mubr.msk.f32.mxu1 %vm5440_vm0, %v5441_v1 }
0x244c   :  { %5041 = vmatprep.subr.bf16.mxu1 %v5439_v0 }
0x244f   :  { %5043 = vmatpush3.bf16.msra.mxu1 %v6089_v13 }
0x2450   :  { %5053 = vmatprep.subr.bf16.mxu1 %v5439_v0 }
0x2511   :  { %v2775_v37 = vpop.f32.mrb[20].mxu1 }
0x2512   :  { %v2776_v38 = vadd.f32 %v6065_v52, %v2775_v37  ;;  %v4621_v40 = vpop.f32.mrb[21].mxu1 }
0x2514   :  { %5279 = vtanh.f32 %v2776_v38  ;;  %v3955_v49 = vmul.f32 -1.442695, %v2776_v38 }
0x251d   :  { %v2999_v35 = vpop.f32.mrb[22].mxu1 }
0x251e   :  { %v5280_v43 = vpop.eup %5279  ;;  %v3000_v22 = vadd.f32 %v5991_v7, %v2999_v35  ;;  %v4647_v46 = vpop.f32.mrb[23].mxu1 }
0x251f   :  { %2788 = vrot.lane.b32.xlu1 %v5280_v43, %s5442_s30 }
0x2520   :  { %5281 = vtanh.f32 %v3000_v22  ;;  %v3958_v51 = vmul.f32 -1.442695, %v3000_v22 }
0x2521   :  { %5283 = vpow2.f32 %v3955_v49 }
0x2522   :  { %5285 = vpow2.f32 %v3958_v51 }
0x252a   :  { %v5282_v47 = vpop.eup %5281 }
0x252b   :  { %3012 = vrot.lane.b32.xlu0 %v5282_v47, %s5442_s30  ;;  %v5284_v54 = vpop.eup %5283 }
0x252c   :  { %v2782_v55 = vadd.f32 1.0, %v5284_v54  ;;  %v5286_v56 = vpop.eup %5285 }
0x252d   :  { %v3006_v57 = vadd.f32 1.0, %v5286_v56 }
0x252e   :  { %5287 = vrcp.f32 %v2782_v55 }
0x252f   :  { %5289 = vrcp.f32 %v3006_v57 }
0x2538   :  { %v5288_v58 = vpop.eup %5287 }
0x2539   :  { %v5290_v61 = vpop.eup %5289  ;;  %v2786_v2 = vmul.f32 %v5288_v58, %v6186_v48 }
0x253a   :  { %v3010_v9 = vmul.f32 %v5290_v61, %v6248_v18 }
0x2591   :  { %v2789_v59 = vpop.permute.xlu1 %2788 }
0x2592   :  { %v2791_v60 = vmul.f32 %v5288_v58, %v2789_v59 }
0x2594   :  { %2793 = vrot.lane.b32.xlu1 %v2791_v60, %s5443_s14 }
0x259d   :  { %v3013_v62 = vpop.permute.xlu0 %3012 }
0x259e   :  { %v3015_v63 = vmul.f32 %v5290_v61, %v3013_v62 }
0x25a0   :  { %3017 = vrot.lane.b32.xlu0 %v3015_v63, %s5443_s14 }
0x2606   :  { %v2794_v8 = vpop.permute.xlu1 %2793 }
0x2607   :  { %v6295_v11 = vadd.f32 %v2794_v8, %v2786_v2 }
0x2609   :  { %5291 = vtanh.f32 %v6295_v11 }
0x2612   :  { %v3018_v14 = vpop.permute.xlu0 %3017 }
0x2613   :  { %v5292_v15 = vpop.eup %5291  ;;  %v6299_v17 = vadd.f32 %v3018_v14, %v3010_v9 }
0x2614   :  { %2799 = vrot.lane.b32.xlu1 %v5292_v15, %s5442_s30 }
0x2615   :  { %5293 = vtanh.f32 %v6299_v17 }
0x261f   :  { %v5294_v27 = vpop.eup %5293 }
0x2620   :  { %3023 = vrot.lane.b32.xlu0 %v5294_v27, %s5442_s30 }
0x2686   :  { %v2800_v16 = vpop.permute.xlu1 %2799 }
0x2687   :  { %v2802_v48 = vmul.f32 %v5288_v58, %v2800_v16 }
0x2689   :  { %2804 = vrot.lane.b32.xlu1 %v2802_v48, %s5443_s14 }
0x268d   :  { %3031 = vrot.lane.b32.xlu1 %v2802_v48, %s5442_s30 }
0x2692   :  { %v3024_v21 = vpop.permute.xlu0 %3023 }
0x2693   :  { %v3026_v39 = vmul.f32 %v5290_v61, %v3024_v21 }
0x2695   :  { %3028 = vrot.lane.b32.xlu0 %v3026_v39, %s5443_s14 }
0x2699   :  { %3255 = vrot.lane.b32.xlu0 %v3026_v39, %s5444_s6 }
0x26fb   :  { %v2805_v18 = vpop.permute.xlu1 %2804 }
0x26fc   :  { %4631 = vmatmul.mubr.msk.f32.vlgmr.msra.gmra.mrb[26].mxu0 %vm259_vm6, %v2805_v18 }
0x26fd   :  { %5028 = vmatpush3.bf16.msra.mxu0 %v6015_v10  ;;  %4664 = vmatprep.mubr.msk.f32.mxu0 %vm5440_vm0, %v5441_v1 }
0x26fe   :  { %5029 = vmatprep.subr.bf16.mxu0 %v5439_v0 }
0x26ff   :  { %v3032_v23 = vpop.permute.xlu1 %3031 }
0x2701   :  { %5031 = vmatpush3.bf16.msra.mxu0 %v6021_v32 }
0x2702   :  { %5032 = vmatprep.subr.bf16.mxu0 %v5439_v0 }
0x2705   :  { %5034 = vmatpush3.bf16.msra.mxu0 %v6032_v36 }
0x2706   :  { %5035 = vmatprep.subr.bf16.mxu0 %v5439_v0 }
0x2707   :  { %v3029_v4 = vpop.permute.xlu0 %3028 }
0x2708   :  { %v3034_v24 = vsel %vm259_vm6, %v3029_v4, %v3032_v23 }
0x2709   :  { %5037 = vmatpush3.bf16.msra.mxu0 %v6044_v42 }
0x270a   :  { %5044 = vmatprep.subr.bf16.mxu0 %v5439_v0 }
0x270b   :  { %v3256_v5 = vpop.permute.xlu0 %3255 }
0x270c   :  { %4665 = vmatmul.mubr.msk.f32.vlgmr.msra.gmra.mrb[28].mxu0 %vm267_vm7, %v3034_v24  ;;  %v3258_v31 = vsel %vm149_vm4, %v3253_v6, %v3256_v5  ;;  %v3569_v5 = vld [vmem:[%s6528_s1 + $0x4] sm:$0x1] }
0x270d   :  { %5046 = vmatpush3.bf16.msra.mxu0 %v5963_v45  ;;  %4690 = vmatprep.mubr.msk.f32.mxu0 %vm5440_vm0, %v5441_v1 }
0x270e   :  { %5047 = vmatprep.subr.bf16.mxu0 %v5439_v0 }
0x2711   :  { %5049 = vmatpush3.bf16.msra.mxu0 %v5969_v50 }
0x2712   :  { %5050 = vmatprep.subr.bf16.mxu0 %v5439_v0 }
0x2715   :  { %5052 = vmatpush3.bf16.msra.mxu0 %v5973_v53 }
0x2716   :  { %5065 = vmatprep.subr.bf16.mxu0 %v5439_v0 }
0x2718   :  { %4691 = vmatmul.mubr.msk.f32.vlgmr.msra.gmra.mrb[30].mxu0 %vm157_vm5, %v3258_v31  ;;  %v3572_v31 = vld [vmem:[%s6528_s1 + $0x1c] sm:$0x1] }
0x2719   :  { %5067 = vmatpush3.bf16.msra.mxu0 %v6083_v12  ;;  %4720 = vmatprep.mubr.msk.f32.mxu0 %vm5440_vm0, %v5441_v1 }
0x271a   :  { %5068 = vmatprep.subr.bf16.mxu0 %v5439_v0 }
0x271d   :  { %5070 = vmatpush3.bf16.msra.mxu0 %v6089_v13 }
0x271e   :  { %5080 = vmatprep.subr.bf16.mxu0 %v5439_v0 }
0x27cf   :  { %v2874_v19 = vpop.f32.mrb[26].mxu0 }
0x27d0   :  { %v2875_v37 = vadd.f32 %v6135_v34, %v2874_v19  ;;  %v4632_v38 = vpop.f32.mrb[27].mxu0  ;;  %v3579_v19 = vrot.slane %v3571_v29, 6 }
0x27d1   :  { %v3581_v38 = vrot.slane %v3572_v31, 5 }
0x27d2   :  { %v2885_v40 = vrot.slane %v2875_v37, %v6137_v33  ;;  %v3578_v37 = vsel %vm140_vm1, %v3577_v30, %v3569_v5 }
0x27d4   :  { %v2886_v35 = vcombine.high %v2885_v40, %v2885_v40  ;;  %v2893_v43 = vrot.slane %v2885_v40, %v6137_v33  ;;  %v3580_v40 = vsel %vm143_vm2, %v3579_v19, %v3578_v37  ;;  %v5338_v37 = vld [vmem:[%s6536_s9] ss:$0 sm:$0xff] }
0x27d6   :  { %v2900_v22 = vrot.slane %v2886_v35, %v6137_v33  ;;  %v2901_v46 = vcombine.high %v2893_v43, %v2893_v43  ;;  %2907 = vst.msk [vmem:[%s6539_s12 + $0x2] sm:$0x1] %vm2248_vm8, %v2893_v43  ;;  %v3582_v35 = vsel %vm146_vm3, %v3581_v38, %v3580_v40 }
0x27d8   :  { %v2902_v47 = vcombine.high %v2900_v22, %v2900_v22  ;;  %2908 = vst.msk [vmem:[%s6539_s12 + $0xa] sm:$0x1] %vm2248_vm8, %v2900_v22  ;;  %2909 = vst.msk [vmem:[%s6539_s12 + $0x12] sm:$0x1] %vm2248_vm8, %v2901_v46 }
0x27da   :  { %2910 = vst.msk [vmem:[%s6539_s12 + $0x1a] sm:$0x1] %vm2248_vm8, %v2902_v47 }
0x27df   :  { %v3104_v49 = vpop.f32.mrb[28].mxu0 }
0x27e0   :  { %v3105_v51 = vadd.f32 %v6065_v52, %v3104_v49  ;;  %v4666_v54 = vpop.f32.mrb[29].mxu0 }
0x27e2   :  { %5295 = vtanh.f32 %v3105_v51  ;;  %v3960_v60 = vmul.f32 -1.442695, %v3105_v51 }
0x27eb   :  { %v3328_v55 = vpop.f32.mrb[30].mxu0 }
0x27ec   :  { %v5296_v56 = vpop.eup %5295  ;;  %v3329_v57 = vadd.f32 %v5991_v7, %v3328_v55  ;;  %v4692_v58 = vpop.f32.mrb[31].mxu0 }
0x27ed   :  { %3117 = vrot.lane.b32.xlu1 %v5296_v56, %s5442_s30 }
0x27ee   :  { %5297 = vtanh.f32 %v3329_v57  ;;  %v3963_v61 = vmul.f32 -1.442695, %v3329_v57 }
0x27ef   :  { %5299 = vpow2.f32 %v3960_v60 }
0x27f0   :  { %5301 = vpow2.f32 %v3963_v61 }
0x27f8   :  { %v5298_v59 = vpop.eup %5297 }
0x27f9   :  { %3341 = vrot.lane.b32.xlu0 %v5298_v59, %s5442_s30  ;;  %v5300_v62 = vpop.eup %5299  ;;  %v5337_v59 = vld [vmem:[#allocation7] ss:$0 sm:$0xff] }
0x27fa   :  { %v3111_v63 = vadd.f32 1.0, %v5300_v62  ;;  %v5302_v2 = vpop.eup %5301 }
0x27fb   :  { %v3335_v8 = vadd.f32 1.0, %v5302_v2 }
0x27fc   :  { %5303 = vrcp.f32 %v3111_v63 }
0x27fd   :  { %5305 = vrcp.f32 %v3335_v8 }
0x2806   :  { %v5304_v9 = vpop.eup %5303 }
0x2807   :  { %v5306_v7 = vpop.eup %5305  ;;  %v3115_v48 = vmul.f32 %v5304_v9, %v6295_v11 }
0x2808   :  { %v3339_v18 = vmul.f32 %v5306_v7, %v6299_v17 }
0x285f   :  { %v3118_v14 = vpop.permute.xlu1 %3117 }
0x2860   :  { %v3120_v15 = vmul.f32 %v5304_v9, %v3118_v14 }
0x2862   :  { %3122 = vrot.lane.b32.xlu1 %v3120_v15, %s5443_s14 }
0x286b   :  { %v3342_v27 = vpop.permute.xlu0 %3341 }
0x286c   :  { %v3344_v16 = vmul.f32 %v5306_v7, %v3342_v27 }
0x286e   :  { %3346 = vrot.lane.b32.xlu0 %v3344_v16, %s5443_s14 }
0x28d4   :  { %v3123_v21 = vpop.permute.xlu1 %3122 }
0x28d5   :  { %v6379_v39 = vadd.f32 %v3123_v21, %v3115_v48 }
0x28d7   :  { %5307 = vtanh.f32 %v6379_v39 }
0x28e0   :  { %v3347_v20 = vpop.permute.xlu0 %3346 }
0x28e1   :  { %v5308_v4 = vpop.eup %5307  ;;  %v6383_v23 = vadd.f32 %v3347_v20, %v3339_v18 }
0x28e2   :  { %3128 = vrot.lane.b32.xlu1 %v5308_v4, %s5442_s30 }
0x28e3   :  { %5309 = vtanh.f32 %v6383_v23 }
0x28ed   :  { %v5310_v41 = vpop.eup %5309 }
0x28ee   :  { %3352 = vrot.lane.b32.xlu0 %v5310_v41, %s5442_s30 }
0x2954   :  { %v3129_v25 = vpop.permute.xlu1 %3128 }
0x2955   :  { %v3131_v11 = vmul.f32 %v5304_v9, %v3129_v25 }
0x2957   :  { %3133 = vrot.lane.b32.xlu1 %v3131_v11, %s5443_s14 }
0x295b   :  { %3360 = vrot.lane.b32.xlu1 %v3131_v11, %s5442_s30 }
0x2960   :  { %v3353_v24 = vpop.permute.xlu0 %3352 }
0x2961   :  { %v3355_v44 = vmul.f32 %v5306_v7, %v3353_v24 }
0x2963   :  { %3357 = vrot.lane.b32.xlu0 %v3355_v44, %s5443_s14 }
0x2967   :  { %3584 = vrot.lane.b32.xlu0 %v3355_v44, %s5444_s6 }
0x29c9   :  { %v3134_v17 = vpop.permute.xlu1 %3133 }
0x29ca   :  { %4676 = vmatmul.mubr.msk.f32.vlgmr.msra.gmra.mrb[24].mxu1 %vm259_vm6, %v3134_v17 }
0x29cb   :  { %5055 = vmatpush3.bf16.msra.mxu1 %v6015_v10  ;;  %4709 = vmatprep.mubr.msk.f32.mxu1 %vm5440_vm0, %v5441_v1 }
0x29cc   :  { %5056 = vmatprep.subr.bf16.mxu1 %v5439_v0 }
0x29cd   :  { %v3361_v3 = vpop.permute.xlu1 %3360 }
0x29cf   :  { %5058 = vmatpush3.bf16.msra.mxu1 %v6021_v32 }
0x29d0   :  { %5059 = vmatprep.subr.bf16.mxu1 %v5439_v0 }
0x29d3   :  { %5061 = vmatpush3.bf16.msra.mxu1 %v6032_v36 }
0x29d4   :  { %5062 = vmatprep.subr.bf16.mxu1 %v5439_v0 }
0x29d5   :  { %v3358_v28 = vpop.permute.xlu0 %3357 }
0x29d6   :  { %v3363_v6 = vsel %vm259_vm6, %v3358_v28, %v3361_v3 }
0x29d7   :  { %5064 = vmatpush3.bf16.msra.mxu1 %v6044_v42 }
0x29d8   :  { %5071 = vmatprep.subr.bf16.mxu1 %v5439_v0 }
0x29d9   :  { %v3585_v43 = vpop.permute.xlu0 %3584 }
0x29da   :  { %4710 = vmatmul.mubr.msk.f32.vlgmr.msra.gmra.mrb[26].mxu1 %vm267_vm7, %v3363_v6 }
0x29db   :  { %5073 = vmatpush3.bf16.msra.mxu1 %v5963_v45  ;;  %4735 = vmatprep.mubr.msk.f32.mxu1 %vm5440_vm0, %v5441_v1  ;;  %v3587_v45 = vsel %vm149_vm4, %v3582_v35, %v3585_v43 }
0x29dc   :  { %5074 = vmatprep.subr.bf16.mxu1 %v5439_v0 }
0x29df   :  { %5076 = vmatpush3.bf16.msra.mxu1 %v5969_v50 }
0x29e0   :  { %5077 = vmatprep.subr.bf16.mxu1 %v5439_v0 }
0x29e3   :  { %5079 = vmatpush3.bf16.msra.mxu1 %v5973_v53 }
0x29e4   :  { %5092 = vmatprep.subr.bf16.mxu1 %v5439_v0 }
0x29e6   :  { %4736 = vmatmul.mubr.msk.f32.vlgmr.msra.gmra.mrb[28].mxu1 %vm157_vm5, %v3587_v45 }
0x29e7   :  { %5094 = vmatpush3.bf16.msra.mxu1 %v6083_v12  ;;  %4765 = vmatprep.mubr.msk.f32.mxu1 %vm5440_vm0, %v5441_v1 }
0x29e8   :  { %5095 = vmatprep.subr.bf16.mxu1 %v5439_v0 }
0x29eb   :  { %5097 = vmatpush3.bf16.msra.mxu1 %v6089_v13 }
0x2a9d   :  { %v3203_v50 = vpop.f32.mrb[24].mxu1 }
0x2a9e   :  { %v3204_v22 = vadd.f32 %v6135_v34, %v3203_v50  ;;  %v4677_v46 = vpop.f32.mrb[25].mxu1 }
0x2aa0   :  { %v3214_v53 = vrot.slane %v3204_v22, %v6137_v33 }
0x2aa2   :  { %v3215_v47 = vcombine.high %v3214_v53, %v3214_v53  ;;  %v3222_v49 = vrot.slane %v3214_v53, %v6137_v33 }
0x2aa4   :  { %v3229_v51 = vrot.slane %v3215_v47, %v6137_v33  ;;  %v3230_v54 = vcombine.high %v3222_v49, %v3222_v49  ;;  %3236 = vst.msk [vmem:[%s6539_s12 + $0x3] sm:$0x1] %vm2248_vm8, %v3222_v49 }
0x2aa6   :  { %v3231_v12 = vcombine.high %v3229_v51, %v3229_v51  ;;  %3237 = vst.msk [vmem:[%s6539_s12 + $0xb] sm:$0x1] %vm2248_vm8, %v3229_v51  ;;  %3238 = vst.msk [vmem:[%s6539_s12 + $0x13] sm:$0x1] %vm2248_vm8, %v3230_v54 }
0x2aa8   :  { %3239 = vst.msk [vmem:[%s6539_s12 + $0x1b] sm:$0x1] %vm2248_vm8, %v3231_v12 }
0x2aad   :  { %v3433_v13 = vpop.f32.mrb[26].mxu1 }
0x2aae   :  { %v3434_v55 = vadd.f32 %v6065_v52, %v3433_v13  ;;  %v4711_v56 = vpop.f32.mrb[27].mxu1 }
0x2ab0   :  { %5311 = vtanh.f32 %v3434_v55  ;;  %v3965_v63 = vmul.f32 -1.442695, %v3434_v55 }
0x2ab9   :  { %v3657_v57 = vpop.f32.mrb[28].mxu1 }
0x2aba   :  { %v5312_v58 = vpop.eup %5311  ;;  %v3658_v60 = vadd.f32 %v5337_v59, %v3657_v57  ;;  %v4737_v61 = vpop.f32.mrb[29].mxu1 }
0x2abb   :  { %3446 = vrot.lane.b32.xlu1 %v5312_v58, %s5442_s30 }
0x2abc   :  { %5313 = vtanh.f32 %v3658_v60  ;;  %v3968_v2 = vmul.f32 -1.442695, %v3658_v60 }
0x2abd   :  { %5315 = vpow2.f32 %v3965_v63 }
0x2abe   :  { %5317 = vpow2.f32 %v3968_v2 }
0x2ac6   :  { %v5314_v62 = vpop.eup %5313 }
0x2ac7   :  { %3670 = vrot.lane.b32.xlu0 %v5314_v62, %s5442_s30  ;;  %v5316_v8 = vpop.eup %5315 }
0x2ac8   :  { %v3440_v9 = vadd.f32 1.0, %v5316_v8  ;;  %v5318_v52 = vpop.eup %5317 }
0x2ac9   :  { %v3664_v14 = vadd.f32 1.0, %v5318_v52 }
0x2aca   :  { %5319 = vrcp.f32 %v3440_v9 }
0x2acb   :  { %5321 = vrcp.f32 %v3664_v14 }
0x2ad4   :  { %v5320_v15 = vpop.eup %5319 }
0x2ad5   :  { %v5322_v16 = vpop.eup %5321  ;;  %v3444_v18 = vmul.f32 %v5320_v15, %v6379_v39 }
0x2ad6   :  { %v3668_v41 = vmul.f32 %v5322_v16, %v6383_v23 }
0x2b2d   :  { %v3447_v7 = vpop.permute.xlu1 %3446 }
0x2b2e   :  { %v3449_v27 = vmul.f32 %v5320_v15, %v3447_v7 }
0x2b30   :  { %3451 = vrot.lane.b32.xlu1 %v3449_v27, %s5443_s14 }
0x2b39   :  { %v3671_v48 = vpop.permute.xlu0 %3670 }
0x2b3a   :  { %v3673_v21 = vmul.f32 %v5322_v16, %v3671_v48 }
0x2b3c   :  { %3675 = vrot.lane.b32.xlu0 %v3673_v21, %s5443_s14 }
0x2ba2   :  { %v3452_v20 = vpop.permute.xlu1 %3451 }
0x2ba3   :  { %v3454_v4 = vadd.f32 %v3452_v20, %v3444_v18 }
0x2ba5   :  { %5323 = vtanh.f32 %v3454_v4 }
0x2bae   :  { %v3676_v25 = vpop.permute.xlu0 %3675 }
0x2baf   :  { %v5324_v11 = vpop.eup %5323  ;;  %v3678_v24 = vadd.f32 %v3676_v25, %v3668_v41 }
0x2bb0   :  { %3457 = vrot.lane.b32.xlu1 %v5324_v11, %s5442_s30 }
0x2bb1   :  { %5325 = vtanh.f32 %v3678_v24 }
0x2bbb   :  { %v5326_v44 = vpop.eup %5325 }
0x2bbc   :  { %3681 = vrot.lane.b32.xlu0 %v5326_v44, %s5442_s30 }
0x2c22   :  { %v3458_v17 = vpop.permute.xlu1 %3457 }
0x2c23   :  { %v3460_v26 = vmul.f32 %v5320_v15, %v3458_v17 }
0x2c25   :  { %3462 = vrot.lane.b32.xlu1 %v3460_v26, %s5443_s14 }
0x2c29   :  { %3689 = vrot.lane.b32.xlu1 %v3460_v26, %s5442_s30 }
0x2c2e   :  { %v3682_v39 = vpop.permute.xlu0 %3681 }
0x2c2f   :  { %v3684_v28 = vmul.f32 %v5322_v16, %v3682_v39 }
0x2c31   :  { %3686 = vrot.lane.b32.xlu0 %v3684_v28, %s5443_s14 }
0x2c97   :  { %v3463_v23 = vpop.permute.xlu1 %3462 }
0x2c98   :  { %4721 = vmatmul.mubr.msk.f32.vlgmr.msra.gmra.mrb[32].mxu0 %vm259_vm6, %v3463_v23 }
0x2c99   :  { %5082 = vmatpush3.bf16.msra.mxu0 %v6015_v10  ;;  %4754 = vmatprep.mubr.msk.f32.mxu0 %vm5440_vm0, %v5441_v1 }
0x2c9a   :  { %5083 = vmatprep.subr.bf16.mxu0 %v5439_v0 }
0x2c9b   :  { %v3690_v29 = vpop.permute.xlu1 %3689 }
0x2c9d   :  { %5085 = vmatpush3.bf16.msra.mxu0 %v6021_v32 }
0x2c9e   :  { %5086 = vmatprep.subr.bf16.mxu0 %v5439_v0 }
0x2ca1   :  { %5088 = vmatpush3.bf16.msra.mxu0 %v6032_v36 }
0x2ca2   :  { %5089 = vmatprep.subr.bf16.mxu0 %v5439_v0 }
0x2ca3   :  { %v3687_v3 = vpop.permute.xlu0 %3686 }
0x2ca4   :  { %v3692_v30 = vsel %vm259_vm6, %v3687_v3, %v3690_v29 }
0x2ca5   :  { %5091 = vmatpush3.bf16.msra.mxu0 %v6044_v42 }
0x2ca8   :  { %4755 = vmatmul.mubr.msk.f32.vlgmr.msra.gmra.mrb[34].mxu0 %vm267_vm7, %v3692_v30 }
0x2d6b   :  { %v3532_v10 = vpop.f32.mrb[32].mxu0 }
0x2d6c   :  { %v3533_v1 = vadd.f32 %v6135_v34, %v3532_v10  ;;  %v4722_v6 = vpop.f32.mrb[33].mxu0 }
0x2d6e   :  { %v3543_v32 = vrot.slane %v3533_v1, %v6137_v33 }
0x2d70   :  { %v3544_v5 = vcombine.high %v3543_v32, %v3543_v32  ;;  %v3551_v31 = vrot.slane %v3543_v32, %v6137_v33 }
0x2d72   :  { %v3558_v36 = vrot.slane %v3544_v5, %v6137_v33  ;;  %v3559_v0 = vcombine.high %v3551_v31, %v3551_v31  ;;  %3565 = vst.msk [vmem:[%s6539_s12 + $0x4] sm:$0x1] %vm2248_vm8, %v3551_v31 }
0x2d74   :  { %v3560_v42 = vcombine.high %v3558_v36, %v3558_v36  ;;  %3566 = vst.msk [vmem:[%s6539_s12 + $0xc] sm:$0x1] %vm2248_vm8, %v3558_v36  ;;  %3567 = vst.msk [vmem:[%s6539_s12 + $0x14] sm:$0x1] %vm2248_vm8, %v3559_v0 }
0x2d76   :  { %3568 = vst.msk [vmem:[%s6539_s12 + $0x1c] sm:$0x1] %vm2248_vm8, %v3560_v42 }
0x2d7b   :  { %v3762_v19 = vpop.f32.mrb[34].mxu0 }
0x2d7c   :  { %v3763_v38 = vadd.f32 %v5338_v37, %v3762_v19  ;;  %v4756_v40 = vpop.f32.mrb[35].mxu0 }
0x2d7e   :  { %5327 = vtanh.f32 %v3763_v38  ;;  %v3970_v43 = vmul.f32 -1.442695, %v3763_v38 }
0x2d80   :  { %5329 = vpow2.f32 %v3970_v43 }
0x2d88   :  { %v5328_v35 = vpop.eup %5327 }
0x2d89   :  { %3775 = vrot.lane.b32.xlu0 %v5328_v35, %s5442_s30 }
0x2d8a   :  { %v5330_v45 = vpop.eup %5329 }
0x2d8b   :  { %v3769_v50 = vadd.f32 1.0, %v5330_v45 }
0x2d8d   :  { %5331 = vrcp.f32 %v3769_v50 }
0x2d97   :  { %v5332_v22 = vpop.eup %5331 }
0x2d98   :  { %v3773_v47 = vmul.f32 %v5332_v22, %v3454_v4 }
0x2dfb   :  { %v3776_v46 = vpop.permute.xlu0 %3775 }
0x2dfc   :  { %v3778_v53 = vmul.f32 %v5332_v22, %v3776_v46 }
0x2dfe   :  { %3780 = vrot.lane.b32.xlu1 %v3778_v53, %s5443_s14 }
0x2e70   :  { %v3781_v49 = vpop.permute.xlu1 %3780 }
0x2e71   :  { %v3783_v51 = vadd.f32 %v3781_v49, %v3773_v47 }
0x2e73   :  { %5333 = vtanh.f32 %v3783_v51 }
0x2e7d   :  { %v5334_v54 = vpop.eup %5333 }
0x2e7e   :  { %3786 = vrot.lane.b32.xlu0 %v5334_v54, %s5442_s30 }
0x2ef0   :  { %v3787_v12 = vpop.permute.xlu0 %3786 }
0x2ef1   :  { %v3789_v13 = vmul.f32 %v5332_v22, %v3787_v12 }
0x2ef3   :  { %3791 = vrot.lane.b32.xlu1 %v3789_v13, %s5443_s14 }
0x2f65   :  { %v3792_v55 = vpop.permute.xlu1 %3791 }
0x2f66   :  { %4766 = vmatmul.mubr.msk.f32.vlgmr.msra.gmra.mrb[30].mxu1 %vm259_vm6, %v3792_v55 }
0x3039   :  { %v3861_v56 = vpop.f32.mrb[30].mxu1 }
0x303a   :  { %v3862_v57 = vadd.f32 %v6135_v34, %v3861_v56  ;;  %v4767_v58 = vpop.f32.mrb[31].mxu1 }
0x303c   :  { %v3872_v59 = vrot.slane %v3862_v57, %v6137_v33 }
0x303e   :  { %v3873_v60 = vcombine.high %v3872_v59, %v3872_v59  ;;  %v3880_v61 = vrot.slane %v3872_v59, %v6137_v33 }
0x3040   :  { %v3887_v62 = vrot.slane %v3873_v60, %v6137_v33  ;;  %v3888_v63 = vcombine.high %v3880_v61, %v3880_v61  ;;  %3894 = vst.msk [vmem:[%s6539_s12 + $0x5] sm:$0x1] %vm2248_vm8, %v3880_v61 }
0x3042   :  { %v3889_v2 = vcombine.high %v3887_v62, %v3887_v62  ;;  %3895 = vst.msk [vmem:[%s6539_s12 + $0xd] sm:$0x1] %vm2248_vm8, %v3887_v62  ;;  %3896 = vst.msk [vmem:[%s6539_s12 + $0x15] sm:$0x1] %vm2248_vm8, %v3888_v63 }
0x3044   :  { %3897 = vst.msk [vmem:[%s6539_s12 + $0x1d] sm:$0x1] %vm2248_vm8, %v3889_v2 }
0x3045   :  { %3902 = vsyncpa [#allocation3], 1 }
0x3046   :  { %3903 = vsyncpa [#allocation5], 1 }
0x3047   :  { %3904 = vsyncpa [#allocation8], 1 }

</bundles_post_ra>
